<compile_context>
chip_gen: v7x
topology: tpu7x:2x2x1
jax: 0.10.0
libtpu: 0.0.40
codegen_flags: <defaults>
</compile_context>

<pallas_src>
import functools
import math

import jax
import jax.numpy as jnp
from jax.experimental import pallas as pl
from jax.experimental.pallas import tpu as pltpu

# ----------------------------- small synthetic config -----------------------------
IMAGE_SIZE = 16          # per-patch tile size (stands in for 512)
MAX_IMG_SIZE = 64        # stands in for 1536 (resize branch not exercised)
PATCH = 4                # ViT patch size (stands in for 16)
EMBED_DIM = 32           # stands in for 192
NUM_HEADS = 2            # stands in for 3
DEPTH = 4                # stands in for 12 (one block per interaction stage)
MLP_HIDDEN = 64
DEC_HIDDEN = 32          # stands in for 512
NUM_CLS = 2
LN_EPS = 1e-6            # timm-ViT convention (PyTorch nn.LayerNorm default is 1e-5)


# ------------------------------- tiling helpers -----------------------------------

def _patch_tile(bn, cap=2):
    """Patches per grid step.  Prefer many grid steps (even count, >= 8) so the
    'parallel' axis keeps the pipeline double-buffered and shards evenly across the
    two TensorCores on v7x; PB is capped low so whole-sequence attention stays well
    inside VMEM at real scale (T=1024)."""
    divs = [d for d in range(1, min(bn, cap) + 1) if bn % d == 0]
    for d in sorted(divs, reverse=True):          # largest PB with even grid >= 8
        g = bn // d
        if g >= 8 and g % 2 == 0:
            return d
    for d in sorted(divs, reverse=True):          # else: any even grid
        if (bn // d) % 2 == 0:
            return d
    return max(divs)


def _full_spec(a):
    """Whole-array block, constant index map -> DMA'd once, VMEM-resident across the
    whole grid.  TODO(synk): on v7x mark these pipeline_mode=pl.Buffered(1) to halve
    the resident weight footprint under the 64 MiB VMEM."""
    return pl.BlockSpec(a.shape, lambda i, _nd=a.ndim: (0,) * _nd)


# ================================ fused Pallas kernel ==============================

def _segmenter_core_kernel(x_ref,
                           pe_w_ref, pe_b_ref, pos_ref,
                           ln1_g_ref, ln1_b_ref, qkv_w_ref, qkv_b_ref,
                           proj_w_ref, proj_b_ref, ln2_g_ref, ln2_b_ref,
                           fc1_w_ref, fc1_b_ref, fc2_w_ref, fc2_b_ref,
                           lat_w_ref, lat_b_ref, fuse_w_ref, fuse_b_ref,
                           cls_w_ref, cls_b_ref,
                           o_ref,
                           attn_sc,
                           *, depth, num_heads, scale, eps, num_cls):
    """Patch-embed + DEPTH transformer blocks + UperNet-style decoder tail for a tile
    of PB patches (T tokens each).  Output is class-major (PB, num_cls, T) so the
    HBM-facing store is lane-dense along the token axis."""
    PB, T, K = x_ref.shape
    D = pos_ref.shape[-1]
    hd = D // num_heads
    N = PB * T

    # TODO(synk): PyTorch nn.GELU is exact erf; the tanh approximation is kept here
    # (guaranteed Mosaic lowering) - small systematic numeric deviation.
    def _gelu(v):
        return jax.nn.gelu(v)

    def _layernorm(v, g, b):
        # one-pass statistics: E[x], E[x^2]  (one VALU pass / XLU reduce fewer)
        mu = jnp.mean(v, axis=-1, keepdims=True)
        ms = jnp.mean(v * v, axis=-1, keepdims=True)
        var = ms - mu * mu
        return (v - mu) * jax.lax.rsqrt(var + eps) * g + b

    # ---- patch embed + positional embedding (f32 residual stream) ----
    x = x_ref[...].reshape(N, K)                                            # bf16
    tok = jnp.dot(x, pe_w_ref[...], preferred_element_type=jnp.float32) + pe_b_ref[...]
    tok = (tok.reshape(PB, T, D) + pos_ref[...][None]).reshape(N, D)

    # ---- transformer blocks (all weights VMEM-resident, activations never leave VMEM)
    taps = []
    for d in range(depth):
        # LN1 -> QKV
        h = _layernorm(tok, ln1_g_ref[d], ln1_b_ref[d])
        qkv = jnp.dot(h.astype(jnp.bfloat16), qkv_w_ref[d],
                      preferred_element_type=jnp.float32) + qkv_b_ref[d]    # (N, 3D)

        # multi-head attention: scale folded into q, per-head output written into a
        # VMEM scratch (bounds live ranges), then ONE full-D projection matmul.
        # TODO(synk): at real scale (hd=64, T=1024) KV-tile this (online softmax) and
        # pad/pack the head contraction dim toward 128 for MXU fill.
        for hh in range(num_heads):
            q = (qkv[:, hh * hd:(hh + 1) * hd] * scale
                 ).reshape(PB, T, hd).astype(jnp.bfloat16)
            k = qkv[:, D + hh * hd:D + (hh + 1) * hd
                    ].reshape(PB, T, hd).astype(jnp.bfloat16)
            v = qkv[:, 2 * D + hh * hd:2 * D + (hh + 1) * hd
                    ].reshape(PB, T, hd).astype(jnp.bfloat16)
            s = jnp.einsum("bqd,bkd->bqk", q, k, preferred_element_type=jnp.float32)
            s = s - jnp.max(s, axis=-1, keepdims=True)
            p = jnp.exp(s)
            # approx reciprocal (EUP slot); ~1e-3 relative deviation from exact softmax
            p = p * pl.reciprocal(jnp.sum(p, axis=-1, keepdims=True), approx=True)
            oh = jnp.einsum("bqk,bkd->bqd", p.astype(jnp.bfloat16), v,
                            preferred_element_type=jnp.float32)
            attn_sc[:, hh * hd:(hh + 1) * hd] = oh.reshape(N, hd).astype(attn_sc.dtype)

        attn = jnp.dot(attn_sc[...], proj_w_ref[d],
                       preferred_element_type=jnp.float32) + proj_b_ref[d]
        tok = tok + attn                                                     # residual 1

        # LN2 -> MLP
        h = _layernorm(tok, ln2_g_ref[d], ln2_b_ref[d])
        h = jnp.dot(h.astype(jnp.bfloat16), fc1_w_ref[d],
                    preferred_element_type=jnp.float32) + fc1_b_ref[d]
        h = _gelu(h)
        h = jnp.dot(h.astype(jnp.bfloat16), fc2_w_ref[d],
                    preferred_element_type=jnp.float32) + fc2_b_ref[d]
        tok = tok + h                                                        # residual 2

        if d >= depth - 4:                       # one pyramid tap per interaction stage
            taps.append(tok.astype(jnp.bfloat16))

    # ---- decoder tail: laterals (concat in VMEM only) -> fuse+GELU -> cls -> softmax
    xcat = jnp.concatenate(taps, axis=-1)                                    # (N, 4D) bf16
    lat = jnp.dot(xcat, lat_w_ref[...], preferred_element_type=jnp.float32) + lat_b_ref[...]
    h = jnp.dot(lat.astype(jnp.bfloat16), fuse_w_ref[...],
                preferred_element_type=jnp.float32) + fuse_b_ref[...]
    h = _gelu(h)
    logits = jnp.dot(h.astype(jnp.bfloat16), cls_w_ref[...],
                     preferred_element_type=jnp.float32) + cls_b_ref[...]    # (N, num_cls)
    z = logits - jnp.max(logits, axis=-1, keepdims=True)
    e = jnp.exp(z)
    probs = e / jnp.sum(e, axis=-1, keepdims=True)      # exact division: rows sum to 1
    probs = probs.reshape(PB, T, num_cls)

    # store class-major so the HBM-facing block is (PB, num_cls, T): tokens on lanes
    for c in range(num_cls):
        o_ref[:, c, :] = probs[:, :, c].astype(o_ref.dtype)


def pallas_segmenter_core(params, x_tok):
    """x_tok: (Bn, T, C*P*P) bf16 -> per-token class probabilities (Bn, NUM_CLS, T) f32."""
    Bn, T, K = x_tok.shape
    enc, dec = params["encoder"], params["decoder"]
    D = enc["patch_w"].shape[1]
    PB = _patch_tile(Bn)
    scale = 1.0 / math.sqrt(D // NUM_HEADS)

    weights = [enc["patch_w"], enc["patch_b"], enc["pos_emb"],
               enc["ln1_g"], enc["ln1_b"], enc["qkv_w"], enc["qkv_b"],
               enc["proj_w"], enc["proj_b"], enc["ln2_g"], enc["ln2_b"],
               enc["fc1_w"], enc["fc1_b"], enc["fc2_w"], enc["fc2_b"],
               dec["lat_w"], dec["lat_b"], dec["fuse_w"], dec["fuse_b"],
               dec["cls_w"], dec["cls_b"]]

    kernel = functools.partial(_segmenter_core_kernel, depth=DEPTH,
                               num_heads=NUM_HEADS, scale=scale, eps=LN_EPS,
                               num_cls=NUM_CLS)
    # TODO(synk): at real scale re-derive vmem_limit_bytes per chip
    # (pltpu.get_tpu_info); 32 MiB is safe on v5e/v6e/v7x and above v5e's 16 MiB default.
    return pl.pallas_call(
        kernel,
        grid=(Bn // PB,),
        in_specs=[pl.BlockSpec((PB, T, K), lambda i: (i, 0, 0))]
                 + [_full_spec(w) for w in weights],
        out_specs=pl.BlockSpec((PB, NUM_CLS, T), lambda i: (i, 0, 0)),
        out_shape=jax.ShapeDtypeStruct((Bn, NUM_CLS, T), jnp.float32),
        scratch_shapes=[pltpu.VMEM((PB * T, D), jnp.bfloat16)],
        compiler_params=pltpu.CompilerParams(
            dimension_semantics=("parallel",),
            vmem_limit_bytes=32 * 1024 * 1024),
    )(x_tok, *weights)


# =============================== Segmenter forward ================================
# TODO(synk): ViTAdapter's spatial-prior conv stem + deformable-attention
# injectors/extractors have no clean small Pallas equivalent; a plain ViT with one
# feature tap per interaction stage is used.  UperNet's PSP pooling / 3x3 convs /
# BN / bilinear upsample are replaced by fused 1x1 convs + GELU + nearest upsample.

def segmenter_forward(params, x):
    B0, C0, H0, W0 = x.shape
    # TODO(synk): max_img_size torchvision.Resize branch (and the final resize-back)
    # is not exercised for H0, W0 <= MAX_IMG_SIZE; bilinear resize left unimplemented.
    pad_H = (H0 // IMAGE_SIZE + 1) * IMAGE_SIZE - H0     # matches the PyTorch padding
    pad_W = (W0 // IMAGE_SIZE + 1) * IMAGE_SIZE - W0
    x = jnp.pad(x, ((0, 0), (0, 0), (0, pad_H), (0, pad_W)))

    B, C, H, W = x.shape
    p = IMAGE_SIZE
    h, w = H // p, W // p
    gh = gw = p // PATCH
    T = gh * gw

    # patchify + per-patch tokenisation fused into one reshape/transpose; bf16 so the
    # kernel's activation read is half-width (operands are bf16 on the MXU anyway).
    x = x.astype(jnp.bfloat16)
    xt = x.reshape(B, C, h, gh, PATCH, w, gw, PATCH)
    xt = jnp.transpose(xt, (0, 2, 5, 3, 6, 1, 4, 7))          # B h w gh gw C P P
    xt = xt.reshape(B * h * w, T, C * PATCH * PATCH)

    # forward_patch: the per-sample PyTorch loop == one batched call (no cross-batch ops)
    probs = pallas_segmenter_core(params, xt)                 # (B*h*w, NUM_CLS, T) f32

    # nearest upsample (replaces bilinear; commutes with softmax) + unpatchify + NCHW,
    # as a single broadcast -> transpose -> reshape (one fused full-res XLA pass)
    sh, sw = p // gh, p // gw
    m = probs.reshape(B, h, w, NUM_CLS, gh, gw)
    m = jnp.broadcast_to(m[:, :, :, :, :, None, :, None],
                         (B, h, w, NUM_CLS, gh, sh, gw, sw))
    m = jnp.transpose(m, (0, 3, 1, 4, 5, 2, 6, 7))            # B C h gh sh w gw sw
    m = m.reshape(B, NUM_CLS, H, W)
    return m[:, :, :H0, :W0]


# ================================= parameter init =================================

def init_params(key):
    keys = iter(jax.random.split(key, 64))

    def nrm(shape, scale=0.02, dtype=jnp.bfloat16):
        # matmul weights kept in bf16 (deliberate: halves the resident VMEM/HBM weight
        # footprint; f32 accumulation on the MXU).  LN/bias/pos params stay f32.
        return (scale * jax.random.normal(next(keys), shape, jnp.float32)).astype(dtype)

    D = EMBED_DIM
    T = (IMAGE_SIZE // PATCH) ** 2

    def stack(fn):
        return jnp.stack([fn() for _ in range(DEPTH)], axis=0)

    enc = {
        "patch_w": nrm((3 * PATCH * PATCH, D)),
        "patch_b": jnp.zeros((1, D), jnp.float32),
        "pos_emb": nrm((T, D), dtype=jnp.float32),
        # per-block params stacked on a leading DEPTH axis: the whole stack is
        # VMEM-resident in the single fused kernel
        "ln1_g": jnp.ones((DEPTH, 1, D), jnp.float32),
        "ln1_b": jnp.zeros((DEPTH, 1, D), jnp.float32),
        "qkv_w": stack(lambda: nrm((D, 3 * D))),
        "qkv_b": jnp.zeros((DEPTH, 1, 3 * D), jnp.float32),
        "proj_w": stack(lambda: nrm((D, D))),
        "proj_b": jnp.zeros((DEPTH, 1, D), jnp.float32),
        "ln2_g": jnp.ones((DEPTH, 1, D), jnp.float32),
        "ln2_b": jnp.zeros((DEPTH, 1, D), jnp.float32),
        "fc1_w": stack(lambda: nrm((D, MLP_HIDDEN))),
        "fc1_b": jnp.zeros((DEPTH, 1, MLP_HIDDEN), jnp.float32),
        "fc2_w": stack(lambda: nrm((MLP_HIDDEN, D))),
        "fc2_b": jnp.zeros((DEPTH, 1, D), jnp.float32),
    }
    # 4 lateral 1x1 convs on the 4 taps, summed == one matmul on channel-concat feats
    dec = {
        "lat_w": jnp.concatenate([nrm((D, DEC_HIDDEN)) for _ in range(4)], axis=0),
        "lat_b": jnp.zeros((1, DEC_HIDDEN), jnp.float32),      # sum of 4 (zero) biases
        "fuse_w": nrm((DEC_HIDDEN, DEC_HIDDEN)),
        "fuse_b": jnp.zeros((1, DEC_HIDDEN), jnp.float32),
        "cls_w": nrm((DEC_HIDDEN, NUM_CLS)),
        "cls_b": jnp.zeros((1, NUM_CLS), jnp.float32),
    }
    return {"encoder": enc, "decoder": dec}


# ===================================== main =======================================

if __name__ == "__main__":
    key = jax.random.PRNGKey(0)
    pkey, xkey = jax.random.split(key)
    params = init_params(pkey)

    # small NCHW input, not a multiple of IMAGE_SIZE, to exercise pad/patchify/crop
    x = jax.random.normal(xkey, (2, 3, 40, 24), jnp.float32)

    fwd = jax.jit(segmenter_forward)
    out = jax.block_until_ready(fwd(params, x))

    assert out.shape == (2, NUM_CLS, 40, 24), out.shape
    assert out.dtype == jnp.float32
    # per-pixel class probabilities should sum to 1 (softmax activation over dim=1)
    s = jnp.sum(out, axis=1)
    assert bool(jnp.all(jnp.abs(s - 1.0) < 1e-4))
    print("KERNEL_OK")
</pallas_src>

<mosaic_0001>
module attributes {stable_mosaic.version = 11 : i64} {
  func.func @_segmenter_core_kernel(%arg0: i32, %arg1: memref<1x16x48xbf16, #tpu.memory_space<vmem>>, %arg2: memref<48x32xbf16, #tpu.memory_space<vmem>>, %arg3: memref<1x32xf32, #tpu.memory_space<vmem>>, %arg4: memref<16x32xf32, #tpu.memory_space<vmem>>, %arg5: memref<4x1x32xf32, #tpu.memory_space<vmem>>, %arg6: memref<4x1x32xf32, #tpu.memory_space<vmem>>, %arg7: memref<4x32x96xbf16, #tpu.memory_space<vmem>>, %arg8: memref<4x1x96xf32, #tpu.memory_space<vmem>>, %arg9: memref<4x32x32xbf16, #tpu.memory_space<vmem>>, %arg10: memref<4x1x32xf32, #tpu.memory_space<vmem>>, %arg11: memref<4x1x32xf32, #tpu.memory_space<vmem>>, %arg12: memref<4x1x32xf32, #tpu.memory_space<vmem>>, %arg13: memref<4x32x64xbf16, #tpu.memory_space<vmem>>, %arg14: memref<4x1x64xf32, #tpu.memory_space<vmem>>, %arg15: memref<4x64x32xbf16, #tpu.memory_space<vmem>>, %arg16: memref<4x1x32xf32, #tpu.memory_space<vmem>>, %arg17: memref<128x32xbf16, #tpu.memory_space<vmem>>, %arg18: memref<1x32xf32, #tpu.memory_space<vmem>>, %arg19: memref<32x32xbf16, #tpu.memory_space<vmem>>, %arg20: memref<1x32xf32, #tpu.memory_space<vmem>>, %arg21: memref<32x2xbf16, #tpu.memory_space<vmem>>, %arg22: memref<1x2xf32, #tpu.memory_space<vmem>>, %arg23: memref<1x2x16xf32, #tpu.memory_space<vmem>>, %arg24: memref<16x32xbf16, #tpu.memory_space<vmem>>) attributes {dimension_semantics = [#tpu.dimension_semantics<parallel>], iteration_bounds = array<i64: 12>, scalar_prefetch = 0 : i64, scratch_operands = 1 : i64, tpu.core_type = #tpu.core_type<tc>, window_params = [{transform_indices = @transform_0, window_bounds = array<i64: 1, 16, 48>}, {pipeline_mode = #tpu.pipeline_mode<synchronous>, transform_indices = @transform_1, window_bounds = array<i64: 48, 32>}, {pipeline_mode = #tpu.pipeline_mode<synchronous>, transform_indices = @transform_2, window_bounds = array<i64: 1, 32>}, {pipeline_mode = #tpu.pipeline_mode<synchronous>, transform_indices = @transform_3, window_bounds = array<i64: 16, 32>}, {pipeline_mode = #tpu.pipeline_mode<synchronous>, transform_indices = @transform_4, window_bounds = array<i64: 4, 1, 32>}, {pipeline_mode = #tpu.pipeline_mode<synchronous>, transform_indices = @transform_5, window_bounds = array<i64: 4, 1, 32>}, {pipeline_mode = #tpu.pipeline_mode<synchronous>, transform_indices = @transform_6, window_bounds = array<i64: 4, 32, 96>}, {pipeline_mode = #tpu.pipeline_mode<synchronous>, transform_indices = @transform_7, window_bounds = array<i64: 4, 1, 96>}, {pipeline_mode = #tpu.pipeline_mode<synchronous>, transform_indices = @transform_8, window_bounds = array<i64: 4, 32, 32>}, {pipeline_mode = #tpu.pipeline_mode<synchronous>, transform_indices = @transform_9, window_bounds = array<i64: 4, 1, 32>}, {pipeline_mode = #tpu.pipeline_mode<synchronous>, transform_indices = @transform_10, window_bounds = array<i64: 4, 1, 32>}, {pipeline_mode = #tpu.pipeline_mode<synchronous>, transform_indices = @transform_11, window_bounds = array<i64: 4, 1, 32>}, {pipeline_mode = #tpu.pipeline_mode<synchronous>, transform_indices = @transform_12, window_bounds = array<i64: 4, 32, 64>}, {pipeline_mode = #tpu.pipeline_mode<synchronous>, transform_indices = @transform_13, window_bounds = array<i64: 4, 1, 64>}, {pipeline_mode = #tpu.pipeline_mode<synchronous>, transform_indices = @transform_14, window_bounds = array<i64: 4, 64, 32>}, {pipeline_mode = #tpu.pipeline_mode<synchronous>, transform_indices = @transform_15, window_bounds = array<i64: 4, 1, 32>}, {pipeline_mode = #tpu.pipeline_mode<synchronous>, transform_indices = @transform_16, window_bounds = array<i64: 128, 32>}, {pipeline_mode = #tpu.pipeline_mode<synchronous>, transform_indices = @transform_17, window_bounds = array<i64: 1, 32>}, {pipeline_mode = #tpu.pipeline_mode<synchronous>, transform_indices = @transform_18, window_bounds = array<i64: 32, 32>}, {pipeline_mode = #tpu.pipeline_mode<synchronous>, transform_indices = @transform_19, window_bounds = array<i64: 1, 32>}, {pipeline_mode = #tpu.pipeline_mode<synchronous>, transform_indices = @transform_20, window_bounds = array<i64: 32, 2>}, {pipeline_mode = #tpu.pipeline_mode<synchronous>, transform_indices = @transform_21, window_bounds = array<i64: 1, 2>}, {transform_indices = @transform_22, window_bounds = array<i64: 1, 2, 16>}]} {
    %c0 = arith.constant 0 : index
    %c0_0 = arith.constant 0 : index
    %c0_1 = arith.constant 0 : index
    %0 = vector.load %arg1[%c0, %c0_0, %c0_1] : memref<1x16x48xbf16, #tpu.memory_space<vmem>>, vector<1x16x48xbf16>
    %1 = vector.shape_cast %0 : vector<1x16x48xbf16> to vector<16x48xbf16>
    %c0_2 = arith.constant 0 : index
    %c0_3 = arith.constant 0 : index
    %2 = vector.load %arg2[%c0_2, %c0_3] : memref<48x32xbf16, #tpu.memory_space<vmem>>, vector<48x32xbf16>
    %cst = arith.constant dense<0.000000e+00> : vector<16x32xf32>
    %3 = tpu.matmul %1, %2, %cst {dimension_numbers = #tpu.dot_dimension_numbers<[1], [0], [0], [1], [0, 0, 1, 1], [], []>} : vector<16x48xbf16>, vector<48x32xbf16>, vector<16x32xf32> -> vector<16x32xf32>
    %c0_4 = arith.constant 0 : index
    %c0_5 = arith.constant 0 : index
    %4 = vector.load %arg3[%c0_4, %c0_5] : memref<1x32xf32, #tpu.memory_space<vmem>>, vector<1x32xf32>
    %5 = vector.broadcast %4 : vector<1x32xf32> to vector<16x32xf32>
    %6 = arith.addf %3, %5 : vector<16x32xf32>
    %7 = vector.shape_cast %6 : vector<16x32xf32> to vector<1x16x32xf32>
    %c0_6 = arith.constant 0 : index
    %c0_7 = arith.constant 0 : index
    %8 = vector.load %arg4[%c0_6, %c0_7] : memref<16x32xf32, #tpu.memory_space<vmem>>, vector<16x32xf32>
    %9 = vector.shape_cast %8 : vector<16x32xf32> to vector<1x16x32xf32>
    %10 = arith.addf %7, %9 : vector<1x16x32xf32>
    %11 = vector.shape_cast %10 : vector<1x16x32xf32> to vector<16x32xf32>
    %c0_8 = arith.constant 0 : index
    %c0_9 = arith.constant 0 : index
    %c0_10 = arith.constant 0 : index
    %12 = vector.load %arg5[%c0_8, %c0_9, %c0_10] : memref<4x1x32xf32, #tpu.memory_space<vmem>>, vector<1x1x32xf32>
    %13 = vector.shape_cast %12 : vector<1x1x32xf32> to vector<1x32xf32>
    %c0_11 = arith.constant 0 : index
    %c0_12 = arith.constant 0 : index
    %c0_13 = arith.constant 0 : index
    %14 = vector.load %arg6[%c0_11, %c0_12, %c0_13] : memref<4x1x32xf32, #tpu.memory_space<vmem>>, vector<1x1x32xf32>
    %15 = vector.shape_cast %14 : vector<1x1x32xf32> to vector<1x32xf32>
    %cst_14 = arith.constant dense<0.000000e+00> : vector<16xf32>
    %16 = vector.multi_reduction <add>, %11, %cst_14 [1] : vector<16x32xf32> to vector<16xf32>
    %17 = vector.shape_cast %16 : vector<16xf32> to vector<16x1xf32>
    %cst_15 = arith.constant 3.200000e+01 : f32
    %18 = vector.broadcast %cst_15 : f32 to vector<16x1xf32>
    %19 = arith.divf %17, %18 : vector<16x1xf32>
    %20 = arith.mulf %11, %11 : vector<16x32xf32>
    %cst_16 = arith.constant dense<0.000000e+00> : vector<16xf32>
    %21 = vector.multi_reduction <add>, %20, %cst_16 [1] : vector<16x32xf32> to vector<16xf32>
    %22 = vector.shape_cast %21 : vector<16xf32> to vector<16x1xf32>
    %cst_17 = arith.constant 3.200000e+01 : f32
    %23 = vector.broadcast %cst_17 : f32 to vector<16x1xf32>
    %24 = arith.divf %22, %23 : vector<16x1xf32>
    %25 = arith.mulf %19, %19 : vector<16x1xf32>
    %26 = arith.subf %24, %25 : vector<16x1xf32>
    %27 = vector.broadcast %19 : vector<16x1xf32> to vector<16x32xf32>
    %28 = arith.subf %11, %27 : vector<16x32xf32>
    %cst_18 = arith.constant 9.99999997E-7 : f32
    %29 = vector.broadcast %cst_18 : f32 to vector<16x1xf32>
    %30 = arith.addf %26, %29 : vector<16x1xf32>
    %31 = math.rsqrt %30 : vector<16x1xf32>
    %32 = vector.broadcast %31 : vector<16x1xf32> to vector<16x32xf32>
    %33 = arith.mulf %28, %32 : vector<16x32xf32>
    %34 = vector.broadcast %13 : vector<1x32xf32> to vector<16x32xf32>
    %35 = arith.mulf %33, %34 : vector<16x32xf32>
    %36 = vector.broadcast %15 : vector<1x32xf32> to vector<16x32xf32>
    %37 = arith.addf %35, %36 : vector<16x32xf32>
    %38 = arith.truncf %37 : vector<16x32xf32> to vector<16x32xbf16>
    %c0_19 = arith.constant 0 : index
    %c0_20 = arith.constant 0 : index
    %c0_21 = arith.constant 0 : index
    %39 = vector.load %arg7[%c0_19, %c0_20, %c0_21] : memref<4x32x96xbf16, #tpu.memory_space<vmem>>, vector<1x32x96xbf16>
    %40 = vector.shape_cast %39 : vector<1x32x96xbf16> to vector<32x96xbf16>
    %cst_22 = arith.constant dense<0.000000e+00> : vector<16x96xf32>
    %41 = tpu.matmul %38, %40, %cst_22 {dimension_numbers = #tpu.dot_dimension_numbers<[1], [0], [0], [1], [0, 0, 1, 1], [], []>} : vector<16x32xbf16>, vector<32x96xbf16>, vector<16x96xf32> -> vector<16x96xf32>
    %c0_23 = arith.constant 0 : index
    %c0_24 = arith.constant 0 : index
    %c0_25 = arith.constant 0 : index
    %42 = vector.load %arg8[%c0_23, %c0_24, %c0_25] : memref<4x1x96xf32, #tpu.memory_space<vmem>>, vector<1x1x96xf32>
    %43 = vector.shape_cast %42 : vector<1x1x96xf32> to vector<1x96xf32>
    %44 = vector.broadcast %43 : vector<1x96xf32> to vector<16x96xf32>
    %45 = arith.addf %41, %44 : vector<16x96xf32>
    %46 = vector.extract_strided_slice %45 {offsets = [0, 0], sizes = [16, 16], strides = [1, 1]} : vector<16x96xf32> to vector<16x16xf32>
    %cst_26 = arith.constant 2.500000e-01 : f32
    %47 = vector.broadcast %cst_26 : f32 to vector<16x16xf32>
    %48 = arith.mulf %46, %47 : vector<16x16xf32>
    %49 = vector.shape_cast %48 : vector<16x16xf32> to vector<1x16x16xf32>
    %50 = arith.truncf %49 : vector<1x16x16xf32> to vector<1x16x16xbf16>
    %51 = vector.extract_strided_slice %45 {offsets = [0, 32], sizes = [16, 16], strides = [1, 1]} : vector<16x96xf32> to vector<16x16xf32>
    %52 = vector.shape_cast %51 : vector<16x16xf32> to vector<1x16x16xf32>
    %53 = arith.truncf %52 : vector<1x16x16xf32> to vector<1x16x16xbf16>
    %54 = vector.extract_strided_slice %45 {offsets = [0, 64], sizes = [16, 16], strides = [1, 1]} : vector<16x96xf32> to vector<16x16xf32>
    %55 = vector.shape_cast %54 : vector<16x16xf32> to vector<1x16x16xf32>
    %56 = arith.truncf %55 : vector<1x16x16xf32> to vector<1x16x16xbf16>
    "tpu.trace_start"() <{level = 10 : i32, message = "bqd,bkd->bqk"}> : () -> ()
    %cst_27 = arith.constant dense<0.000000e+00> : vector<1x16x16xf32>
    %57 = tpu.matmul %50, %53, %cst_27 {dimension_numbers = #tpu.dot_dimension_numbers<[2], [2], [1], [1], [0, 0, 0, 1, 1, 1], [0], [0]>} : vector<1x16x16xbf16>, vector<1x16x16xbf16>, vector<1x16x16xf32> -> vector<1x16x16xf32>
    "tpu.trace_stop"() : () -> ()
    %cst_28 = arith.constant dense<0xFF800000> : vector<1x16xf32>
    %58 = vector.multi_reduction <maximumf>, %57, %cst_28 [2] : vector<1x16x16xf32> to vector<1x16xf32>
    %59 = vector.shape_cast %58 : vector<1x16xf32> to vector<1x16x1xf32>
    %60 = vector.broadcast %59 : vector<1x16x1xf32> to vector<1x16x16xf32>
    %61 = arith.subf %57, %60 : vector<1x16x16xf32>
    %62 = math.exp %61 : vector<1x16x16xf32>
    %cst_29 = arith.constant dense<0.000000e+00> : vector<1x16xf32>
    %63 = vector.multi_reduction <add>, %62, %cst_29 [2] : vector<1x16x16xf32> to vector<1x16xf32>
    %64 = vector.shape_cast %63 : vector<1x16xf32> to vector<1x16x1xf32>
    %65 = tpu.reciprocal %64 {approx = true} : vector<1x16x1xf32> -> vector<1x16x1xf32>
    %66 = vector.broadcast %65 : vector<1x16x1xf32> to vector<1x16x16xf32>
    %67 = arith.mulf %62, %66 : vector<1x16x16xf32>
    %68 = arith.truncf %67 : vector<1x16x16xf32> to vector<1x16x16xbf16>
    "tpu.trace_start"() <{level = 10 : i32, message = "bqk,bkd->bqd"}> : () -> ()
    %cst_30 = arith.constant dense<0.000000e+00> : vector<1x16x16xf32>
    %69 = tpu.matmul %68, %56, %cst_30 {dimension_numbers = #tpu.dot_dimension_numbers<[2], [1], [1], [2], [0, 0, 0, 1, 1, 2], [0], [0]>} : vector<1x16x16xbf16>, vector<1x16x16xbf16>, vector<1x16x16xf32> -> vector<1x16x16xf32>
    "tpu.trace_stop"() : () -> ()
    %70 = vector.shape_cast %69 : vector<1x16x16xf32> to vector<16x16xf32>
    %71 = arith.truncf %70 : vector<16x16xf32> to vector<16x16xbf16>
    %c0_31 = arith.constant 0 : index
    %c0_32 = arith.constant 0 : index
    %72 = vector.load %arg24[%c0_31, %c0_32] : memref<16x32xbf16, #tpu.memory_space<vmem>>, vector<16x16xbf16>
    tpu.vector_store %arg24[%c0_31, %c0_32], %71 {strides = array<i32>} : memref<16x32xbf16, #tpu.memory_space<vmem>>, vector<16x16xbf16>,
    %73 = vector.extract_strided_slice %45 {offsets = [0, 16], sizes = [16, 16], strides = [1, 1]} : vector<16x96xf32> to vector<16x16xf32>
    %cst_33 = arith.constant 2.500000e-01 : f32
    %74 = vector.broadcast %cst_33 : f32 to vector<16x16xf32>
    %75 = arith.mulf %73, %74 : vector<16x16xf32>
    %76 = vector.shape_cast %75 : vector<16x16xf32> to vector<1x16x16xf32>
    %77 = arith.truncf %76 : vector<1x16x16xf32> to vector<1x16x16xbf16>
    %78 = vector.extract_strided_slice %45 {offsets = [0, 48], sizes = [16, 16], strides = [1, 1]} : vector<16x96xf32> to vector<16x16xf32>
    %79 = vector.shape_cast %78 : vector<16x16xf32> to vector<1x16x16xf32>
    %80 = arith.truncf %79 : vector<1x16x16xf32> to vector<1x16x16xbf16>
    %81 = vector.extract_strided_slice %45 {offsets = [0, 80], sizes = [16, 16], strides = [1, 1]} : vector<16x96xf32> to vector<16x16xf32>
    %82 = vector.shape_cast %81 : vector<16x16xf32> to vector<1x16x16xf32>
    %83 = arith.truncf %82 : vector<1x16x16xf32> to vector<1x16x16xbf16>
    "tpu.trace_start"() <{level = 10 : i32, message = "bqd,bkd->bqk"}> : () -> ()
    %cst_34 = arith.constant dense<0.000000e+00> : vector<1x16x16xf32>
    %84 = tpu.matmul %77, %80, %cst_34 {dimension_numbers = #tpu.dot_dimension_numbers<[2], [2], [1], [1], [0, 0, 0, 1, 1, 1], [0], [0]>} : vector<1x16x16xbf16>, vector<1x16x16xbf16>, vector<1x16x16xf32> -> vector<1x16x16xf32>
    "tpu.trace_stop"() : () -> ()
    %cst_35 = arith.constant dense<0xFF800000> : vector<1x16xf32>
    %85 = vector.multi_reduction <maximumf>, %84, %cst_35 [2] : vector<1x16x16xf32> to vector<1x16xf32>
    %86 = vector.shape_cast %85 : vector<1x16xf32> to vector<1x16x1xf32>
    %87 = vector.broadcast %86 : vector<1x16x1xf32> to vector<1x16x16xf32>
    %88 = arith.subf %84, %87 : vector<1x16x16xf32>
    %89 = math.exp %88 : vector<1x16x16xf32>
    %cst_36 = arith.constant dense<0.000000e+00> : vector<1x16xf32>
    %90 = vector.multi_reduction <add>, %89, %cst_36 [2] : vector<1x16x16xf32> to vector<1x16xf32>
    %91 = vector.shape_cast %90 : vector<1x16xf32> to vector<1x16x1xf32>
    %92 = tpu.reciprocal %91 {approx = true} : vector<1x16x1xf32> -> vector<1x16x1xf32>
    %93 = vector.broadcast %92 : vector<1x16x1xf32> to vector<1x16x16xf32>
    %94 = arith.mulf %89, %93 : vector<1x16x16xf32>
    %95 = arith.truncf %94 : vector<1x16x16xf32> to vector<1x16x16xbf16>
    "tpu.trace_start"() <{level = 10 : i32, message = "bqk,bkd->bqd"}> : () -> ()
    %cst_37 = arith.constant dense<0.000000e+00> : vector<1x16x16xf32>
    %96 = tpu.matmul %95, %83, %cst_37 {dimension_numbers = #tpu.dot_dimension_numbers<[2], [1], [1], [2], [0, 0, 0, 1, 1, 2], [0], [0]>} : vector<1x16x16xbf16>, vector<1x16x16xbf16>, vector<1x16x16xf32> -> vector<1x16x16xf32>
    "tpu.trace_stop"() : () -> ()
    %97 = vector.shape_cast %96 : vector<1x16x16xf32> to vector<16x16xf32>
    %98 = arith.truncf %97 : vector<16x16xf32> to vector<16x16xbf16>
    %c0_38 = arith.constant 0 : index
    %c16 = arith.constant 16 : index
    %99 = vector.load %arg24[%c0_38, %c16] : memref<16x32xbf16, #tpu.memory_space<vmem>>, vector<16x16xbf16>
    tpu.vector_store %arg24[%c0_38, %c16], %98 {strides = array<i32>} : memref<16x32xbf16, #tpu.memory_space<vmem>>, vector<16x16xbf16>,
    %c0_39 = arith.constant 0 : index
    %c0_40 = arith.constant 0 : index
    %100 = vector.load %arg24[%c0_39, %c0_40] : memref<16x32xbf16, #tpu.memory_space<vmem>>, vector<16x32xbf16>
    %c0_41 = arith.constant 0 : index
    %c0_42 = arith.constant 0 : index
    %c0_43 = arith.constant 0 : index
    %101 = vector.load %arg9[%c0_41, %c0_42, %c0_43] : memref<4x32x32xbf16, #tpu.memory_space<vmem>>, vector<1x32x32xbf16>
    %102 = vector.shape_cast %101 : vector<1x32x32xbf16> to vector<32x32xbf16>
    %cst_44 = arith.constant dense<0.000000e+00> : vector<16x32xf32>
    %103 = tpu.matmul %100, %102, %cst_44 {dimension_numbers = #tpu.dot_dimension_numbers<[1], [0], [0], [1], [0, 0, 1, 1], [], []>} : vector<16x32xbf16>, vector<32x32xbf16>, vector<16x32xf32> -> vector<16x32xf32>
    %c0_45 = arith.constant 0 : index
    %c0_46 = arith.constant 0 : index
    %c0_47 = arith.constant 0 : index
    %104 = vector.load %arg10[%c0_45, %c0_46, %c0_47] : memref<4x1x32xf32, #tpu.memory_space<vmem>>, vector<1x1x32xf32>
    %105 = vector.shape_cast %104 : vector<1x1x32xf32> to vector<1x32xf32>
    %106 = vector.broadcast %105 : vector<1x32xf32> to vector<16x32xf32>
    %107 = arith.addf %103, %106 : vector<16x32xf32>
    %108 = arith.addf %11, %107 : vector<16x32xf32>
    %c0_48 = arith.constant 0 : index
    %c0_49 = arith.constant 0 : index
    %c0_50 = arith.constant 0 : index
    %109 = vector.load %arg11[%c0_48, %c0_49, %c0_50] : memref<4x1x32xf32, #tpu.memory_space<vmem>>, vector<1x1x32xf32>
    %110 = vector.shape_cast %109 : vector<1x1x32xf32> to vector<1x32xf32>
    %c0_51 = arith.constant 0 : index
    %c0_52 = arith.constant 0 : index
    %c0_53 = arith.constant 0 : index
    %111 = vector.load %arg12[%c0_51, %c0_52, %c0_53] : memref<4x1x32xf32, #tpu.memory_space<vmem>>, vector<1x1x32xf32>
    %112 = vector.shape_cast %111 : vector<1x1x32xf32> to vector<1x32xf32>
    %cst_54 = arith.constant dense<0.000000e+00> : vector<16xf32>
    %113 = vector.multi_reduction <add>, %108, %cst_54 [1] : vector<16x32xf32> to vector<16xf32>
    %114 = vector.shape_cast %113 : vector<16xf32> to vector<16x1xf32>
    %cst_55 = arith.constant 3.200000e+01 : f32
    %115 = vector.broadcast %cst_55 : f32 to vector<16x1xf32>
    %116 = arith.divf %114, %115 : vector<16x1xf32>
    %117 = arith.mulf %108, %108 : vector<16x32xf32>
    %cst_56 = arith.constant dense<0.000000e+00> : vector<16xf32>
    %118 = vector.multi_reduction <add>, %117, %cst_56 [1] : vector<16x32xf32> to vector<16xf32>
    %119 = vector.shape_cast %118 : vector<16xf32> to vector<16x1xf32>
    %cst_57 = arith.constant 3.200000e+01 : f32
    %120 = vector.broadcast %cst_57 : f32 to vector<16x1xf32>
    %121 = arith.divf %119, %120 : vector<16x1xf32>
    %122 = arith.mulf %116, %116 : vector<16x1xf32>
    %123 = arith.subf %121, %122 : vector<16x1xf32>
    %124 = vector.broadcast %116 : vector<16x1xf32> to vector<16x32xf32>
    %125 = arith.subf %108, %124 : vector<16x32xf32>
    %cst_58 = arith.constant 9.99999997E-7 : f32
    %126 = vector.broadcast %cst_58 : f32 to vector<16x1xf32>
    %127 = arith.addf %123, %126 : vector<16x1xf32>
    %128 = math.rsqrt %127 : vector<16x1xf32>
    %129 = vector.broadcast %128 : vector<16x1xf32> to vector<16x32xf32>
    %130 = arith.mulf %125, %129 : vector<16x32xf32>
    %131 = vector.broadcast %110 : vector<1x32xf32> to vector<16x32xf32>
    %132 = arith.mulf %130, %131 : vector<16x32xf32>
    %133 = vector.broadcast %112 : vector<1x32xf32> to vector<16x32xf32>
    %134 = arith.addf %132, %133 : vector<16x32xf32>
    %135 = arith.truncf %134 : vector<16x32xf32> to vector<16x32xbf16>
    %c0_59 = arith.constant 0 : index
    %c0_60 = arith.constant 0 : index
    %c0_61 = arith.constant 0 : index
    %136 = vector.load %arg13[%c0_59, %c0_60, %c0_61] : memref<4x32x64xbf16, #tpu.memory_space<vmem>>, vector<1x32x64xbf16>
    %137 = vector.shape_cast %136 : vector<1x32x64xbf16> to vector<32x64xbf16>
    %cst_62 = arith.constant dense<0.000000e+00> : vector<16x64xf32>
    %138 = tpu.matmul %135, %137, %cst_62 {dimension_numbers = #tpu.dot_dimension_numbers<[1], [0], [0], [1], [0, 0, 1, 1], [], []>} : vector<16x32xbf16>, vector<32x64xbf16>, vector<16x64xf32> -> vector<16x64xf32>
    %c0_63 = arith.constant 0 : index
    %c0_64 = arith.constant 0 : index
    %c0_65 = arith.constant 0 : index
    %139 = vector.load %arg14[%c0_63, %c0_64, %c0_65] : memref<4x1x64xf32, #tpu.memory_space<vmem>>, vector<1x1x64xf32>
    %140 = vector.shape_cast %139 : vector<1x1x64xf32> to vector<1x64xf32>
    %141 = vector.broadcast %140 : vector<1x64xf32> to vector<16x64xf32>
    %142 = arith.addf %138, %141 : vector<16x64xf32>
    %143 = arith.mulf %142, %142 : vector<16x64xf32>
    %144 = arith.mulf %142, %143 : vector<16x64xf32>
    %cst_66 = arith.constant 4.471500e-02 : f32
    %145 = vector.broadcast %cst_66 : f32 to vector<16x64xf32>
    %146 = arith.mulf %145, %144 : vector<16x64xf32>
    %147 = arith.addf %142, %146 : vector<16x64xf32>
    %cst_67 = arith.constant 0.797884583 : f32
    %148 = vector.broadcast %cst_67 : f32 to vector<16x64xf32>
    %149 = arith.mulf %148, %147 : vector<16x64xf32>
    %150 = math.tanh %149 : vector<16x64xf32>
    %cst_68 = arith.constant 1.000000e+00 : f32
    %151 = vector.broadcast %cst_68 : f32 to vector<16x64xf32>
    %152 = arith.addf %151, %150 : vector<16x64xf32>
    %cst_69 = arith.constant 5.000000e-01 : f32
    %153 = vector.broadcast %cst_69 : f32 to vector<16x64xf32>
    %154 = arith.mulf %153, %152 : vector<16x64xf32>
    %155 = arith.mulf %142, %154 : vector<16x64xf32>
    %156 = arith.truncf %155 : vector<16x64xf32> to vector<16x64xbf16>
    %c0_70 = arith.constant 0 : index
    %c0_71 = arith.constant 0 : index
    %c0_72 = arith.constant 0 : index
    %157 = vector.load %arg15[%c0_70, %c0_71, %c0_72] : memref<4x64x32xbf16, #tpu.memory_space<vmem>>, vector<1x64x32xbf16>
    %158 = vector.shape_cast %157 : vector<1x64x32xbf16> to vector<64x32xbf16>
    %cst_73 = arith.constant dense<0.000000e+00> : vector<16x32xf32>
    %159 = tpu.matmul %156, %158, %cst_73 {dimension_numbers = #tpu.dot_dimension_numbers<[1], [0], [0], [1], [0, 0, 1, 1], [], []>} : vector<16x64xbf16>, vector<64x32xbf16>, vector<16x32xf32> -> vector<16x32xf32>
    %c0_74 = arith.constant 0 : index
    %c0_75 = arith.constant 0 : index
    %c0_76 = arith.constant 0 : index
    %160 = vector.load %arg16[%c0_74, %c0_75, %c0_76] : memref<4x1x32xf32, #tpu.memory_space<vmem>>, vector<1x1x32xf32>
    %161 = vector.shape_cast %160 : vector<1x1x32xf32> to vector<1x32xf32>
    %162 = vector.broadcast %161 : vector<1x32xf32> to vector<16x32xf32>
    %163 = arith.addf %159, %162 : vector<16x32xf32>
    %164 = arith.addf %108, %163 : vector<16x32xf32>
    %165 = arith.truncf %164 : vector<16x32xf32> to vector<16x32xbf16>
    %c1 = arith.constant 1 : index
    %c0_77 = arith.constant 0 : index
    %c0_78 = arith.constant 0 : index
    %166 = vector.load %arg5[%c1, %c0_77, %c0_78] : memref<4x1x32xf32, #tpu.memory_space<vmem>>, vector<1x1x32xf32>
    %167 = vector.shape_cast %166 : vector<1x1x32xf32> to vector<1x32xf32>
    %c1_79 = arith.constant 1 : index
    %c0_80 = arith.constant 0 : index
    %c0_81 = arith.constant 0 : index
    %168 = vector.load %arg6[%c1_79, %c0_80, %c0_81] : memref<4x1x32xf32, #tpu.memory_space<vmem>>, vector<1x1x32xf32>
    %169 = vector.shape_cast %168 : vector<1x1x32xf32> to vector<1x32xf32>
    %cst_82 = arith.constant dense<0.000000e+00> : vector<16xf32>
    %170 = vector.multi_reduction <add>, %164, %cst_82 [1] : vector<16x32xf32> to vector<16xf32>
    %171 = vector.shape_cast %170 : vector<16xf32> to vector<16x1xf32>
    %cst_83 = arith.constant 3.200000e+01 : f32
    %172 = vector.broadcast %cst_83 : f32 to vector<16x1xf32>
    %173 = arith.divf %171, %172 : vector<16x1xf32>
    %174 = arith.mulf %164, %164 : vector<16x32xf32>
    %cst_84 = arith.constant dense<0.000000e+00> : vector<16xf32>
    %175 = vector.multi_reduction <add>, %174, %cst_84 [1] : vector<16x32xf32> to vector<16xf32>
    %176 = vector.shape_cast %175 : vector<16xf32> to vector<16x1xf32>
    %cst_85 = arith.constant 3.200000e+01 : f32
    %177 = vector.broadcast %cst_85 : f32 to vector<16x1xf32>
    %178 = arith.divf %176, %177 : vector<16x1xf32>
    %179 = arith.mulf %173, %173 : vector<16x1xf32>
    %180 = arith.subf %178, %179 : vector<16x1xf32>
    %181 = vector.broadcast %173 : vector<16x1xf32> to vector<16x32xf32>
    %182 = arith.subf %164, %181 : vector<16x32xf32>
    %cst_86 = arith.constant 9.99999997E-7 : f32
    %183 = vector.broadcast %cst_86 : f32 to vector<16x1xf32>
    %184 = arith.addf %180, %183 : vector<16x1xf32>
    %185 = math.rsqrt %184 : vector<16x1xf32>
    %186 = vector.broadcast %185 : vector<16x1xf32> to vector<16x32xf32>
    %187 = arith.mulf %182, %186 : vector<16x32xf32>
    %188 = vector.broadcast %167 : vector<1x32xf32> to vector<16x32xf32>
    %189 = arith.mulf %187, %188 : vector<16x32xf32>
    %190 = vector.broadcast %169 : vector<1x32xf32> to vector<16x32xf32>
    %191 = arith.addf %189, %190 : vector<16x32xf32>
    %192 = arith.truncf %191 : vector<16x32xf32> to vector<16x32xbf16>
    %c1_87 = arith.constant 1 : index
    %c0_88 = arith.constant 0 : index
    %c0_89 = arith.constant 0 : index
    %193 = vector.load %arg7[%c1_87, %c0_88, %c0_89] : memref<4x32x96xbf16, #tpu.memory_space<vmem>>, vector<1x32x96xbf16>
    %194 = vector.shape_cast %193 : vector<1x32x96xbf16> to vector<32x96xbf16>
    %cst_90 = arith.constant dense<0.000000e+00> : vector<16x96xf32>
    %195 = tpu.matmul %192, %194, %cst_90 {dimension_numbers = #tpu.dot_dimension_numbers<[1], [0], [0], [1], [0, 0, 1, 1], [], []>} : vector<16x32xbf16>, vector<32x96xbf16>, vector<16x96xf32> -> vector<16x96xf32>
    %c1_91 = arith.constant 1 : index
    %c0_92 = arith.constant 0 : index
    %c0_93 = arith.constant 0 : index
    %196 = vector.load %arg8[%c1_91, %c0_92, %c0_93] : memref<4x1x96xf32, #tpu.memory_space<vmem>>, vector<1x1x96xf32>
    %197 = vector.shape_cast %196 : vector<1x1x96xf32> to vector<1x96xf32>
    %198 = vector.broadcast %197 : vector<1x96xf32> to vector<16x96xf32>
    %199 = arith.addf %195, %198 : vector<16x96xf32>
    %200 = vector.extract_strided_slice %199 {offsets = [0, 0], sizes = [16, 16], strides = [1, 1]} : vector<16x96xf32> to vector<16x16xf32>
    %cst_94 = arith.constant 2.500000e-01 : f32
    %201 = vector.broadcast %cst_94 : f32 to vector<16x16xf32>
    %202 = arith.mulf %200, %201 : vector<16x16xf32>
    %203 = vector.shape_cast %202 : vector<16x16xf32> to vector<1x16x16xf32>
    %204 = arith.truncf %203 : vector<1x16x16xf32> to vector<1x16x16xbf16>
    %205 = vector.extract_strided_slice %199 {offsets = [0, 32], sizes = [16, 16], strides = [1, 1]} : vector<16x96xf32> to vector<16x16xf32>
    %206 = vector.shape_cast %205 : vector<16x16xf32> to vector<1x16x16xf32>
    %207 = arith.truncf %206 : vector<1x16x16xf32> to vector<1x16x16xbf16>
    %208 = vector.extract_strided_slice %199 {offsets = [0, 64], sizes = [16, 16], strides = [1, 1]} : vector<16x96xf32> to vector<16x16xf32>
    %209 = vector.shape_cast %208 : vector<16x16xf32> to vector<1x16x16xf32>
    %210 = arith.truncf %209 : vector<1x16x16xf32> to vector<1x16x16xbf16>
    "tpu.trace_start"() <{level = 10 : i32, message = "bqd,bkd->bqk"}> : () -> ()
    %cst_95 = arith.constant dense<0.000000e+00> : vector<1x16x16xf32>
    %211 = tpu.matmul %204, %207, %cst_95 {dimension_numbers = #tpu.dot_dimension_numbers<[2], [2], [1], [1], [0, 0, 0, 1, 1, 1], [0], [0]>} : vector<1x16x16xbf16>, vector<1x16x16xbf16>, vector<1x16x16xf32> -> vector<1x16x16xf32>
    "tpu.trace_stop"() : () -> ()
    %cst_96 = arith.constant dense<0xFF800000> : vector<1x16xf32>
    %212 = vector.multi_reduction <maximumf>, %211, %cst_96 [2] : vector<1x16x16xf32> to vector<1x16xf32>
    %213 = vector.shape_cast %212 : vector<1x16xf32> to vector<1x16x1xf32>
    %214 = vector.broadcast %213 : vector<1x16x1xf32> to vector<1x16x16xf32>
    %215 = arith.subf %211, %214 : vector<1x16x16xf32>
    %216 = math.exp %215 : vector<1x16x16xf32>
    %cst_97 = arith.constant dense<0.000000e+00> : vector<1x16xf32>
    %217 = vector.multi_reduction <add>, %216, %cst_97 [2] : vector<1x16x16xf32> to vector<1x16xf32>
    %218 = vector.shape_cast %217 : vector<1x16xf32> to vector<1x16x1xf32>
    %219 = tpu.reciprocal %218 {approx = true} : vector<1x16x1xf32> -> vector<1x16x1xf32>
    %220 = vector.broadcast %219 : vector<1x16x1xf32> to vector<1x16x16xf32>
    %221 = arith.mulf %216, %220 : vector<1x16x16xf32>
    %222 = arith.truncf %221 : vector<1x16x16xf32> to vector<1x16x16xbf16>
    "tpu.trace_start"() <{level = 10 : i32, message = "bqk,bkd->bqd"}> : () -> ()
    %cst_98 = arith.constant dense<0.000000e+00> : vector<1x16x16xf32>
    %223 = tpu.matmul %222, %210, %cst_98 {dimension_numbers = #tpu.dot_dimension_numbers<[2], [1], [1], [2], [0, 0, 0, 1, 1, 2], [0], [0]>} : vector<1x16x16xbf16>, vector<1x16x16xbf16>, vector<1x16x16xf32> -> vector<1x16x16xf32>
    "tpu.trace_stop"() : () -> ()
    %224 = vector.shape_cast %223 : vector<1x16x16xf32> to vector<16x16xf32>
    %225 = arith.truncf %224 : vector<16x16xf32> to vector<16x16xbf16>
    %c0_99 = arith.constant 0 : index
    %c0_100 = arith.constant 0 : index
    %226 = vector.load %arg24[%c0_99, %c0_100] : memref<16x32xbf16, #tpu.memory_space<vmem>>, vector<16x16xbf16>
    tpu.vector_store %arg24[%c0_99, %c0_100], %225 {strides = array<i32>} : memref<16x32xbf16, #tpu.memory_space<vmem>>, vector<16x16xbf16>,
    %227 = vector.extract_strided_slice %199 {offsets = [0, 16], sizes = [16, 16], strides = [1, 1]} : vector<16x96xf32> to vector<16x16xf32>
    %cst_101 = arith.constant 2.500000e-01 : f32
    %228 = vector.broadcast %cst_101 : f32 to vector<16x16xf32>
    %229 = arith.mulf %227, %228 : vector<16x16xf32>
    %230 = vector.shape_cast %229 : vector<16x16xf32> to vector<1x16x16xf32>
    %231 = arith.truncf %230 : vector<1x16x16xf32> to vector<1x16x16xbf16>
    %232 = vector.extract_strided_slice %199 {offsets = [0, 48], sizes = [16, 16], strides = [1, 1]} : vector<16x96xf32> to vector<16x16xf32>
    %233 = vector.shape_cast %232 : vector<16x16xf32> to vector<1x16x16xf32>
    %234 = arith.truncf %233 : vector<1x16x16xf32> to vector<1x16x16xbf16>
    %235 = vector.extract_strided_slice %199 {offsets = [0, 80], sizes = [16, 16], strides = [1, 1]} : vector<16x96xf32> to vector<16x16xf32>
    %236 = vector.shape_cast %235 : vector<16x16xf32> to vector<1x16x16xf32>
    %237 = arith.truncf %236 : vector<1x16x16xf32> to vector<1x16x16xbf16>
    "tpu.trace_start"() <{level = 10 : i32, message = "bqd,bkd->bqk"}> : () -> ()
    %cst_102 = arith.constant dense<0.000000e+00> : vector<1x16x16xf32>
    %238 = tpu.matmul %231, %234, %cst_102 {dimension_numbers = #tpu.dot_dimension_numbers<[2], [2], [1], [1], [0, 0, 0, 1, 1, 1], [0], [0]>} : vector<1x16x16xbf16>, vector<1x16x16xbf16>, vector<1x16x16xf32> -> vector<1x16x16xf32>
    "tpu.trace_stop"() : () -> ()
    %cst_103 = arith.constant dense<0xFF800000> : vector<1x16xf32>
    %239 = vector.multi_reduction <maximumf>, %238, %cst_103 [2] : vector<1x16x16xf32> to vector<1x16xf32>
    %240 = vector.shape_cast %239 : vector<1x16xf32> to vector<1x16x1xf32>
    %241 = vector.broadcast %240 : vector<1x16x1xf32> to vector<1x16x16xf32>
    %242 = arith.subf %238, %241 : vector<1x16x16xf32>
    %243 = math.exp %242 : vector<1x16x16xf32>
    %cst_104 = arith.constant dense<0.000000e+00> : vector<1x16xf32>
    %244 = vector.multi_reduction <add>, %243, %cst_104 [2] : vector<1x16x16xf32> to vector<1x16xf32>
    %245 = vector.shape_cast %244 : vector<1x16xf32> to vector<1x16x1xf32>
    %246 = tpu.reciprocal %245 {approx = true} : vector<1x16x1xf32> -> vector<1x16x1xf32>
    %247 = vector.broadcast %246 : vector<1x16x1xf32> to vector<1x16x16xf32>
    %248 = arith.mulf %243, %247 : vector<1x16x16xf32>
    %249 = arith.truncf %248 : vector<1x16x16xf32> to vector<1x16x16xbf16>
    "tpu.trace_start"() <{level = 10 : i32, message = "bqk,bkd->bqd"}> : () -> ()
    %cst_105 = arith.constant dense<0.000000e+00> : vector<1x16x16xf32>
    %250 = tpu.matmul %249, %237, %cst_105 {dimension_numbers = #tpu.dot_dimension_numbers<[2], [1], [1], [2], [0, 0, 0, 1, 1, 2], [0], [0]>} : vector<1x16x16xbf16>, vector<1x16x16xbf16>, vector<1x16x16xf32> -> vector<1x16x16xf32>
    "tpu.trace_stop"() : () -> ()
    %251 = vector.shape_cast %250 : vector<1x16x16xf32> to vector<16x16xf32>
    %252 = arith.truncf %251 : vector<16x16xf32> to vector<16x16xbf16>
    %c0_106 = arith.constant 0 : index
    %c16_107 = arith.constant 16 : index
    %253 = vector.load %arg24[%c0_106, %c16_107] : memref<16x32xbf16, #tpu.memory_space<vmem>>, vector<16x16xbf16>
    tpu.vector_store %arg24[%c0_106, %c16_107], %252 {strides = array<i32>} : memref<16x32xbf16, #tpu.memory_space<vmem>>, vector<16x16xbf16>,
    %c0_108 = arith.constant 0 : index
    %c0_109 = arith.constant 0 : index
    %254 = vector.load %arg24[%c0_108, %c0_109] : memref<16x32xbf16, #tpu.memory_space<vmem>>, vector<16x32xbf16>
    %c1_110 = arith.constant 1 : index
    %c0_111 = arith.constant 0 : index
    %c0_112 = arith.constant 0 : index
    %255 = vector.load %arg9[%c1_110, %c0_111, %c0_112] : memref<4x32x32xbf16, #tpu.memory_space<vmem>>, vector<1x32x32xbf16>
    %256 = vector.shape_cast %255 : vector<1x32x32xbf16> to vector<32x32xbf16>
    %cst_113 = arith.constant dense<0.000000e+00> : vector<16x32xf32>
    %257 = tpu.matmul %254, %256, %cst_113 {dimension_numbers = #tpu.dot_dimension_numbers<[1], [0], [0], [1], [0, 0, 1, 1], [], []>} : vector<16x32xbf16>, vector<32x32xbf16>, vector<16x32xf32> -> vector<16x32xf32>
    %c1_114 = arith.constant 1 : index
    %c0_115 = arith.constant 0 : index
    %c0_116 = arith.constant 0 : index
    %258 = vector.load %arg10[%c1_114, %c0_115, %c0_116] : memref<4x1x32xf32, #tpu.memory_space<vmem>>, vector<1x1x32xf32>
    %259 = vector.shape_cast %258 : vector<1x1x32xf32> to vector<1x32xf32>
    %260 = vector.broadcast %259 : vector<1x32xf32> to vector<16x32xf32>
    %261 = arith.addf %257, %260 : vector<16x32xf32>
    %262 = arith.addf %164, %261 : vector<16x32xf32>
    %c1_117 = arith.constant 1 : index
    %c0_118 = arith.constant 0 : index
    %c0_119 = arith.constant 0 : index
    %263 = vector.load %arg11[%c1_117, %c0_118, %c0_119] : memref<4x1x32xf32, #tpu.memory_space<vmem>>, vector<1x1x32xf32>
    %264 = vector.shape_cast %263 : vector<1x1x32xf32> to vector<1x32xf32>
    %c1_120 = arith.constant 1 : index
    %c0_121 = arith.constant 0 : index
    %c0_122 = arith.constant 0 : index
    %265 = vector.load %arg12[%c1_120, %c0_121, %c0_122] : memref<4x1x32xf32, #tpu.memory_space<vmem>>, vector<1x1x32xf32>
    %266 = vector.shape_cast %265 : vector<1x1x32xf32> to vector<1x32xf32>
    %cst_123 = arith.constant dense<0.000000e+00> : vector<16xf32>
    %267 = vector.multi_reduction <add>, %262, %cst_123 [1] : vector<16x32xf32> to vector<16xf32>
    %268 = vector.shape_cast %267 : vector<16xf32> to vector<16x1xf32>
    %cst_124 = arith.constant 3.200000e+01 : f32
    %269 = vector.broadcast %cst_124 : f32 to vector<16x1xf32>
    %270 = arith.divf %268, %269 : vector<16x1xf32>
    %271 = arith.mulf %262, %262 : vector<16x32xf32>
    %cst_125 = arith.constant dense<0.000000e+00> : vector<16xf32>
    %272 = vector.multi_reduction <add>, %271, %cst_125 [1] : vector<16x32xf32> to vector<16xf32>
    %273 = vector.shape_cast %272 : vector<16xf32> to vector<16x1xf32>
    %cst_126 = arith.constant 3.200000e+01 : f32
    %274 = vector.broadcast %cst_126 : f32 to vector<16x1xf32>
    %275 = arith.divf %273, %274 : vector<16x1xf32>
    %276 = arith.mulf %270, %270 : vector<16x1xf32>
    %277 = arith.subf %275, %276 : vector<16x1xf32>
    %278 = vector.broadcast %270 : vector<16x1xf32> to vector<16x32xf32>
    %279 = arith.subf %262, %278 : vector<16x32xf32>
    %cst_127 = arith.constant 9.99999997E-7 : f32
    %280 = vector.broadcast %cst_127 : f32 to vector<16x1xf32>
    %281 = arith.addf %277, %280 : vector<16x1xf32>
    %282 = math.rsqrt %281 : vector<16x1xf32>
    %283 = vector.broadcast %282 : vector<16x1xf32> to vector<16x32xf32>
    %284 = arith.mulf %279, %283 : vector<16x32xf32>
    %285 = vector.broadcast %264 : vector<1x32xf32> to vector<16x32xf32>
    %286 = arith.mulf %284, %285 : vector<16x32xf32>
    %287 = vector.broadcast %266 : vector<1x32xf32> to vector<16x32xf32>
    %288 = arith.addf %286, %287 : vector<16x32xf32>
    %289 = arith.truncf %288 : vector<16x32xf32> to vector<16x32xbf16>
    %c1_128 = arith.constant 1 : index
    %c0_129 = arith.constant 0 : index
    %c0_130 = arith.constant 0 : index
    %290 = vector.load %arg13[%c1_128, %c0_129, %c0_130] : memref<4x32x64xbf16, #tpu.memory_space<vmem>>, vector<1x32x64xbf16>
    %291 = vector.shape_cast %290 : vector<1x32x64xbf16> to vector<32x64xbf16>
    %cst_131 = arith.constant dense<0.000000e+00> : vector<16x64xf32>
    %292 = tpu.matmul %289, %291, %cst_131 {dimension_numbers = #tpu.dot_dimension_numbers<[1], [0], [0], [1], [0, 0, 1, 1], [], []>} : vector<16x32xbf16>, vector<32x64xbf16>, vector<16x64xf32> -> vector<16x64xf32>
    %c1_132 = arith.constant 1 : index
    %c0_133 = arith.constant 0 : index
    %c0_134 = arith.constant 0 : index
    %293 = vector.load %arg14[%c1_132, %c0_133, %c0_134] : memref<4x1x64xf32, #tpu.memory_space<vmem>>, vector<1x1x64xf32>
    %294 = vector.shape_cast %293 : vector<1x1x64xf32> to vector<1x64xf32>
    %295 = vector.broadcast %294 : vector<1x64xf32> to vector<16x64xf32>
    %296 = arith.addf %292, %295 : vector<16x64xf32>
    %297 = arith.mulf %296, %296 : vector<16x64xf32>
    %298 = arith.mulf %296, %297 : vector<16x64xf32>
    %cst_135 = arith.constant 4.471500e-02 : f32
    %299 = vector.broadcast %cst_135 : f32 to vector<16x64xf32>
    %300 = arith.mulf %299, %298 : vector<16x64xf32>
    %301 = arith.addf %296, %300 : vector<16x64xf32>
    %cst_136 = arith.constant 0.797884583 : f32
    %302 = vector.broadcast %cst_136 : f32 to vector<16x64xf32>
    %303 = arith.mulf %302, %301 : vector<16x64xf32>
    %304 = math.tanh %303 : vector<16x64xf32>
    %cst_137 = arith.constant 1.000000e+00 : f32
    %305 = vector.broadcast %cst_137 : f32 to vector<16x64xf32>
    %306 = arith.addf %305, %304 : vector<16x64xf32>
    %cst_138 = arith.constant 5.000000e-01 : f32
    %307 = vector.broadcast %cst_138 : f32 to vector<16x64xf32>
    %308 = arith.mulf %307, %306 : vector<16x64xf32>
    %309 = arith.mulf %296, %308 : vector<16x64xf32>
    %310 = arith.truncf %309 : vector<16x64xf32> to vector<16x64xbf16>
    %c1_139 = arith.constant 1 : index
    %c0_140 = arith.constant 0 : index
    %c0_141 = arith.constant 0 : index
    %311 = vector.load %arg15[%c1_139, %c0_140, %c0_141] : memref<4x64x32xbf16, #tpu.memory_space<vmem>>, vector<1x64x32xbf16>
    %312 = vector.shape_cast %311 : vector<1x64x32xbf16> to vector<64x32xbf16>
    %cst_142 = arith.constant dense<0.000000e+00> : vector<16x32xf32>
    %313 = tpu.matmul %310, %312, %cst_142 {dimension_numbers = #tpu.dot_dimension_numbers<[1], [0], [0], [1], [0, 0, 1, 1], [], []>} : vector<16x64xbf16>, vector<64x32xbf16>, vector<16x32xf32> -> vector<16x32xf32>
    %c1_143 = arith.constant 1 : index
    %c0_144 = arith.constant 0 : index
    %c0_145 = arith.constant 0 : index
    %314 = vector.load %arg16[%c1_143, %c0_144, %c0_145] : memref<4x1x32xf32, #tpu.memory_space<vmem>>, vector<1x1x32xf32>
    %315 = vector.shape_cast %314 : vector<1x1x32xf32> to vector<1x32xf32>
    %316 = vector.broadcast %315 : vector<1x32xf32> to vector<16x32xf32>
    %317 = arith.addf %313, %316 : vector<16x32xf32>
    %318 = arith.addf %262, %317 : vector<16x32xf32>
    %319 = arith.truncf %318 : vector<16x32xf32> to vector<16x32xbf16>
    %c2 = arith.constant 2 : index
    %c0_146 = arith.constant 0 : index
    %c0_147 = arith.constant 0 : index
    %320 = vector.load %arg5[%c2, %c0_146, %c0_147] : memref<4x1x32xf32, #tpu.memory_space<vmem>>, vector<1x1x32xf32>
    %321 = vector.shape_cast %320 : vector<1x1x32xf32> to vector<1x32xf32>
    %c2_148 = arith.constant 2 : index
    %c0_149 = arith.constant 0 : index
    %c0_150 = arith.constant 0 : index
    %322 = vector.load %arg6[%c2_148, %c0_149, %c0_150] : memref<4x1x32xf32, #tpu.memory_space<vmem>>, vector<1x1x32xf32>
    %323 = vector.shape_cast %322 : vector<1x1x32xf32> to vector<1x32xf32>
    %cst_151 = arith.constant dense<0.000000e+00> : vector<16xf32>
    %324 = vector.multi_reduction <add>, %318, %cst_151 [1] : vector<16x32xf32> to vector<16xf32>
    %325 = vector.shape_cast %324 : vector<16xf32> to vector<16x1xf32>
    %cst_152 = arith.constant 3.200000e+01 : f32
    %326 = vector.broadcast %cst_152 : f32 to vector<16x1xf32>
    %327 = arith.divf %325, %326 : vector<16x1xf32>
    %328 = arith.mulf %318, %318 : vector<16x32xf32>
    %cst_153 = arith.constant dense<0.000000e+00> : vector<16xf32>
    %329 = vector.multi_reduction <add>, %328, %cst_153 [1] : vector<16x32xf32> to vector<16xf32>
    %330 = vector.shape_cast %329 : vector<16xf32> to vector<16x1xf32>
    %cst_154 = arith.constant 3.200000e+01 : f32
    %331 = vector.broadcast %cst_154 : f32 to vector<16x1xf32>
    %332 = arith.divf %330, %331 : vector<16x1xf32>
    %333 = arith.mulf %327, %327 : vector<16x1xf32>
    %334 = arith.subf %332, %333 : vector<16x1xf32>
    %335 = vector.broadcast %327 : vector<16x1xf32> to vector<16x32xf32>
    %336 = arith.subf %318, %335 : vector<16x32xf32>
    %cst_155 = arith.constant 9.99999997E-7 : f32
    %337 = vector.broadcast %cst_155 : f32 to vector<16x1xf32>
    %338 = arith.addf %334, %337 : vector<16x1xf32>
    %339 = math.rsqrt %338 : vector<16x1xf32>
    %340 = vector.broadcast %339 : vector<16x1xf32> to vector<16x32xf32>
    %341 = arith.mulf %336, %340 : vector<16x32xf32>
    %342 = vector.broadcast %321 : vector<1x32xf32> to vector<16x32xf32>
    %343 = arith.mulf %341, %342 : vector<16x32xf32>
    %344 = vector.broadcast %323 : vector<1x32xf32> to vector<16x32xf32>
    %345 = arith.addf %343, %344 : vector<16x32xf32>
    %346 = arith.truncf %345 : vector<16x32xf32> to vector<16x32xbf16>
    %c2_156 = arith.constant 2 : index
    %c0_157 = arith.constant 0 : index
    %c0_158 = arith.constant 0 : index
    %347 = vector.load %arg7[%c2_156, %c0_157, %c0_158] : memref<4x32x96xbf16, #tpu.memory_space<vmem>>, vector<1x32x96xbf16>
    %348 = vector.shape_cast %347 : vector<1x32x96xbf16> to vector<32x96xbf16>
    %cst_159 = arith.constant dense<0.000000e+00> : vector<16x96xf32>
    %349 = tpu.matmul %346, %348, %cst_159 {dimension_numbers = #tpu.dot_dimension_numbers<[1], [0], [0], [1], [0, 0, 1, 1], [], []>} : vector<16x32xbf16>, vector<32x96xbf16>, vector<16x96xf32> -> vector<16x96xf32>
    %c2_160 = arith.constant 2 : index
    %c0_161 = arith.constant 0 : index
    %c0_162 = arith.constant 0 : index
    %350 = vector.load %arg8[%c2_160, %c0_161, %c0_162] : memref<4x1x96xf32, #tpu.memory_space<vmem>>, vector<1x1x96xf32>
    %351 = vector.shape_cast %350 : vector<1x1x96xf32> to vector<1x96xf32>
    %352 = vector.broadcast %351 : vector<1x96xf32> to vector<16x96xf32>
    %353 = arith.addf %349, %352 : vector<16x96xf32>
    %354 = vector.extract_strided_slice %353 {offsets = [0, 0], sizes = [16, 16], strides = [1, 1]} : vector<16x96xf32> to vector<16x16xf32>
    %cst_163 = arith.constant 2.500000e-01 : f32
    %355 = vector.broadcast %cst_163 : f32 to vector<16x16xf32>
    %356 = arith.mulf %354, %355 : vector<16x16xf32>
    %357 = vector.shape_cast %356 : vector<16x16xf32> to vector<1x16x16xf32>
    %358 = arith.truncf %357 : vector<1x16x16xf32> to vector<1x16x16xbf16>
    %359 = vector.extract_strided_slice %353 {offsets = [0, 32], sizes = [16, 16], strides = [1, 1]} : vector<16x96xf32> to vector<16x16xf32>
    %360 = vector.shape_cast %359 : vector<16x16xf32> to vector<1x16x16xf32>
    %361 = arith.truncf %360 : vector<1x16x16xf32> to vector<1x16x16xbf16>
    %362 = vector.extract_strided_slice %353 {offsets = [0, 64], sizes = [16, 16], strides = [1, 1]} : vector<16x96xf32> to vector<16x16xf32>
    %363 = vector.shape_cast %362 : vector<16x16xf32> to vector<1x16x16xf32>
    %364 = arith.truncf %363 : vector<1x16x16xf32> to vector<1x16x16xbf16>
    "tpu.trace_start"() <{level = 10 : i32, message = "bqd,bkd->bqk"}> : () -> ()
    %cst_164 = arith.constant dense<0.000000e+00> : vector<1x16x16xf32>
    %365 = tpu.matmul %358, %361, %cst_164 {dimension_numbers = #tpu.dot_dimension_numbers<[2], [2], [1], [1], [0, 0, 0, 1, 1, 1], [0], [0]>} : vector<1x16x16xbf16>, vector<1x16x16xbf16>, vector<1x16x16xf32> -> vector<1x16x16xf32>
    "tpu.trace_stop"() : () -> ()
    %cst_165 = arith.constant dense<0xFF800000> : vector<1x16xf32>
    %366 = vector.multi_reduction <maximumf>, %365, %cst_165 [2] : vector<1x16x16xf32> to vector<1x16xf32>
    %367 = vector.shape_cast %366 : vector<1x16xf32> to vector<1x16x1xf32>
    %368 = vector.broadcast %367 : vector<1x16x1xf32> to vector<1x16x16xf32>
    %369 = arith.subf %365, %368 : vector<1x16x16xf32>
    %370 = math.exp %369 : vector<1x16x16xf32>
    %cst_166 = arith.constant dense<0.000000e+00> : vector<1x16xf32>
    %371 = vector.multi_reduction <add>, %370, %cst_166 [2] : vector<1x16x16xf32> to vector<1x16xf32>
    %372 = vector.shape_cast %371 : vector<1x16xf32> to vector<1x16x1xf32>
    %373 = tpu.reciprocal %372 {approx = true} : vector<1x16x1xf32> -> vector<1x16x1xf32>
    %374 = vector.broadcast %373 : vector<1x16x1xf32> to vector<1x16x16xf32>
    %375 = arith.mulf %370, %374 : vector<1x16x16xf32>
    %376 = arith.truncf %375 : vector<1x16x16xf32> to vector<1x16x16xbf16>
    "tpu.trace_start"() <{level = 10 : i32, message = "bqk,bkd->bqd"}> : () -> ()
    %cst_167 = arith.constant dense<0.000000e+00> : vector<1x16x16xf32>
    %377 = tpu.matmul %376, %364, %cst_167 {dimension_numbers = #tpu.dot_dimension_numbers<[2], [1], [1], [2], [0, 0, 0, 1, 1, 2], [0], [0]>} : vector<1x16x16xbf16>, vector<1x16x16xbf16>, vector<1x16x16xf32> -> vector<1x16x16xf32>
    "tpu.trace_stop"() : () -> ()
    %378 = vector.shape_cast %377 : vector<1x16x16xf32> to vector<16x16xf32>
    %379 = arith.truncf %378 : vector<16x16xf32> to vector<16x16xbf16>
    %c0_168 = arith.constant 0 : index
    %c0_169 = arith.constant 0 : index
    %380 = vector.load %arg24[%c0_168, %c0_169] : memref<16x32xbf16, #tpu.memory_space<vmem>>, vector<16x16xbf16>
    tpu.vector_store %arg24[%c0_168, %c0_169], %379 {strides = array<i32>} : memref<16x32xbf16, #tpu.memory_space<vmem>>, vector<16x16xbf16>,
    %381 = vector.extract_strided_slice %353 {offsets = [0, 16], sizes = [16, 16], strides = [1, 1]} : vector<16x96xf32> to vector<16x16xf32>
    %cst_170 = arith.constant 2.500000e-01 : f32
    %382 = vector.broadcast %cst_170 : f32 to vector<16x16xf32>
    %383 = arith.mulf %381, %382 : vector<16x16xf32>
    %384 = vector.shape_cast %383 : vector<16x16xf32> to vector<1x16x16xf32>
    %385 = arith.truncf %384 : vector<1x16x16xf32> to vector<1x16x16xbf16>
    %386 = vector.extract_strided_slice %353 {offsets = [0, 48], sizes = [16, 16], strides = [1, 1]} : vector<16x96xf32> to vector<16x16xf32>
    %387 = vector.shape_cast %386 : vector<16x16xf32> to vector<1x16x16xf32>
    %388 = arith.truncf %387 : vector<1x16x16xf32> to vector<1x16x16xbf16>
    %389 = vector.extract_strided_slice %353 {offsets = [0, 80], sizes = [16, 16], strides = [1, 1]} : vector<16x96xf32> to vector<16x16xf32>
    %390 = vector.shape_cast %389 : vector<16x16xf32> to vector<1x16x16xf32>
    %391 = arith.truncf %390 : vector<1x16x16xf32> to vector<1x16x16xbf16>
    "tpu.trace_start"() <{level = 10 : i32, message = "bqd,bkd->bqk"}> : () -> ()
    %cst_171 = arith.constant dense<0.000000e+00> : vector<1x16x16xf32>
    %392 = tpu.matmul %385, %388, %cst_171 {dimension_numbers = #tpu.dot_dimension_numbers<[2], [2], [1], [1], [0, 0, 0, 1, 1, 1], [0], [0]>} : vector<1x16x16xbf16>, vector<1x16x16xbf16>, vector<1x16x16xf32> -> vector<1x16x16xf32>
    "tpu.trace_stop"() : () -> ()
    %cst_172 = arith.constant dense<0xFF800000> : vector<1x16xf32>
    %393 = vector.multi_reduction <maximumf>, %392, %cst_172 [2] : vector<1x16x16xf32> to vector<1x16xf32>
    %394 = vector.shape_cast %393 : vector<1x16xf32> to vector<1x16x1xf32>
    %395 = vector.broadcast %394 : vector<1x16x1xf32> to vector<1x16x16xf32>
    %396 = arith.subf %392, %395 : vector<1x16x16xf32>
    %397 = math.exp %396 : vector<1x16x16xf32>
    %cst_173 = arith.constant dense<0.000000e+00> : vector<1x16xf32>
    %398 = vector.multi_reduction <add>, %397, %cst_173 [2] : vector<1x16x16xf32> to vector<1x16xf32>
    %399 = vector.shape_cast %398 : vector<1x16xf32> to vector<1x16x1xf32>
    %400 = tpu.reciprocal %399 {approx = true} : vector<1x16x1xf32> -> vector<1x16x1xf32>
    %401 = vector.broadcast %400 : vector<1x16x1xf32> to vector<1x16x16xf32>
    %402 = arith.mulf %397, %401 : vector<1x16x16xf32>
    %403 = arith.truncf %402 : vector<1x16x16xf32> to vector<1x16x16xbf16>
    "tpu.trace_start"() <{level = 10 : i32, message = "bqk,bkd->bqd"}> : () -> ()
    %cst_174 = arith.constant dense<0.000000e+00> : vector<1x16x16xf32>
    %404 = tpu.matmul %403, %391, %cst_174 {dimension_numbers = #tpu.dot_dimension_numbers<[2], [1], [1], [2], [0, 0, 0, 1, 1, 2], [0], [0]>} : vector<1x16x16xbf16>, vector<1x16x16xbf16>, vector<1x16x16xf32> -> vector<1x16x16xf32>
    "tpu.trace_stop"() : () -> ()
    %405 = vector.shape_cast %404 : vector<1x16x16xf32> to vector<16x16xf32>
    %406 = arith.truncf %405 : vector<16x16xf32> to vector<16x16xbf16>
    %c0_175 = arith.constant 0 : index
    %c16_176 = arith.constant 16 : index
    %407 = vector.load %arg24[%c0_175, %c16_176] : memref<16x32xbf16, #tpu.memory_space<vmem>>, vector<16x16xbf16>
    tpu.vector_store %arg24[%c0_175, %c16_176], %406 {strides = array<i32>} : memref<16x32xbf16, #tpu.memory_space<vmem>>, vector<16x16xbf16>,
    %c0_177 = arith.constant 0 : index
    %c0_178 = arith.constant 0 : index
    %408 = vector.load %arg24[%c0_177, %c0_178] : memref<16x32xbf16, #tpu.memory_space<vmem>>, vector<16x32xbf16>
    %c2_179 = arith.constant 2 : index
    %c0_180 = arith.constant 0 : index
    %c0_181 = arith.constant 0 : index
    %409 = vector.load %arg9[%c2_179, %c0_180, %c0_181] : memref<4x32x32xbf16, #tpu.memory_space<vmem>>, vector<1x32x32xbf16>
    %410 = vector.shape_cast %409 : vector<1x32x32xbf16> to vector<32x32xbf16>
    %cst_182 = arith.constant dense<0.000000e+00> : vector<16x32xf32>
    %411 = tpu.matmul %408, %410, %cst_182 {dimension_numbers = #tpu.dot_dimension_numbers<[1], [0], [0], [1], [0, 0, 1, 1], [], []>} : vector<16x32xbf16>, vector<32x32xbf16>, vector<16x32xf32> -> vector<16x32xf32>
    %c2_183 = arith.constant 2 : index
    %c0_184 = arith.constant 0 : index
    %c0_185 = arith.constant 0 : index
    %412 = vector.load %arg10[%c2_183, %c0_184, %c0_185] : memref<4x1x32xf32, #tpu.memory_space<vmem>>, vector<1x1x32xf32>
    %413 = vector.shape_cast %412 : vector<1x1x32xf32> to vector<1x32xf32>
    %414 = vector.broadcast %413 : vector<1x32xf32> to vector<16x32xf32>
    %415 = arith.addf %411, %414 : vector<16x32xf32>
    %416 = arith.addf %318, %415 : vector<16x32xf32>
    %c2_186 = arith.constant 2 : index
    %c0_187 = arith.constant 0 : index
    %c0_188 = arith.constant 0 : index
    %417 = vector.load %arg11[%c2_186, %c0_187, %c0_188] : memref<4x1x32xf32, #tpu.memory_space<vmem>>, vector<1x1x32xf32>
    %418 = vector.shape_cast %417 : vector<1x1x32xf32> to vector<1x32xf32>
    %c2_189 = arith.constant 2 : index
    %c0_190 = arith.constant 0 : index
    %c0_191 = arith.constant 0 : index
    %419 = vector.load %arg12[%c2_189, %c0_190, %c0_191] : memref<4x1x32xf32, #tpu.memory_space<vmem>>, vector<1x1x32xf32>
    %420 = vector.shape_cast %419 : vector<1x1x32xf32> to vector<1x32xf32>
    %cst_192 = arith.constant dense<0.000000e+00> : vector<16xf32>
    %421 = vector.multi_reduction <add>, %416, %cst_192 [1] : vector<16x32xf32> to vector<16xf32>
    %422 = vector.shape_cast %421 : vector<16xf32> to vector<16x1xf32>
    %cst_193 = arith.constant 3.200000e+01 : f32
    %423 = vector.broadcast %cst_193 : f32 to vector<16x1xf32>
    %424 = arith.divf %422, %423 : vector<16x1xf32>
    %425 = arith.mulf %416, %416 : vector<16x32xf32>
    %cst_194 = arith.constant dense<0.000000e+00> : vector<16xf32>
    %426 = vector.multi_reduction <add>, %425, %cst_194 [1] : vector<16x32xf32> to vector<16xf32>
    %427 = vector.shape_cast %426 : vector<16xf32> to vector<16x1xf32>
    %cst_195 = arith.constant 3.200000e+01 : f32
    %428 = vector.broadcast %cst_195 : f32 to vector<16x1xf32>
    %429 = arith.divf %427, %428 : vector<16x1xf32>
    %430 = arith.mulf %424, %424 : vector<16x1xf32>
    %431 = arith.subf %429, %430 : vector<16x1xf32>
    %432 = vector.broadcast %424 : vector<16x1xf32> to vector<16x32xf32>
    %433 = arith.subf %416, %432 : vector<16x32xf32>
    %cst_196 = arith.constant 9.99999997E-7 : f32
    %434 = vector.broadcast %cst_196 : f32 to vector<16x1xf32>
    %435 = arith.addf %431, %434 : vector<16x1xf32>
    %436 = math.rsqrt %435 : vector<16x1xf32>
    %437 = vector.broadcast %436 : vector<16x1xf32> to vector<16x32xf32>
    %438 = arith.mulf %433, %437 : vector<16x32xf32>
    %439 = vector.broadcast %418 : vector<1x32xf32> to vector<16x32xf32>
    %440 = arith.mulf %438, %439 : vector<16x32xf32>
    %441 = vector.broadcast %420 : vector<1x32xf32> to vector<16x32xf32>
    %442 = arith.addf %440, %441 : vector<16x32xf32>
    %443 = arith.truncf %442 : vector<16x32xf32> to vector<16x32xbf16>
    %c2_197 = arith.constant 2 : index
    %c0_198 = arith.constant 0 : index
    %c0_199 = arith.constant 0 : index
    %444 = vector.load %arg13[%c2_197, %c0_198, %c0_199] : memref<4x32x64xbf16, #tpu.memory_space<vmem>>, vector<1x32x64xbf16>
    %445 = vector.shape_cast %444 : vector<1x32x64xbf16> to vector<32x64xbf16>
    %cst_200 = arith.constant dense<0.000000e+00> : vector<16x64xf32>
    %446 = tpu.matmul %443, %445, %cst_200 {dimension_numbers = #tpu.dot_dimension_numbers<[1], [0], [0], [1], [0, 0, 1, 1], [], []>} : vector<16x32xbf16>, vector<32x64xbf16>, vector<16x64xf32> -> vector<16x64xf32>
    %c2_201 = arith.constant 2 : index
    %c0_202 = arith.constant 0 : index
    %c0_203 = arith.constant 0 : index
    %447 = vector.load %arg14[%c2_201, %c0_202, %c0_203] : memref<4x1x64xf32, #tpu.memory_space<vmem>>, vector<1x1x64xf32>
    %448 = vector.shape_cast %447 : vector<1x1x64xf32> to vector<1x64xf32>
    %449 = vector.broadcast %448 : vector<1x64xf32> to vector<16x64xf32>
    %450 = arith.addf %446, %449 : vector<16x64xf32>
    %451 = arith.mulf %450, %450 : vector<16x64xf32>
    %452 = arith.mulf %450, %451 : vector<16x64xf32>
    %cst_204 = arith.constant 4.471500e-02 : f32
    %453 = vector.broadcast %cst_204 : f32 to vector<16x64xf32>
    %454 = arith.mulf %453, %452 : vector<16x64xf32>
    %455 = arith.addf %450, %454 : vector<16x64xf32>
    %cst_205 = arith.constant 0.797884583 : f32
    %456 = vector.broadcast %cst_205 : f32 to vector<16x64xf32>
    %457 = arith.mulf %456, %455 : vector<16x64xf32>
    %458 = math.tanh %457 : vector<16x64xf32>
    %cst_206 = arith.constant 1.000000e+00 : f32
    %459 = vector.broadcast %cst_206 : f32 to vector<16x64xf32>
    %460 = arith.addf %459, %458 : vector<16x64xf32>
    %cst_207 = arith.constant 5.000000e-01 : f32
    %461 = vector.broadcast %cst_207 : f32 to vector<16x64xf32>
    %462 = arith.mulf %461, %460 : vector<16x64xf32>
    %463 = arith.mulf %450, %462 : vector<16x64xf32>
    %464 = arith.truncf %463 : vector<16x64xf32> to vector<16x64xbf16>
    %c2_208 = arith.constant 2 : index
    %c0_209 = arith.constant 0 : index
    %c0_210 = arith.constant 0 : index
    %465 = vector.load %arg15[%c2_208, %c0_209, %c0_210] : memref<4x64x32xbf16, #tpu.memory_space<vmem>>, vector<1x64x32xbf16>
    %466 = vector.shape_cast %465 : vector<1x64x32xbf16> to vector<64x32xbf16>
    %cst_211 = arith.constant dense<0.000000e+00> : vector<16x32xf32>
    %467 = tpu.matmul %464, %466, %cst_211 {dimension_numbers = #tpu.dot_dimension_numbers<[1], [0], [0], [1], [0, 0, 1, 1], [], []>} : vector<16x64xbf16>, vector<64x32xbf16>, vector<16x32xf32> -> vector<16x32xf32>
    %c2_212 = arith.constant 2 : index
    %c0_213 = arith.constant 0 : index
    %c0_214 = arith.constant 0 : index
    %468 = vector.load %arg16[%c2_212, %c0_213, %c0_214] : memref<4x1x32xf32, #tpu.memory_space<vmem>>, vector<1x1x32xf32>
    %469 = vector.shape_cast %468 : vector<1x1x32xf32> to vector<1x32xf32>
    %470 = vector.broadcast %469 : vector<1x32xf32> to vector<16x32xf32>
    %471 = arith.addf %467, %470 : vector<16x32xf32>
    %472 = arith.addf %416, %471 : vector<16x32xf32>
    %473 = arith.truncf %472 : vector<16x32xf32> to vector<16x32xbf16>
    %c3 = arith.constant 3 : index
    %c0_215 = arith.constant 0 : index
    %c0_216 = arith.constant 0 : index
    %474 = vector.load %arg5[%c3, %c0_215, %c0_216] : memref<4x1x32xf32, #tpu.memory_space<vmem>>, vector<1x1x32xf32>
    %475 = vector.shape_cast %474 : vector<1x1x32xf32> to vector<1x32xf32>
    %c3_217 = arith.constant 3 : index
    %c0_218 = arith.constant 0 : index
    %c0_219 = arith.constant 0 : index
    %476 = vector.load %arg6[%c3_217, %c0_218, %c0_219] : memref<4x1x32xf32, #tpu.memory_space<vmem>>, vector<1x1x32xf32>
    %477 = vector.shape_cast %476 : vector<1x1x32xf32> to vector<1x32xf32>
    %cst_220 = arith.constant dense<0.000000e+00> : vector<16xf32>
    %478 = vector.multi_reduction <add>, %472, %cst_220 [1] : vector<16x32xf32> to vector<16xf32>
    %479 = vector.shape_cast %478 : vector<16xf32> to vector<16x1xf32>
    %cst_221 = arith.constant 3.200000e+01 : f32
    %480 = vector.broadcast %cst_221 : f32 to vector<16x1xf32>
    %481 = arith.divf %479, %480 : vector<16x1xf32>
    %482 = arith.mulf %472, %472 : vector<16x32xf32>
    %cst_222 = arith.constant dense<0.000000e+00> : vector<16xf32>
    %483 = vector.multi_reduction <add>, %482, %cst_222 [1] : vector<16x32xf32> to vector<16xf32>
    %484 = vector.shape_cast %483 : vector<16xf32> to vector<16x1xf32>
    %cst_223 = arith.constant 3.200000e+01 : f32
    %485 = vector.broadcast %cst_223 : f32 to vector<16x1xf32>
    %486 = arith.divf %484, %485 : vector<16x1xf32>
    %487 = arith.mulf %481, %481 : vector<16x1xf32>
    %488 = arith.subf %486, %487 : vector<16x1xf32>
    %489 = vector.broadcast %481 : vector<16x1xf32> to vector<16x32xf32>
    %490 = arith.subf %472, %489 : vector<16x32xf32>
    %cst_224 = arith.constant 9.99999997E-7 : f32
    %491 = vector.broadcast %cst_224 : f32 to vector<16x1xf32>
    %492 = arith.addf %488, %491 : vector<16x1xf32>
    %493 = math.rsqrt %492 : vector<16x1xf32>
    %494 = vector.broadcast %493 : vector<16x1xf32> to vector<16x32xf32>
    %495 = arith.mulf %490, %494 : vector<16x32xf32>
    %496 = vector.broadcast %475 : vector<1x32xf32> to vector<16x32xf32>
    %497 = arith.mulf %495, %496 : vector<16x32xf32>
    %498 = vector.broadcast %477 : vector<1x32xf32> to vector<16x32xf32>
    %499 = arith.addf %497, %498 : vector<16x32xf32>
    %500 = arith.truncf %499 : vector<16x32xf32> to vector<16x32xbf16>
    %c3_225 = arith.constant 3 : index
    %c0_226 = arith.constant 0 : index
    %c0_227 = arith.constant 0 : index
    %501 = vector.load %arg7[%c3_225, %c0_226, %c0_227] : memref<4x32x96xbf16, #tpu.memory_space<vmem>>, vector<1x32x96xbf16>
    %502 = vector.shape_cast %501 : vector<1x32x96xbf16> to vector<32x96xbf16>
    %cst_228 = arith.constant dense<0.000000e+00> : vector<16x96xf32>
    %503 = tpu.matmul %500, %502, %cst_228 {dimension_numbers = #tpu.dot_dimension_numbers<[1], [0], [0], [1], [0, 0, 1, 1], [], []>} : vector<16x32xbf16>, vector<32x96xbf16>, vector<16x96xf32> -> vector<16x96xf32>
    %c3_229 = arith.constant 3 : index
    %c0_230 = arith.constant 0 : index
    %c0_231 = arith.constant 0 : index
    %504 = vector.load %arg8[%c3_229, %c0_230, %c0_231] : memref<4x1x96xf32, #tpu.memory_space<vmem>>, vector<1x1x96xf32>
    %505 = vector.shape_cast %504 : vector<1x1x96xf32> to vector<1x96xf32>
    %506 = vector.broadcast %505 : vector<1x96xf32> to vector<16x96xf32>
    %507 = arith.addf %503, %506 : vector<16x96xf32>
    %508 = vector.extract_strided_slice %507 {offsets = [0, 0], sizes = [16, 16], strides = [1, 1]} : vector<16x96xf32> to vector<16x16xf32>
    %cst_232 = arith.constant 2.500000e-01 : f32
    %509 = vector.broadcast %cst_232 : f32 to vector<16x16xf32>
    %510 = arith.mulf %508, %509 : vector<16x16xf32>
    %511 = vector.shape_cast %510 : vector<16x16xf32> to vector<1x16x16xf32>
    %512 = arith.truncf %511 : vector<1x16x16xf32> to vector<1x16x16xbf16>
    %513 = vector.extract_strided_slice %507 {offsets = [0, 32], sizes = [16, 16], strides = [1, 1]} : vector<16x96xf32> to vector<16x16xf32>
    %514 = vector.shape_cast %513 : vector<16x16xf32> to vector<1x16x16xf32>
    %515 = arith.truncf %514 : vector<1x16x16xf32> to vector<1x16x16xbf16>
    %516 = vector.extract_strided_slice %507 {offsets = [0, 64], sizes = [16, 16], strides = [1, 1]} : vector<16x96xf32> to vector<16x16xf32>
    %517 = vector.shape_cast %516 : vector<16x16xf32> to vector<1x16x16xf32>
    %518 = arith.truncf %517 : vector<1x16x16xf32> to vector<1x16x16xbf16>
    "tpu.trace_start"() <{level = 10 : i32, message = "bqd,bkd->bqk"}> : () -> ()
    %cst_233 = arith.constant dense<0.000000e+00> : vector<1x16x16xf32>
    %519 = tpu.matmul %512, %515, %cst_233 {dimension_numbers = #tpu.dot_dimension_numbers<[2], [2], [1], [1], [0, 0, 0, 1, 1, 1], [0], [0]>} : vector<1x16x16xbf16>, vector<1x16x16xbf16>, vector<1x16x16xf32> -> vector<1x16x16xf32>
    "tpu.trace_stop"() : () -> ()
    %cst_234 = arith.constant dense<0xFF800000> : vector<1x16xf32>
    %520 = vector.multi_reduction <maximumf>, %519, %cst_234 [2] : vector<1x16x16xf32> to vector<1x16xf32>
    %521 = vector.shape_cast %520 : vector<1x16xf32> to vector<1x16x1xf32>
    %522 = vector.broadcast %521 : vector<1x16x1xf32> to vector<1x16x16xf32>
    %523 = arith.subf %519, %522 : vector<1x16x16xf32>
    %524 = math.exp %523 : vector<1x16x16xf32>
    %cst_235 = arith.constant dense<0.000000e+00> : vector<1x16xf32>
    %525 = vector.multi_reduction <add>, %524, %cst_235 [2] : vector<1x16x16xf32> to vector<1x16xf32>
    %526 = vector.shape_cast %525 : vector<1x16xf32> to vector<1x16x1xf32>
    %527 = tpu.reciprocal %526 {approx = true} : vector<1x16x1xf32> -> vector<1x16x1xf32>
    %528 = vector.broadcast %527 : vector<1x16x1xf32> to vector<1x16x16xf32>
    %529 = arith.mulf %524, %528 : vector<1x16x16xf32>
    %530 = arith.truncf %529 : vector<1x16x16xf32> to vector<1x16x16xbf16>
    "tpu.trace_start"() <{level = 10 : i32, message = "bqk,bkd->bqd"}> : () -> ()
    %cst_236 = arith.constant dense<0.000000e+00> : vector<1x16x16xf32>
    %531 = tpu.matmul %530, %518, %cst_236 {dimension_numbers = #tpu.dot_dimension_numbers<[2], [1], [1], [2], [0, 0, 0, 1, 1, 2], [0], [0]>} : vector<1x16x16xbf16>, vector<1x16x16xbf16>, vector<1x16x16xf32> -> vector<1x16x16xf32>
    "tpu.trace_stop"() : () -> ()
    %532 = vector.shape_cast %531 : vector<1x16x16xf32> to vector<16x16xf32>
    %533 = arith.truncf %532 : vector<16x16xf32> to vector<16x16xbf16>
    %c0_237 = arith.constant 0 : index
    %c0_238 = arith.constant 0 : index
    %534 = vector.load %arg24[%c0_237, %c0_238] : memref<16x32xbf16, #tpu.memory_space<vmem>>, vector<16x16xbf16>
    tpu.vector_store %arg24[%c0_237, %c0_238], %533 {strides = array<i32>} : memref<16x32xbf16, #tpu.memory_space<vmem>>, vector<16x16xbf16>,
    %535 = vector.extract_strided_slice %507 {offsets = [0, 16], sizes = [16, 16], strides = [1, 1]} : vector<16x96xf32> to vector<16x16xf32>
    %cst_239 = arith.constant 2.500000e-01 : f32
    %536 = vector.broadcast %cst_239 : f32 to vector<16x16xf32>
    %537 = arith.mulf %535, %536 : vector<16x16xf32>
    %538 = vector.shape_cast %537 : vector<16x16xf32> to vector<1x16x16xf32>
    %539 = arith.truncf %538 : vector<1x16x16xf32> to vector<1x16x16xbf16>
    %540 = vector.extract_strided_slice %507 {offsets = [0, 48], sizes = [16, 16], strides = [1, 1]} : vector<16x96xf32> to vector<16x16xf32>
    %541 = vector.shape_cast %540 : vector<16x16xf32> to vector<1x16x16xf32>
    %542 = arith.truncf %541 : vector<1x16x16xf32> to vector<1x16x16xbf16>
    %543 = vector.extract_strided_slice %507 {offsets = [0, 80], sizes = [16, 16], strides = [1, 1]} : vector<16x96xf32> to vector<16x16xf32>
    %544 = vector.shape_cast %543 : vector<16x16xf32> to vector<1x16x16xf32>
    %545 = arith.truncf %544 : vector<1x16x16xf32> to vector<1x16x16xbf16>
    "tpu.trace_start"() <{level = 10 : i32, message = "bqd,bkd->bqk"}> : () -> ()
    %cst_240 = arith.constant dense<0.000000e+00> : vector<1x16x16xf32>
    %546 = tpu.matmul %539, %542, %cst_240 {dimension_numbers = #tpu.dot_dimension_numbers<[2], [2], [1], [1], [0, 0, 0, 1, 1, 1], [0], [0]>} : vector<1x16x16xbf16>, vector<1x16x16xbf16>, vector<1x16x16xf32> -> vector<1x16x16xf32>
    "tpu.trace_stop"() : () -> ()
    %cst_241 = arith.constant dense<0xFF800000> : vector<1x16xf32>
    %547 = vector.multi_reduction <maximumf>, %546, %cst_241 [2] : vector<1x16x16xf32> to vector<1x16xf32>
    %548 = vector.shape_cast %547 : vector<1x16xf32> to vector<1x16x1xf32>
    %549 = vector.broadcast %548 : vector<1x16x1xf32> to vector<1x16x16xf32>
    %550 = arith.subf %546, %549 : vector<1x16x16xf32>
    %551 = math.exp %550 : vector<1x16x16xf32>
    %cst_242 = arith.constant dense<0.000000e+00> : vector<1x16xf32>
    %552 = vector.multi_reduction <add>, %551, %cst_242 [2] : vector<1x16x16xf32> to vector<1x16xf32>
    %553 = vector.shape_cast %552 : vector<1x16xf32> to vector<1x16x1xf32>
    %554 = tpu.reciprocal %553 {approx = true} : vector<1x16x1xf32> -> vector<1x16x1xf32>
    %555 = vector.broadcast %554 : vector<1x16x1xf32> to vector<1x16x16xf32>
    %556 = arith.mulf %551, %555 : vector<1x16x16xf32>
    %557 = arith.truncf %556 : vector<1x16x16xf32> to vector<1x16x16xbf16>
    "tpu.trace_start"() <{level = 10 : i32, message = "bqk,bkd->bqd"}> : () -> ()
    %cst_243 = arith.constant dense<0.000000e+00> : vector<1x16x16xf32>
    %558 = tpu.matmul %557, %545, %cst_243 {dimension_numbers = #tpu.dot_dimension_numbers<[2], [1], [1], [2], [0, 0, 0, 1, 1, 2], [0], [0]>} : vector<1x16x16xbf16>, vector<1x16x16xbf16>, vector<1x16x16xf32> -> vector<1x16x16xf32>
    "tpu.trace_stop"() : () -> ()
    %559 = vector.shape_cast %558 : vector<1x16x16xf32> to vector<16x16xf32>
    %560 = arith.truncf %559 : vector<16x16xf32> to vector<16x16xbf16>
    %c0_244 = arith.constant 0 : index
    %c16_245 = arith.constant 16 : index
    %561 = vector.load %arg24[%c0_244, %c16_245] : memref<16x32xbf16, #tpu.memory_space<vmem>>, vector<16x16xbf16>
    tpu.vector_store %arg24[%c0_244, %c16_245], %560 {strides = array<i32>} : memref<16x32xbf16, #tpu.memory_space<vmem>>, vector<16x16xbf16>,
    %c0_246 = arith.constant 0 : index
    %c0_247 = arith.constant 0 : index
    %562 = vector.load %arg24[%c0_246, %c0_247] : memref<16x32xbf16, #tpu.memory_space<vmem>>, vector<16x32xbf16>
    %c3_248 = arith.constant 3 : index
    %c0_249 = arith.constant 0 : index
    %c0_250 = arith.constant 0 : index
    %563 = vector.load %arg9[%c3_248, %c0_249, %c0_250] : memref<4x32x32xbf16, #tpu.memory_space<vmem>>, vector<1x32x32xbf16>
    %564 = vector.shape_cast %563 : vector<1x32x32xbf16> to vector<32x32xbf16>
    %cst_251 = arith.constant dense<0.000000e+00> : vector<16x32xf32>
    %565 = tpu.matmul %562, %564, %cst_251 {dimension_numbers = #tpu.dot_dimension_numbers<[1], [0], [0], [1], [0, 0, 1, 1], [], []>} : vector<16x32xbf16>, vector<32x32xbf16>, vector<16x32xf32> -> vector<16x32xf32>
    %c3_252 = arith.constant 3 : index
    %c0_253 = arith.constant 0 : index
    %c0_254 = arith.constant 0 : index
    %566 = vector.load %arg10[%c3_252, %c0_253, %c0_254] : memref<4x1x32xf32, #tpu.memory_space<vmem>>, vector<1x1x32xf32>
    %567 = vector.shape_cast %566 : vector<1x1x32xf32> to vector<1x32xf32>
    %568 = vector.broadcast %567 : vector<1x32xf32> to vector<16x32xf32>
    %569 = arith.addf %565, %568 : vector<16x32xf32>
    %570 = arith.addf %472, %569 : vector<16x32xf32>
    %c3_255 = arith.constant 3 : index
    %c0_256 = arith.constant 0 : index
    %c0_257 = arith.constant 0 : index
    %571 = vector.load %arg11[%c3_255, %c0_256, %c0_257] : memref<4x1x32xf32, #tpu.memory_space<vmem>>, vector<1x1x32xf32>
    %572 = vector.shape_cast %571 : vector<1x1x32xf32> to vector<1x32xf32>
    %c3_258 = arith.constant 3 : index
    %c0_259 = arith.constant 0 : index
    %c0_260 = arith.constant 0 : index
    %573 = vector.load %arg12[%c3_258, %c0_259, %c0_260] : memref<4x1x32xf32, #tpu.memory_space<vmem>>, vector<1x1x32xf32>
    %574 = vector.shape_cast %573 : vector<1x1x32xf32> to vector<1x32xf32>
    %cst_261 = arith.constant dense<0.000000e+00> : vector<16xf32>
    %575 = vector.multi_reduction <add>, %570, %cst_261 [1] : vector<16x32xf32> to vector<16xf32>
    %576 = vector.shape_cast %575 : vector<16xf32> to vector<16x1xf32>
    %cst_262 = arith.constant 3.200000e+01 : f32
    %577 = vector.broadcast %cst_262 : f32 to vector<16x1xf32>
    %578 = arith.divf %576, %577 : vector<16x1xf32>
    %579 = arith.mulf %570, %570 : vector<16x32xf32>
    %cst_263 = arith.constant dense<0.000000e+00> : vector<16xf32>
    %580 = vector.multi_reduction <add>, %579, %cst_263 [1] : vector<16x32xf32> to vector<16xf32>
    %581 = vector.shape_cast %580 : vector<16xf32> to vector<16x1xf32>
    %cst_264 = arith.constant 3.200000e+01 : f32
    %582 = vector.broadcast %cst_264 : f32 to vector<16x1xf32>
    %583 = arith.divf %581, %582 : vector<16x1xf32>
    %584 = arith.mulf %578, %578 : vector<16x1xf32>
    %585 = arith.subf %583, %584 : vector<16x1xf32>
    %586 = vector.broadcast %578 : vector<16x1xf32> to vector<16x32xf32>
    %587 = arith.subf %570, %586 : vector<16x32xf32>
    %cst_265 = arith.constant 9.99999997E-7 : f32
    %588 = vector.broadcast %cst_265 : f32 to vector<16x1xf32>
    %589 = arith.addf %585, %588 : vector<16x1xf32>
    %590 = math.rsqrt %589 : vector<16x1xf32>
    %591 = vector.broadcast %590 : vector<16x1xf32> to vector<16x32xf32>
    %592 = arith.mulf %587, %591 : vector<16x32xf32>
    %593 = vector.broadcast %572 : vector<1x32xf32> to vector<16x32xf32>
    %594 = arith.mulf %592, %593 : vector<16x32xf32>
    %595 = vector.broadcast %574 : vector<1x32xf32> to vector<16x32xf32>
    %596 = arith.addf %594, %595 : vector<16x32xf32>
    %597 = arith.truncf %596 : vector<16x32xf32> to vector<16x32xbf16>
    %c3_266 = arith.constant 3 : index
    %c0_267 = arith.constant 0 : index
    %c0_268 = arith.constant 0 : index
    %598 = vector.load %arg13[%c3_266, %c0_267, %c0_268] : memref<4x32x64xbf16, #tpu.memory_space<vmem>>, vector<1x32x64xbf16>
    %599 = vector.shape_cast %598 : vector<1x32x64xbf16> to vector<32x64xbf16>
    %cst_269 = arith.constant dense<0.000000e+00> : vector<16x64xf32>
    %600 = tpu.matmul %597, %599, %cst_269 {dimension_numbers = #tpu.dot_dimension_numbers<[1], [0], [0], [1], [0, 0, 1, 1], [], []>} : vector<16x32xbf16>, vector<32x64xbf16>, vector<16x64xf32> -> vector<16x64xf32>
    %c3_270 = arith.constant 3 : index
    %c0_271 = arith.constant 0 : index
    %c0_272 = arith.constant 0 : index
    %601 = vector.load %arg14[%c3_270, %c0_271, %c0_272] : memref<4x1x64xf32, #tpu.memory_space<vmem>>, vector<1x1x64xf32>
    %602 = vector.shape_cast %601 : vector<1x1x64xf32> to vector<1x64xf32>
    %603 = vector.broadcast %602 : vector<1x64xf32> to vector<16x64xf32>
    %604 = arith.addf %600, %603 : vector<16x64xf32>
    %605 = arith.mulf %604, %604 : vector<16x64xf32>
    %606 = arith.mulf %604, %605 : vector<16x64xf32>
    %cst_273 = arith.constant 4.471500e-02 : f32
    %607 = vector.broadcast %cst_273 : f32 to vector<16x64xf32>
    %608 = arith.mulf %607, %606 : vector<16x64xf32>
    %609 = arith.addf %604, %608 : vector<16x64xf32>
    %cst_274 = arith.constant 0.797884583 : f32
    %610 = vector.broadcast %cst_274 : f32 to vector<16x64xf32>
    %611 = arith.mulf %610, %609 : vector<16x64xf32>
    %612 = math.tanh %611 : vector<16x64xf32>
    %cst_275 = arith.constant 1.000000e+00 : f32
    %613 = vector.broadcast %cst_275 : f32 to vector<16x64xf32>
    %614 = arith.addf %613, %612 : vector<16x64xf32>
    %cst_276 = arith.constant 5.000000e-01 : f32
    %615 = vector.broadcast %cst_276 : f32 to vector<16x64xf32>
    %616 = arith.mulf %615, %614 : vector<16x64xf32>
    %617 = arith.mulf %604, %616 : vector<16x64xf32>
    %618 = arith.truncf %617 : vector<16x64xf32> to vector<16x64xbf16>
    %c3_277 = arith.constant 3 : index
    %c0_278 = arith.constant 0 : index
    %c0_279 = arith.constant 0 : index
    %619 = vector.load %arg15[%c3_277, %c0_278, %c0_279] : memref<4x64x32xbf16, #tpu.memory_space<vmem>>, vector<1x64x32xbf16>
    %620 = vector.shape_cast %619 : vector<1x64x32xbf16> to vector<64x32xbf16>
    %cst_280 = arith.constant dense<0.000000e+00> : vector<16x32xf32>
    %621 = tpu.matmul %618, %620, %cst_280 {dimension_numbers = #tpu.dot_dimension_numbers<[1], [0], [0], [1], [0, 0, 1, 1], [], []>} : vector<16x64xbf16>, vector<64x32xbf16>, vector<16x32xf32> -> vector<16x32xf32>
    %c3_281 = arith.constant 3 : index
    %c0_282 = arith.constant 0 : index
    %c0_283 = arith.constant 0 : index
    %622 = vector.load %arg16[%c3_281, %c0_282, %c0_283] : memref<4x1x32xf32, #tpu.memory_space<vmem>>, vector<1x1x32xf32>
    %623 = vector.shape_cast %622 : vector<1x1x32xf32> to vector<1x32xf32>
    %624 = vector.broadcast %623 : vector<1x32xf32> to vector<16x32xf32>
    %625 = arith.addf %621, %624 : vector<16x32xf32>
    %626 = arith.addf %570, %625 : vector<16x32xf32>
    %627 = arith.truncf %626 : vector<16x32xf32> to vector<16x32xbf16>
    %628 = tpu.concatenate %165, %319, %473, %627 in 1 : vector<16x32xbf16>, vector<16x32xbf16>, vector<16x32xbf16>, vector<16x32xbf16> -> vector<16x128xbf16>
    %c0_284 = arith.constant 0 : index
    %c0_285 = arith.constant 0 : index
    %629 = vector.load %arg17[%c0_284, %c0_285] : memref<128x32xbf16, #tpu.memory_space<vmem>>, vector<128x32xbf16>
    %cst_286 = arith.constant dense<0.000000e+00> : vector<16x32xf32>
    %630 = tpu.matmul %628, %629, %cst_286 {dimension_numbers = #tpu.dot_dimension_numbers<[1], [0], [0], [1], [0, 0, 1, 1], [], []>} : vector<16x128xbf16>, vector<128x32xbf16>, vector<16x32xf32> -> vector<16x32xf32>
    %c0_287 = arith.constant 0 : index
    %c0_288 = arith.constant 0 : index
    %631 = vector.load %arg18[%c0_287, %c0_288] : memref<1x32xf32, #tpu.memory_space<vmem>>, vector<1x32xf32>
    %632 = vector.broadcast %631 : vector<1x32xf32> to vector<16x32xf32>
    %633 = arith.addf %630, %632 : vector<16x32xf32>
    %634 = arith.truncf %633 : vector<16x32xf32> to vector<16x32xbf16>
    %c0_289 = arith.constant 0 : index
    %c0_290 = arith.constant 0 : index
    %635 = vector.load %arg19[%c0_289, %c0_290] : memref<32x32xbf16, #tpu.memory_space<vmem>>, vector<32x32xbf16>
    %cst_291 = arith.constant dense<0.000000e+00> : vector<16x32xf32>
    %636 = tpu.matmul %634, %635, %cst_291 {dimension_numbers = #tpu.dot_dimension_numbers<[1], [0], [0], [1], [0, 0, 1, 1], [], []>} : vector<16x32xbf16>, vector<32x32xbf16>, vector<16x32xf32> -> vector<16x32xf32>
    %c0_292 = arith.constant 0 : index
    %c0_293 = arith.constant 0 : index
    %637 = vector.load %arg20[%c0_292, %c0_293] : memref<1x32xf32, #tpu.memory_space<vmem>>, vector<1x32xf32>
    %638 = vector.broadcast %637 : vector<1x32xf32> to vector<16x32xf32>
    %639 = arith.addf %636, %638 : vector<16x32xf32>
    %640 = arith.mulf %639, %639 : vector<16x32xf32>
    %641 = arith.mulf %639, %640 : vector<16x32xf32>
    %cst_294 = arith.constant 4.471500e-02 : f32
    %642 = vector.broadcast %cst_294 : f32 to vector<16x32xf32>
    %643 = arith.mulf %642, %641 : vector<16x32xf32>
    %644 = arith.addf %639, %643 : vector<16x32xf32>
    %cst_295 = arith.constant 0.797884583 : f32
    %645 = vector.broadcast %cst_295 : f32 to vector<16x32xf32>
    %646 = arith.mulf %645, %644 : vector<16x32xf32>
    %647 = math.tanh %646 : vector<16x32xf32>
    %cst_296 = arith.constant 1.000000e+00 : f32
    %648 = vector.broadcast %cst_296 : f32 to vector<16x32xf32>
    %649 = arith.addf %648, %647 : vector<16x32xf32>
    %cst_297 = arith.constant 5.000000e-01 : f32
    %650 = vector.broadcast %cst_297 : f32 to vector<16x32xf32>
    %651 = arith.mulf %650, %649 : vector<16x32xf32>
    %652 = arith.mulf %639, %651 : vector<16x32xf32>
    %653 = arith.truncf %652 : vector<16x32xf32> to vector<16x32xbf16>
    %c0_298 = arith.constant 0 : index
    %c0_299 = arith.constant 0 : index
    %654 = vector.load %arg21[%c0_298, %c0_299] : memref<32x2xbf16, #tpu.memory_space<vmem>>, vector<32x2xbf16>
    %cst_300 = arith.constant dense<0.000000e+00> : vector<16x2xf32>
    %655 = tpu.matmul %653, %654, %cst_300 {dimension_numbers = #tpu.dot_dimension_numbers<[1], [0], [0], [1], [0, 0, 1, 1], [], []>} : vector<16x32xbf16>, vector<32x2xbf16>, vector<16x2xf32> -> vector<16x2xf32>
    %c0_301 = arith.constant 0 : index
    %c0_302 = arith.constant 0 : index
    %656 = vector.load %arg22[%c0_301, %c0_302] : memref<1x2xf32, #tpu.memory_space<vmem>>, vector<1x2xf32>
    %657 = vector.broadcast %656 : vector<1x2xf32> to vector<16x2xf32>
    %658 = arith.addf %655, %657 : vector<16x2xf32>
    %cst_303 = arith.constant dense<0xFF800000> : vector<16xf32>
    %659 = vector.multi_reduction <maximumf>, %658, %cst_303 [1] : vector<16x2xf32> to vector<16xf32>
    %660 = vector.shape_cast %659 : vector<16xf32> to vector<16x1xf32>
    %661 = vector.broadcast %660 : vector<16x1xf32> to vector<16x2xf32>
    %662 = arith.subf %658, %661 : vector<16x2xf32>
    %663 = math.exp %662 : vector<16x2xf32>
    %cst_304 = arith.constant dense<0.000000e+00> : vector<16xf32>
    %664 = vector.multi_reduction <add>, %663, %cst_304 [1] : vector<16x2xf32> to vector<16xf32>
    %665 = vector.shape_cast %664 : vector<16xf32> to vector<16x1xf32>
    %666 = vector.broadcast %665 : vector<16x1xf32> to vector<16x2xf32>
    %667 = arith.divf %663, %666 : vector<16x2xf32>
    %668 = vector.shape_cast %667 : vector<16x2xf32> to vector<1x16x2xf32>
    %669 = vector.extract_strided_slice %668 {offsets = [0, 0, 0], sizes = [1, 16, 1], strides = [1, 1, 1]} : vector<1x16x2xf32> to vector<1x16x1xf32>
    %670 = vector.shape_cast %669 : vector<1x16x1xf32> to vector<1x16xf32>
    %c0_305 = arith.constant 0 : index
    %c0_306 = arith.constant 0 : index
    %c0_307 = arith.constant 0 : index
    %671 = vector.load %arg23[%c0_305, %c0_306, %c0_307] : memref<1x2x16xf32, #tpu.memory_space<vmem>>, vector<1x1x16xf32>
    %672 = vector.shape_cast %671 : vector<1x1x16xf32> to vector<1x16xf32>
    %673 = vector.shape_cast %670 : vector<1x16xf32> to vector<1x1x16xf32>
    tpu.vector_store %arg23[%c0_305, %c0_306, %c0_307], %673 {strides = array<i32>} : memref<1x2x16xf32, #tpu.memory_space<vmem>>, vector<1x1x16xf32>,
    %674 = vector.extract_strided_slice %668 {offsets = [0, 0, 1], sizes = [1, 16, 1], strides = [1, 1, 1]} : vector<1x16x2xf32> to vector<1x16x1xf32>
    %675 = vector.shape_cast %674 : vector<1x16x1xf32> to vector<1x16xf32>
    %c0_308 = arith.constant 0 : index
    %c1_309 = arith.constant 1 : index
    %c0_310 = arith.constant 0 : index
    %676 = vector.load %arg23[%c0_308, %c1_309, %c0_310] : memref<1x2x16xf32, #tpu.memory_space<vmem>>, vector<1x1x16xf32>
    %677 = vector.shape_cast %676 : vector<1x1x16xf32> to vector<1x16xf32>
    %678 = vector.shape_cast %675 : vector<1x16xf32> to vector<1x1x16xf32>
    tpu.vector_store %arg23[%c0_308, %c1_309, %c0_310], %678 {strides = array<i32>} : memref<1x2x16xf32, #tpu.memory_space<vmem>>, vector<1x1x16xf32>,
    return
  }
  func.func @transform_0(%arg0: i32) -> (i32, i32, i32) {
    %c0_i32 = arith.constant 0 : i32
    %c0_i32_0 = arith.constant 0 : i32
    %c0_i32_1 = arith.constant 0 : i32
    return %arg0, %c0_i32, %c0_i32_0 : i32, i32, i32
  }
  func.func @transform_1(%arg0: i32) -> (i32, i32) {
    %c0_i32 = arith.constant 0 : i32
    %c0_i32_0 = arith.constant 0 : i32
    %c0_i32_1 = arith.constant 0 : i32
    return %c0_i32, %c0_i32_0 : i32, i32
  }
  func.func @transform_2(%arg0: i32) -> (i32, i32) {
    %c0_i32 = arith.constant 0 : i32
    %c0_i32_0 = arith.constant 0 : i32
    %c0_i32_1 = arith.constant 0 : i32
    return %c0_i32, %c0_i32_0 : i32, i32
  }
  func.func @transform_3(%arg0: i32) -> (i32, i32) {
    %c0_i32 = arith.constant 0 : i32
    %c0_i32_0 = arith.constant 0 : i32
    %c0_i32_1 = arith.constant 0 : i32
    return %c0_i32, %c0_i32_0 : i32, i32
  }
  func.func @transform_4(%arg0: i32) -> (i32, i32, i32) {
    %c0_i32 = arith.constant 0 : i32
    %c0_i32_0 = arith.constant 0 : i32
    %c0_i32_1 = arith.constant 0 : i32
    %c0_i32_2 = arith.constant 0 : i32
    return %c0_i32, %c0_i32_0, %c0_i32_1 : i32, i32, i32
  }
  func.func @transform_5(%arg0: i32) -> (i32, i32, i32) {
    %c0_i32 = arith.constant 0 : i32
    %c0_i32_0 = arith.constant 0 : i32
    %c0_i32_1 = arith.constant 0 : i32
    %c0_i32_2 = arith.constant 0 : i32
    return %c0_i32, %c0_i32_0, %c0_i32_1 : i32, i32, i32
  }
  func.func @transform_6(%arg0: i32) -> (i32, i32, i32) {
    %c0_i32 = arith.constant 0 : i32
    %c0_i32_0 = arith.constant 0 : i32
    %c0_i32_1 = arith.constant 0 : i32
    %c0_i32_2 = arith.constant 0 : i32
    return %c0_i32, %c0_i32_0, %c0_i32_1 : i32, i32, i32
  }
  func.func @transform_7(%arg0: i32) -> (i32, i32, i32) {
    %c0_i32 = arith.constant 0 : i32
    %c0_i32_0 = arith.constant 0 : i32
    %c0_i32_1 = arith.constant 0 : i32
    %c0_i32_2 = arith.constant 0 : i32
    return %c0_i32, %c0_i32_0, %c0_i32_1 : i32, i32, i32
  }
  func.func @transform_8(%arg0: i32) -> (i32, i32, i32) {
    %c0_i32 = arith.constant 0 : i32
    %c0_i32_0 = arith.constant 0 : i32
    %c0_i32_1 = arith.constant 0 : i32
    %c0_i32_2 = arith.constant 0 : i32
    return %c0_i32, %c0_i32_0, %c0_i32_1 : i32, i32, i32
  }
  func.func @transform_9(%arg0: i32) -> (i32, i32, i32) {
    %c0_i32 = arith.constant 0 : i32
    %c0_i32_0 = arith.constant 0 : i32
    %c0_i32_1 = arith.constant 0 : i32
    %c0_i32_2 = arith.constant 0 : i32
    return %c0_i32, %c0_i32_0, %c0_i32_1 : i32, i32, i32
  }
  func.func @transform_10(%arg0: i32) -> (i32, i32, i32) {
    %c0_i32 = arith.constant 0 : i32
    %c0_i32_0 = arith.constant 0 : i32
    %c0_i32_1 = arith.constant 0 : i32
    %c0_i32_2 = arith.constant 0 : i32
    return %c0_i32, %c0_i32_0, %c0_i32_1 : i32, i32, i32
  }
  func.func @transform_11(%arg0: i32) -> (i32, i32, i32) {
    %c0_i32 = arith.constant 0 : i32
    %c0_i32_0 = arith.constant 0 : i32
    %c0_i32_1 = arith.constant 0 : i32
    %c0_i32_2 = arith.constant 0 : i32
    return %c0_i32, %c0_i32_0, %c0_i32_1 : i32, i32, i32
  }
  func.func @transform_12(%arg0: i32) -> (i32, i32, i32) {
    %c0_i32 = arith.constant 0 : i32
    %c0_i32_0 = arith.constant 0 : i32
    %c0_i32_1 = arith.constant 0 : i32
    %c0_i32_2 = arith.constant 0 : i32
    return %c0_i32, %c0_i32_0, %c0_i32_1 : i32, i32, i32
  }
  func.func @transform_13(%arg0: i32) -> (i32, i32, i32) {
    %c0_i32 = arith.constant 0 : i32
    %c0_i32_0 = arith.constant 0 : i32
    %c0_i32_1 = arith.constant 0 : i32
    %c0_i32_2 = arith.constant 0 : i32
    return %c0_i32, %c0_i32_0, %c0_i32_1 : i32, i32, i32
  }
  func.func @transform_14(%arg0: i32) -> (i32, i32, i32) {
    %c0_i32 = arith.constant 0 : i32
    %c0_i32_0 = arith.constant 0 : i32
    %c0_i32_1 = arith.constant 0 : i32
    %c0_i32_2 = arith.constant 0 : i32
    return %c0_i32, %c0_i32_0, %c0_i32_1 : i32, i32, i32
  }
  func.func @transform_15(%arg0: i32) -> (i32, i32, i32) {
    %c0_i32 = arith.constant 0 : i32
    %c0_i32_0 = arith.constant 0 : i32
    %c0_i32_1 = arith.constant 0 : i32
    %c0_i32_2 = arith.constant 0 : i32
    return %c0_i32, %c0_i32_0, %c0_i32_1 : i32, i32, i32
  }
  func.func @transform_16(%arg0: i32) -> (i32, i32) {
    %c0_i32 = arith.constant 0 : i32
    %c0_i32_0 = arith.constant 0 : i32
    %c0_i32_1 = arith.constant 0 : i32
    return %c0_i32, %c0_i32_0 : i32, i32
  }
  func.func @transform_17(%arg0: i32) -> (i32, i32) {
    %c0_i32 = arith.constant 0 : i32
    %c0_i32_0 = arith.constant 0 : i32
    %c0_i32_1 = arith.constant 0 : i32
    return %c0_i32, %c0_i32_0 : i32, i32
  }
  func.func @transform_18(%arg0: i32) -> (i32, i32) {
    %c0_i32 = arith.constant 0 : i32
    %c0_i32_0 = arith.constant 0 : i32
    %c0_i32_1 = arith.constant 0 : i32
    return %c0_i32, %c0_i32_0 : i32, i32
  }
  func.func @transform_19(%arg0: i32) -> (i32, i32) {
    %c0_i32 = arith.constant 0 : i32
    %c0_i32_0 = arith.constant 0 : i32
    %c0_i32_1 = arith.constant 0 : i32
    return %c0_i32, %c0_i32_0 : i32, i32
  }
  func.func @transform_20(%arg0: i32) -> (i32, i32) {
    %c0_i32 = arith.constant 0 : i32
    %c0_i32_0 = arith.constant 0 : i32
    %c0_i32_1 = arith.constant 0 : i32
    return %c0_i32, %c0_i32_0 : i32, i32
  }
  func.func @transform_21(%arg0: i32) -> (i32, i32) {
    %c0_i32 = arith.constant 0 : i32
    %c0_i32_0 = arith.constant 0 : i32
    %c0_i32_1 = arith.constant 0 : i32
    return %c0_i32, %c0_i32_0 : i32, i32
  }
  func.func @transform_22(%arg0: i32) -> (i32, i32, i32) {
    %c0_i32 = arith.constant 0 : i32
    %c0_i32_0 = arith.constant 0 : i32
    %c0_i32_1 = arith.constant 0 : i32
    return %arg0, %c0_i32, %c0_i32_0 : i32, i32, i32
  }
}

</mosaic_0001>

<bundles_post_ra>
// kernel: segmenter_forward.1
= control target key start
LH: loop header
LB: loop body
LE: loop exit
PB: predicated region body
PF: predicated region fallthrough
CT: control target
= control target key end

     0   :  { %s5521_s0 = inlined_call_operand.vmem [shape: bf16[12,16,48], index: 0, kind: input, shape index: {}]   ;;  %s5522_s1 = inlined_call_operand.vmem [shape: bf16[48,32], index: 1, kind: input, shape index: {}]   ;;  %s5523_s2 = inlined_call_operand.vmem [shape: f32[1,32], index: 2, kind: input, shape index: {}]   ;;  %s5524_s3 = inlined_call_operand.vmem [shape: f32[16,32], index: 3, kind: input, shape index: {}]   ;;  %s5525_s4 = inlined_call_operand.vmem [shape: f32[4,1,32], index: 4, kind: input, shape index: {}]   ;;  %s5526_s5 = inlined_call_operand.vmem [shape: f32[4,1,32], index: 5, kind: input, shape index: {}]   ;;  %s5527_s6 = inlined_call_operand.vmem [shape: bf16[4,32,96], index: 6, kind: input, shape index: {}]   ;;  %s5528_s7 = inlined_call_operand.vmem [shape: f32[4,1,96], index: 7, kind: input, shape index: {}]   ;;  %s5529_s8 = inlined_call_operand.vmem [shape: bf16[4,32,32], index: 8, kind: input, shape index: {}]   ;;  %s5530_s9 = inlined_call_operand.vmem [shape: f32[4,1,32], index: 9, kind: input, shape index: {}]   ;;  %s5531_s10 = inlined_call_operand.vmem [shape: f32[4,1,32], index: 10, kind: input, shape index: {}]   ;;  %s5532_s11 = inlined_call_operand.vmem [shape: f32[4,1,32], index: 11, kind: input, shape index: {}]   ;;  %s5533_s12 = inlined_call_operand.vmem [shape: bf16[4,32,64], index: 12, kind: input, shape index: {}]   ;;  %s5534_s13 = inlined_call_operand.vmem [shape: f32[4,1,64], index: 13, kind: input, shape index: {}]   ;;  %s5535_s14 = inlined_call_operand.vmem [shape: bf16[4,64,32], index: 14, kind: input, shape index: {}]   ;;  %s5536_s15 = inlined_call_operand.vmem [shape: f32[4,1,32], index: 15, kind: input, shape index: {}]   ;;  %s5537_s16 = inlined_call_operand.vmem [shape: bf16[128,32], index: 16, kind: input, shape index: {}]   ;;  %s5538_s17 = inlined_call_operand.vmem [shape: f32[1,32], index: 17, kind: input, shape index: {}]   ;;  %s5539_s18 = inlined_call_operand.vmem [shape: bf16[32,32], index: 18, kind: input, shape index: {}]   ;;  %s5540_s19 = inlined_call_operand.vmem [shape: f32[1,32], index: 19, kind: input, shape index: {}]   ;;  %s5541_s20 = inlined_call_operand.vmem [shape: bf16[32,2], index: 20, kind: input, shape index: {}]   ;;  %s5542_s21 = inlined_call_operand.vmem [shape: f32[1,2], index: 21, kind: input, shape index: {}]   ;;  %s5543_s22 = inlined_call_operand.vmem [shape: f32[12,2,16], index: 22, kind: output, shape index: {}]  }
   0x1   :  { %5565 = sst [smem:[#allocation5_spill]] %s5521_s0 }
   0x2   :  { %5566 = sst [smem:[#allocation6_spill]] %s5522_s1 }
   0x3   :  { %5567 = sst [smem:[#allocation7_spill]] %s5523_s2 }
   0x4   :  { %5568 = sst [smem:[#allocation8_spill]] %s5524_s3  ;;  %s4808_s3 = smov 0  }
   0x5   :  { %5569 = sst [smem:[#allocation9_spill]] %s5525_s4 }
   0x6   :  { %5570 = sst [smem:[#allocation10_spill]] %s5526_s5 }
   0x7   :  { %5571 = sst [smem:[#allocation11_spill]] %s5527_s6 }
   0x8   :  { %5572 = sst [smem:[#allocation12_spill]] %s5543_s22 }
   0x9 LB: > { %5573 = sst [smem:[#allocation3_spill]] %s4680_s3  ;;  %s3856_s28 = sadd.s32 4294967295, %s4680_s3   ;;  %s4680_s3 = sphi %s4808_s3, %s32_s3  }
   0xa   : > { %p3860_p0 = scmp.ge.s32.totalorder %s4680_s3, 1  ;;  %p612_p1 = scmp.lt.s32.totalorder %s4680_s3, 13 }
   0xc   : > { %p613_p2 = pnand %p3860_p0, %p612_p1 }
   0xe   : > { %616 = sbr.rel (%p613_p2) target bundleno = 10487 (0x28f7), region = 108 }
  0x15   : > { %s5574_s4 = sld [smem:[#allocation6_spill]]  ;;  %v4682_v1 = vmov 0.0   ;;  %vm4683_vm0 = vmmov 0   ;;  %p673_p3 = scmp.lt.s32.totalorder %s3856_s28, 11  ;;  %vm721_vm1 = vcmask 392192   ;;  %vm772_vm2 = vcmask 261120  }
  0x16   : > { %4185 = vmatprep.subr.bf16.mxu0 %v4682_v1  ;;  %4195 = vmatprep.subr.bf16.mxu1 %v4682_v1  ;;  %s5576_s26 = sld [smem:[#allocation5_spill]]  ;;  %s5577_s30 = sld [smem:[#allocation7_spill]]  ;;  %v3872_v51 = vld [vmem:[%s5528_s7] ss:$0 sm:$0xff]  ;;  %vm895_vm3 = vcmask 130048   ;;  %vm1142_vm4 = vcmask 261248  }
  0x17   : > { %4191 = vmatprep.mubr.msk.bf16.mxu0 %vm4683_vm0, %v4682_v1  ;;  %4199 = vmatprep.mubr.msk.bf16.mxu1 %vm4683_vm0, %v4682_v1  ;;  %s5592_s28 = smov (!%p673_p3, %s3856_s28), 11  ;;  %s5578_s1 = sld [smem:[#allocation8_spill]]  ;;  %vm1388_vm5 = vcmask 523264   ;;  %vm3469_vm6 = vcmask 785408   ;;  %vm3739_vm7 = vcmask 15360   ;;  %vm3781_vm8 = vcmask 130112  }
  0x18   : > { %5575 = sst [smem:[#allocation4_spill]] %s5592_s28  ;;  %s4077_s24 = sshll.u32 %s5592_s28, 3  ;;  %vm3784_vm9 = vcmask 122880  }
  0x19   : > { %s5580_s0 = sld [smem:[#allocation9_spill]]  ;;  %s5557_s27 = smov 96  }
  0x1a   : > { %s5555_s29 = smov 112   ;;  %s5549_s23 = smov 48  }
  0x1b   : > { %v4494_v0 = vld [vmem:[%s5574_s4] sm:$0xff]   ;;  %v4495_v2 = vld [vmem:[%s5574_s4 + $0x8] sm:$0xff]   ;;  %v4496_v3 = vld [vmem:[%s5574_s4 + $0x10] sm:$0xff]   ;;  %s5551_s5 = smov 16   ;;  %s5582_s25 = smov 96  }
  0x1c   : > { %4186 = vmatpush3.bf16.msra.mxu0 %v4494_v0  ;;  %s677_s2 = scalar_lea.vmem %s5576_s26, %s4077_s24  ;;  %v3864_v5 = vld [vmem:[%s5577_s30] ss:$0 sm:$0xff]  ;;  %s5579_s26 = sld [smem:[#allocation11_spill]] }
  0x1d   : > { %4187 = vmatprep.subr.bf16.mxu0 %v4682_v1  ;;  %v4497_v4 = vld [vmem:[%s677_s2] sm:$0xff]   ;;  %v767_v11 = vld [vmem:[%s5578_s1 + $0x8] sm:$0xff]  ;;  %s5581_s24 = sld [smem:[#allocation10_spill]]  ;;  %s5559_s2 = smov 80  }
  0x1e   : > { %v766_v7 = vld [vmem:[%s5578_s1] sm:$0xff]  ;;  %s5553_s30 = smov 64   ;;  %s5588_s3 = sld [smem:[#allocation4_spill]] }
  0x1f   : > { %v3870_v41 = vld [vmem:[%s5580_s0] ss:$0 sm:$0xff] }
  0x20   : > { %4188 = vmatpush3.bf16.msra.mxu0 %v4495_v2 }
  0x21   : > { %4189 = vmatprep.subr.bf16.mxu0 %v4682_v1 }
  0x22   : > { %v4498_v22 = vld [vmem:[%s5579_s26] sm:$0xff]   ;;  %v4499_v23 = vld [vmem:[%s5579_s26 + $0x8] sm:$0xff]  }
  0x23   : > { %4196 = vmatpush3.bf16.msra.mxu1 %v4498_v22  ;;  %v3871_v46 = vld [vmem:[%s5581_s24] ss:$0 sm:$0xff] }
  0x24   : > { %4190 = vmatpush3.bf16.msra.mxu0 %v4496_v3  ;;  %4197 = vmatprep.subr.bf16.mxu1 %v4682_v1 }
  0x25   : > { %4209 = vmatprep.subr.bf16.mxu0 %v4682_v1 }
  0x27   : > { %4192 = vmatmul.mubr.msk.bf16.vlgmr.msra.gmra.mrb[0].mxu0 %vm721_vm1, %v4497_v4  ;;  %4198 = vmatpush3.bf16.msra.mxu1 %v4499_v23 }
  0x28   : > { %4211 = vmatprep.mubr.msk.bf16.mxu0 %vm4683_vm0, %v4682_v1  ;;  %4203 = vmatprep.subr.bf16.mxu1 %v4682_v1 }
  0xfa   : > { %v759_v6 = vpop.f32.mrb[0].mxu0 }
  0xfb   : > { %v760_v8 = vadd.f32 %v3864_v5, %v759_v6  ;;  %v4193_v9 = vpop.f32.mrb[1].mxu0 }
  0xfc   : > { %v762_v10 = vpop.f32.mrb[2].mxu0 }
  0xfd   : > { %v4851_v12 = vadd.f32 %v766_v7, %v760_v8  ;;  %v763_v13 = vadd.f32 %v3864_v5, %v762_v10  ;;  %v4194_v14 = vpop.f32.mrb[3].mxu0 }
  0xff   : > { %v4853_v15 = vadd.f32 %v767_v11, %v763_v13  ;;  %v773_v16 = vsel %vm772_vm2, %v4851_v12, 0.0  ;;  %v782_v17 = vmul.f32 %v4851_v12, %v4851_v12 }
 0x100   : > { %774 = vadd.xlane.f32.xlu0 %v773_v16 }
 0x101   : > { %v784_v18 = vsel %vm772_vm2, %v782_v17, 0.0  ;;  %v783_v19 = vmul.f32 %v4853_v15, %v4853_v15  ;;  %v776_v20 = vsel %vm772_vm2, %v4853_v15, 0.0 }
 0x102   : > { %785 = vadd.xlane.f32.xlu1 %v784_v18 }
 0x103   : > { %v787_v21 = vsel %vm772_vm2, %v783_v19, 0.0 }
 0x104   : > { %777 = vadd.xlane.f32.xlu0 %v776_v20 }
 0x106   : > { %788 = vadd.xlane.f32.xlu1 %v787_v21 }
 0x18d   : > { %v775_v24 = vpop.xlane.xlu0 %774 }
 0x18e   : > { %v780_v25 = vmul.f32 0.03125, %v775_v24 }
 0x18f   : > { %v786_v26 = vpop.xlane.xlu1 %785 }
 0x190   : > { %v792_v27 = vmul.f32 %v780_v25, %v780_v25  ;;  %v790_v28 = vmul.f32 0.03125, %v786_v26  ;;  %v796_v38 = vsub.f32 %v4851_v12, %v780_v25 }
 0x191   : > { %v778_v29 = vpop.xlane.xlu0 %777 }
 0x192   : > { %v794_v30 = vsub.f32 %v790_v28, %v792_v27  ;;  %v781_v31 = vmul.f32 0.03125, %v778_v29 }
 0x193   : > { %v789_v32 = vpop.xlane.xlu1 %788 }
 0x194   : > { %v798_v33 = vadd.f32 1e-06, %v794_v30  ;;  %v793_v34 = vmul.f32 %v781_v31, %v781_v31  ;;  %v791_v35 = vmul.f32 0.03125, %v789_v32  ;;  %v797_v42 = vsub.f32 %v4853_v15, %v781_v31 }
 0x196   : > { %4550 = vrsqrt.f32 %v798_v33  ;;  %v795_v36 = vsub.f32 %v791_v35, %v793_v34 }
 0x198   : > { %v799_v37 = vadd.f32 1e-06, %v795_v36 }
 0x19a   : > { %4552 = vrsqrt.f32 %v799_v37 }
 0x1a0   : > { %v4551_v39 = vpop.eup %4550 }
 0x1a1   : > { %v802_v40 = vmul.f32 %v4551_v39, %v796_v38 }
 0x1a3   : > { %v810_v45 = vmul.f32 %v3870_v41, %v802_v40 }
 0x1a4   : > { %v4553_v43 = vpop.eup %4552 }
 0x1a5   : > { %v803_v44 = vmul.f32 %v4553_v43, %v797_v42  ;;  %v818_v48 = vadd.f32 %v3871_v46, %v810_v45 }
 0x1a7   : > { %v811_v47 = vmul.f32 %v3870_v41, %v803_v44 }
 0x1a9   : > { %v819_v49 = vadd.f32 %v3871_v46, %v811_v47 }
 0x1ab   : > { %v820_v50 = vpack.c.bf16 %v819_v49, %v818_v48 }
 0x1ad   : > { %4200 = vmatmul.mubr.msk.bf16.vlgmr.msra.gmra.mrb[0].mxu1 %vm772_vm2, %v820_v50 }
 0x1ae   : > { %4205 = vmatprep.mubr.msk.bf16.mxu1 %vm4683_vm0, %v4682_v1 }
 0x280   : > { %v881_v52 = vpop.f32.mrb[0].mxu1 }
 0x281   : > { %v882_v53 = vadd.f32 %v3872_v51, %v881_v52  ;;  %v4201_v54 = vpop.f32.mrb[1].mxu1 }
 0x282   : > { %v884_v55 = vpop.f32.mrb[2].mxu1 }
 0x283   : > { %v885_v56 = vadd.f32 %v3872_v51, %v884_v55  ;;  %v4202_v57 = vpop.f32.mrb[3].mxu1  ;;  %v888_v58 = vmul.f32 0.25, %v882_v53 }
 0x284   : > { %v4500_v57 = vld [vmem:[%s5529_s8] sm:$0xff]  }
 0x285   : > { %v889_v59 = vmul.f32 0.25, %v885_v56  ;;  %v4887_v60 = vpack.c.bf16 %v885_v56, %v882_v53 }
 0x287   : > { %1018 = vrot.lane.b32.xlu1 %v4887_v60, %s5559_s2  ;;  %893 = vrot.lane.b32.xlu0 %v4887_v60, %s5557_s27  ;;  %v890_v61 = vpack.c.bf16 %v889_v59, %v888_v58  ;;  %s5584_s27 = smov 64  }
 0x28b   : > { %1016 = vrot.lane.b32.xlu1 %v890_v61, %s5555_s29  ;;  %s5583_s29 = smov 112  }
 0x2f9   : > { %v894_v62 = vpop.permute.xlu0 %893  ;;  %v1019_v0 = vpop.permute.xlu1 %1018 }
 0x2fa   : > { %v900_v63 = vsel %vm895_vm3, %v894_v62, 0  ;;  %v1024_v2 = vsel %vm895_vm3, %v1019_v0, 0 }
 0x2fb   : > { %4204 = vmatpush3.bf16.xpose.msra.mxu1 %v900_v63 }
 0x2fc   : > { %4215 = vmatprep.subr.bf16.mxu1 %v4682_v1 }
 0x2fd   : > { %v1017_v3 = vpop.permute.xlu1 %1016 }
 0x302   : > { %4206 = vmatmul.mubr.msk.bf16.vlgmr.msra.gmra.mrb[4].mxu1 %vm895_vm3, %v890_v61 }
 0x303   : > { %4216 = vmatpush3.bf16.xpose.msra.mxu1 %v1024_v2  ;;  %4217 = vmatprep.mubr.msk.bf16.mxu1 %vm4683_vm0, %v4682_v1 }
 0x304   : > { %4227 = vmatprep.subr.bf16.mxu1 %v4682_v1 }
 0x30a   : > { %4218 = vmatmul.mubr.msk.bf16.vlgmr.msra.gmra.mrb[8].mxu1 %vm895_vm3, %v1017_v3 }
 0x30b   : > { %4231 = vmatprep.mubr.msk.bf16.mxu1 %vm4683_vm0, %v4682_v1  ;;  %4228 = vmatpush3.bf16.msra.mxu1 %v4500_v57 }
 0x30c   : > { %4229 = vmatprep.subr.bf16.mxu1 %v4682_v1 }
 0x3d5   : > { %v936_v4 = vpop.f32.mrb[4].mxu1 }
 0x3d6   : > { %v4207_v5 = vpop.f32.mrb[5].mxu1  ;;  %v943_v6 = vsel %vm895_vm3, %v936_v4, -inf }
 0x3d7   : > { %944 = vmax.xlane.f32.xlu1 %v943_v6  ;;  %v939_v7 = vpop.f32.mrb[6].mxu1  ;;  %v3880_v5 = vld [vmem:[%s5530_s9] ss:$0 sm:$0xff] }
 0x3d8   : > { %v4208_v8 = vpop.f32.mrb[7].mxu1  ;;  %v946_v9 = vsel %vm895_vm3, %v939_v7, -inf }
 0x3d9   : > { %947 = vmax.xlane.f32.xlu0 %v946_v9 }
 0x3dd   : > { %v1060_v10 = vpop.f32.mrb[8].mxu1 }
 0x3de   : > { %v4219_v11 = vpop.f32.mrb[9].mxu1  ;;  %v1067_v13 = vsel %vm895_vm3, %v1060_v10, -inf }
 0x3df   : > { %1068 = vmax.xlane.f32.xlu0 %v1067_v13  ;;  %v1063_v14 = vpop.f32.mrb[10].mxu1 }
 0x3e0   : > { %v4220_v16 = vpop.f32.mrb[11].mxu1  ;;  %v1070_v17 = vsel %vm895_vm3, %v1063_v14, -inf }
 0x3e3   : > { %1071 = vmax.xlane.f32.xlu0 %v1070_v17 }
 0x464   : > { %v945_v18 = vpop.xlane.xlu1 %944 }
 0x465   : > { %v949_v19 = vsub.f32 %v936_v4, %v945_v18 }
 0x466   : > { %v948_v20 = vpop.xlane.xlu0 %947 }
 0x467   : > { %v951_v21 = vmul.f32 1.442695, %v949_v19  ;;  %v950_v22 = vsub.f32 %v939_v7, %v948_v20  ;;  %v4502_v20 = vld [vmem:[%s5533_s12] sm:$0xff]  }
 0x469   : > { %4554 = vpow2.f32 %v951_v21  ;;  %v953_v23 = vmul.f32 1.442695, %v950_v22  ;;  %v4503_v21 = vld [vmem:[%s5533_s12 + $0x8] sm:$0xff]  }
 0x46b   : > { %4556 = vpow2.f32 %v953_v23 }
 0x46c   : > { %v1069_v24 = vpop.xlane.xlu0 %1068 }
 0x46d   : > { %v1073_v25 = vsub.f32 %v1060_v10, %v1069_v24 }
 0x46f   : > { %v1075_v26 = vmul.f32 1.442695, %v1073_v25 }
 0x470   : > { %v1072_v27 = vpop.xlane.xlu0 %1071 }
 0x471   : > { %4558 = vpow2.f32 %v1075_v26  ;;  %v1074_v28 = vsub.f32 %v1063_v14, %v1072_v27 }
 0x473   : > { %v4555_v29 = vpop.eup %4554  ;;  %v1077_v30 = vmul.f32 1.442695, %v1074_v28 }
 0x474   : > { %v955_v31 = vsel %vm895_vm3, %v4555_v29, 0.0 }
 0x475   : > { %v4557_v32 = vpop.eup %4556  ;;  %4560 = vpow2.f32 %v1077_v30  ;;  %956 = vadd.xlane.f32.xlu1 %v955_v31 }
 0x476   : > { %v958_v33 = vsel %vm895_vm3, %v4557_v32, 0.0 }
 0x477   : > { %959 = vadd.xlane.f32.xlu0 %v958_v33 }
 0x47b   : > { %v4559_v34 = vpop.eup %4558 }
 0x47c   : > { %v1079_v35 = vsel %vm895_vm3, %v4559_v34, 0.0 }
 0x47d   : > { %1080 = vadd.xlane.f32.xlu1 %v1079_v35 }
 0x47f   : > { %v4561_v36 = vpop.eup %4560 }
 0x480   : > { %v1082_v37 = vsel %vm895_vm3, %v4561_v36, 0.0 }
 0x481   : > { %1083 = vadd.xlane.f32.xlu0 %v1082_v37 }
 0x48e   : > { %966 = vrot.lane.b32.xlu1 %v4887_v60, %s5553_s30  ;;  %s5585_s30 = smov 48  }
 0x497   : > { %1090 = vrot.lane.b32.xlu0 %v4887_v60, %s5549_s23  ;;  %v4501_v60 = vld [vmem:[%s5529_s8 + $0x8] sm:$0xff]   ;;  %s5586_s23 = smov 16  }
 0x498   : > { %4230 = vmatpush3.bf16.msra.mxu1 %v4501_v60 }
 0x499   : > { %4243 = vmatprep.subr.bf16.mxu1 %v4682_v1 }
 0x502   : > { %v957_v38 = vpop.xlane.xlu1 %956 }
 0x503   : > { %4562 = vrcp.f32 %v957_v38  ;;  %v3884_v38 = vld [vmem:[%s5531_s10] ss:$0 sm:$0xff] }
 0x504   : > { %v960_v39 = vpop.xlane.xlu0 %959 }
 0x505   : > { %4564 = vrcp.f32 %v960_v39 }
 0x50a   : > { %v1081_v40 = vpop.xlane.xlu1 %1080 }
 0x50b   : > { %4566 = vrcp.f32 %v1081_v40 }
 0x50d   : > { %v4563_v41 = vpop.eup %4562 }
 0x50e   : > { %v967_v42 = vpop.permute.xlu1 %966  ;;  %v1084_v43 = vpop.xlane.xlu0 %1083  ;;  %v963_v45 = vmul.f32 %v4563_v41, %v4555_v29 }
 0x50f   : > { %v4565_v44 = vpop.eup %4564  ;;  %4568 = vrcp.f32 %v1084_v43  ;;  %4210 = vmatpush3.bf16.msra.mxu0 %v967_v42 }
 0x510   : > { %v964_v46 = vmul.f32 %v4565_v44, %v4557_v32  ;;  %4221 = vmatprep.subr.bf16.mxu0 %v4682_v1  ;;  %v3885_v44 = vld [vmem:[%s5532_s11] ss:$0 sm:$0xff] }
 0x512   : > { %v1091_v47 = vpop.permute.xlu0 %1090  ;;  %v965_v48 = vpack.c.bf16 %v964_v46, %v963_v45 }
 0x514   : > { %4212 = vmatmul.mubr.msk.bf16.vlgmr.msra.gmra.mrb[4].mxu0 %vm895_vm3, %v965_v48 }
 0x515   : > { %4222 = vmatpush3.bf16.msra.mxu0 %v1091_v47  ;;  %4223 = vmatprep.mubr.msk.bf16.mxu0 %vm4683_vm0, %v4682_v1  ;;  %v4567_v49 = vpop.eup %4566 }
 0x516   : > { %4235 = vmatprep.subr.bf16.mxu0 %v4682_v1  ;;  %v1087_v51 = vmul.f32 %v4567_v49, %v4559_v34  ;;  %v4504_v49 = vld [vmem:[%s5535_s14] sm:$0xff]  }
 0x519   : > { %v4569_v50 = vpop.eup %4568 }
 0x51a   : > { %v1088_v52 = vmul.f32 %v4569_v50, %v4561_v36  ;;  %v4505_v50 = vld [vmem:[%s5535_s14 + $0x8] sm:$0xff]  }
 0x51c   : > { %v1089_v53 = vpack.c.bf16 %v1088_v52, %v1087_v51  ;;  %v4506_v51 = vld [vmem:[%s5535_s14 + $0x10] sm:$0xff]   ;;  %v4507_v52 = vld [vmem:[%s5535_s14 + $0x18] sm:$0xff]  }
 0x51e   : > { %4224 = vmatmul.mubr.msk.bf16.vlgmr.msra.gmra.mrb[8].mxu0 %vm895_vm3, %v1089_v53  ;;  %v3886_v53 = vld [vmem:[%s5534_s13] ss:$0 sm:$0xff] }
 0x51f   : > { %4239 = vmatprep.mubr.msk.bf16.mxu0 %vm4683_vm0, %v4682_v1  ;;  %4236 = vmatpush3.bf16.msra.mxu0 %v4502_v20 }
 0x520   : > { %4237 = vmatprep.subr.bf16.mxu0 %v4682_v1 }
 0x523   : > { %4238 = vmatpush3.bf16.msra.mxu0 %v4503_v21 }
 0x524   : > { %4255 = vmatprep.subr.bf16.mxu0 %v4682_v1 }
 0x5e7   : > { %v1006_v54 = vpop.f32.mrb[4].mxu0 }
 0x5e8   : > { %v4213_v55 = vpop.f32.mrb[5].mxu0 }
 0x5e9   : > { %v1009_v56 = vpop.f32.mrb[6].mxu0 }
 0x5ea   : > { %v1013_v58 = vpack.c.bf16 %v1009_v56, %v1006_v54  ;;  %v4214_v59 = vpop.f32.mrb[7].mxu0 }
 0x5ec   : > { %1014 = vst.msk [vmem:[#allocation2] sm:$0xff] %vm895_vm3, %v1013_v58 }
 0x5f1   : > { %v1130_v61 = vpop.f32.mrb[8].mxu0 }
 0x5f2   : > { %v4225_v62 = vpop.f32.mrb[9].mxu0 }
 0x5f3   : > { %v1133_v63 = vpop.f32.mrb[10].mxu0 }
 0x5f4   : > { %v1137_v0 = vpack.c.bf16 %v1133_v63, %v1130_v61  ;;  %v4226_v2 = vpop.f32.mrb[11].mxu0 }
 0x5f6   : > { %1139 = vrot.lane.b32.xlu1 %v1137_v0, %s5551_s5  ;;  %s5587_s5 = smov 80  }
 0x668   : > { %v1140_v3 = vpop.permute.xlu1 %1139 }
 0x669   : > { %1143 = vst.msk [vmem:[#allocation2] sm:$0xff] %vm1142_vm4, %v1140_v3 }
 0x670   : > { %v1144_v4 = vld [vmem:[#allocation2] sm:$0xff] }
 0x671   : > { %4232 = vmatmul.mubr.msk.bf16.vlgmr.msra.gmra.mrb[12].mxu1 %vm772_vm2, %v1144_v4 }
 0x672   : > { %4251 = vmatprep.mubr.msk.bf16.mxu1 %vm4683_vm0, %v4682_v1  ;;  %4244 = vmatpush3.bf16.msra.mxu1 %v4504_v49  ;;  %v3898_v49 = vld [vmem:[%s5580_s0 + $0x1] ss:$0 sm:$0xff] }
 0x673   : > { %4245 = vmatprep.subr.bf16.mxu1 %v4682_v1 }
 0x676   : > { %4246 = vmatpush3.bf16.msra.mxu1 %v4505_v50 }
 0x677   : > { %4247 = vmatprep.subr.bf16.mxu1 %v4682_v1 }
 0x67a   : > { %4248 = vmatpush3.bf16.msra.mxu1 %v4506_v51 }
 0x67b   : > { %4249 = vmatprep.subr.bf16.mxu1 %v4682_v1 }
 0x67e   : > { %4250 = vmatpush3.bf16.msra.mxu1 %v4507_v52 }
 0x67f   : > { %4269 = vmatprep.subr.bf16.mxu1 %v4682_v1 }
 0x744   : > { %v1205_v6 = vpop.f32.mrb[12].mxu1 }
 0x745   : > { %v1206_v7 = vadd.f32 %v3880_v5, %v1205_v6  ;;  %v4233_v8 = vpop.f32.mrb[13].mxu1 }
 0x746   : > { %v1208_v9 = vpop.f32.mrb[14].mxu1 }
 0x747   : > { %v4942_v10 = vadd.f32 %v1206_v7, %v4851_v12  ;;  %v1209_v11 = vadd.f32 %v3880_v5, %v1208_v9  ;;  %v4234_v13 = vpop.f32.mrb[15].mxu1 }
 0x749   : > { %v4945_v14 = vadd.f32 %v1209_v11, %v4853_v15  ;;  %v1216_v16 = vsel %vm772_vm2, %v4942_v10, 0.0  ;;  %v1224_v19 = vmul.f32 %v4942_v10, %v4942_v10 }
 0x74a   : > { %1217 = vadd.xlane.f32.xlu1 %v1216_v16 }
 0x74b   : > { %v1219_v17 = vsel %vm772_vm2, %v4945_v14, 0.0  ;;  %v1225_v18 = vmul.f32 %v4945_v14, %v4945_v14  ;;  %v1226_v15 = vsel %vm772_vm2, %v1224_v19, 0.0 }
 0x74c   : > { %1220 = vadd.xlane.f32.xlu0 %v1219_v17 }
 0x74d   : > { %v1229_v12 = vsel %vm772_vm2, %v1225_v18, 0.0 }
 0x74e   : > { %1230 = vadd.xlane.f32.xlu1 %v1229_v12  ;;  %v3890_v12 = vld [vmem:[%s5536_s15] ss:$0 sm:$0xff] }
 0x750   : > { %1227 = vadd.xlane.f32.xlu0 %v1226_v15 }
 0x7d7   : > { %v1218_v22 = vpop.xlane.xlu1 %1217 }
 0x7d8   : > { %v1222_v24 = vmul.f32 0.03125, %v1218_v22 }
 0x7d9   : > { %v1221_v23 = vpop.xlane.xlu0 %1220 }
 0x7da   : > { %v1223_v25 = vmul.f32 0.03125, %v1221_v23  ;;  %v1234_v30 = vmul.f32 %v1222_v24, %v1222_v24  ;;  %v1238_v39 = vsub.f32 %v4942_v10, %v1222_v24 }
 0x7db   : > { %v1231_v26 = vpop.xlane.xlu1 %1230 }
 0x7dc   : > { %v1235_v27 = vmul.f32 %v1223_v25, %v1223_v25  ;;  %v1233_v28 = vmul.f32 0.03125, %v1231_v26  ;;  %v1239_v36 = vsub.f32 %v4945_v14, %v1223_v25 }
 0x7dd   : > { %v1228_v29 = vpop.xlane.xlu0 %1227 }
 0x7de   : > { %v1237_v31 = vsub.f32 %v1233_v28, %v1235_v27  ;;  %v1232_v32 = vmul.f32 0.03125, %v1228_v29 }
 0x7e0   : > { %v1241_v33 = vadd.f32 1e-06, %v1237_v31  ;;  %v1236_v34 = vsub.f32 %v1232_v32, %v1234_v30  ;;  %v4508_v31 = vld [vmem:[%s5579_s26 + $0x10] sm:$0xff]   ;;  %v4509_v32 = vld [vmem:[%s5579_s26 + $0x18] sm:$0xff]  }
 0x7e2   : > { %4570 = vrsqrt.f32 %v1241_v33  ;;  %v1240_v35 = vadd.f32 1e-06, %v1236_v34 }
 0x7e4   : > { %4572 = vrsqrt.f32 %v1240_v35 }
 0x7ec   : > { %v4571_v37 = vpop.eup %4570 }
 0x7ed   : > { %v1245_v40 = vmul.f32 %v4571_v37, %v1239_v36 }
 0x7ee   : > { %v4573_v41 = vpop.eup %4572 }
 0x7ef   : > { %v1244_v42 = vmul.f32 %v4573_v41, %v1238_v39  ;;  %v1253_v43 = vmul.f32 %v3884_v38, %v1245_v40 }
 0x7f1   : > { %v1252_v45 = vmul.f32 %v3884_v38, %v1244_v42  ;;  %v1261_v47 = vadd.f32 %v3885_v44, %v1253_v43 }
 0x7f3   : > { %v1260_v46 = vadd.f32 %v3885_v44, %v1252_v45 }
 0x7f5   : > { %v1262_v48 = vpack.c.bf16 %v1261_v47, %v1260_v46 }
 0x7f7   : > { %4240 = vmatmul.mubr.msk.bf16.vlgmr.msra.gmra.mrb[12].mxu0 %vm772_vm2, %v1262_v48 }
 0x7f8   : > { %4259 = vmatprep.mubr.msk.bf16.mxu0 %vm4683_vm0, %v4682_v1  ;;  %4256 = vmatpush3.bf16.msra.mxu0 %v4508_v31 }
 0x7f9   : > { %4257 = vmatprep.subr.bf16.mxu0 %v4682_v1 }
 0x7fc   : > { %4258 = vmatpush3.bf16.msra.mxu0 %v4509_v32 }
 0x7fd   : > { %4263 = vmatprep.subr.bf16.mxu0 %v4682_v1 }
 0x8ca   : > { %v1323_v54 = vpop.f32.mrb[12].mxu0 }
 0x8cb   : > { %v1324_v55 = vadd.f32 %v3886_v53, %v1323_v54  ;;  %v4241_v56 = vpop.f32.mrb[13].mxu0 }
 0x8cc   : > { %v1326_v57 = vpop.f32.mrb[14].mxu0 }
 0x8cd   : > { %v1330_v58 = vmul.f32 %v1324_v55, %v1324_v55  ;;  %v1327_v59 = vadd.f32 %v3886_v53, %v1326_v57  ;;  %v4242_v60 = vpop.f32.mrb[15].mxu0 }
 0x8ce   : > { %v3905_v60 = vld [vmem:[%s5528_s7 + $0x1] ss:$0 sm:$0xff] }
 0x8cf   : > { %v1332_v61 = vmul.f32 %v1330_v58, %v1324_v55  ;;  %v1331_v62 = vmul.f32 %v1327_v59, %v1327_v59 }
 0x8d1   : > { %v1334_v63 = vmul.f32 0.044715, %v1332_v61  ;;  %v1333_v0 = vmul.f32 %v1331_v62, %v1327_v59 }
 0x8d3   : > { %v1336_v2 = vadd.f32 %v1334_v63, %v1324_v55  ;;  %v1335_v3 = vmul.f32 0.044715, %v1333_v0 }
 0x8d5   : > { %v1338_v4 = vmul.f32 0.7978846, %v1336_v2  ;;  %v1337_v5 = vadd.f32 %v1335_v3, %v1327_v59 }
 0x8d7   : > { %4574 = vtanh.f32 %v1338_v4  ;;  %v1339_v6 = vmul.f32 0.7978846, %v1337_v5 }
 0x8d9   : > { %4576 = vtanh.f32 %v1339_v6 }
 0x8e1   : > { %v4575_v7 = vpop.eup %4574 }
 0x8e2   : > { %v1342_v8 = vadd.f32 1.0, %v4575_v7 }
 0x8e3   : > { %v4577_v9 = vpop.eup %4576 }
 0x8e4   : > { %v1344_v11 = vmul.f32 0.5, %v1342_v8  ;;  %v1343_v13 = vadd.f32 1.0, %v4577_v9 }
 0x8e6   : > { %v1345_v16 = vmul.f32 0.5, %v1343_v13  ;;  %v1346_v17 = vmul.f32 %v1344_v11, %v1324_v55  ;;  %v3899_v55 = vld [vmem:[%s5581_s24 + $0x1] ss:$0 sm:$0xff] }
 0x8e8   : > { %v1347_v18 = vmul.f32 %v1345_v16, %v1327_v59 }
 0x8ea   : > { %v1348_v19 = vpack.c.bf16 %v1347_v18, %v1346_v17 }
 0x8ec   : > { %4252 = vmatmul.mubr.msk.bf16.vlgmr.msra.gmra.mrb[16].mxu1 %vm1388_vm5, %v1348_v19 }
 0x8ed   : > { %4271 = vmatprep.mubr.msk.bf16.mxu1 %vm4683_vm0, %v4682_v1 }
 0x9bf   : > { %v1426_v15 = vpop.f32.mrb[16].mxu1 }
 0x9c0   : > { %v1427_v20 = vadd.f32 %v3890_v12, %v1426_v15  ;;  %v4253_v21 = vpop.f32.mrb[17].mxu1 }
 0x9c1   : > { %v1429_v22 = vpop.f32.mrb[18].mxu1 }
 0x9c2   : > { %v5002_v23 = vadd.f32 %v1427_v20, %v4942_v10  ;;  %v1430_v24 = vadd.f32 %v3890_v12, %v1429_v22  ;;  %v4254_v25 = vpop.f32.mrb[19].mxu1 }
 0x9c4   : > { %v5005_v26 = vadd.f32 %v1430_v24, %v4945_v14  ;;  %v1440_v27 = vsel %vm772_vm2, %v5002_v23, 0.0  ;;  %v1448_v28 = vmul.f32 %v5002_v23, %v5002_v23 }
 0x9c5   : > { %1441 = vadd.xlane.f32.xlu0 %v1440_v27 }
 0x9c6   : > { %v1443_v29 = vsel %vm772_vm2, %v5005_v26, 0.0  ;;  %v1449_v30 = vmul.f32 %v5005_v26, %v5005_v26  ;;  %v1450_v10 = vsel %vm772_vm2, %v1448_v28, 0.0 }
 0x9c7   : > { %1444 = vadd.xlane.f32.xlu1 %v1443_v29 }
 0x9c8   : > { %v1453_v14 = vsel %vm772_vm2, %v1449_v30, 0.0 }
 0x9c9   : > { %1451 = vadd.xlane.f32.xlu0 %v1450_v10 }
 0x9cb   : > { %1454 = vadd.xlane.f32.xlu1 %v1453_v14 }
 0xa52   : > { %v1442_v33 = vpop.xlane.xlu0 %1441 }
 0xa53   : > { %v1446_v34 = vmul.f32 0.03125, %v1442_v33 }
 0xa54   : > { %v1445_v35 = vpop.xlane.xlu1 %1444 }
 0xa55   : > { %v1447_v36 = vmul.f32 0.03125, %v1445_v35  ;;  %v1458_v38 = vmul.f32 %v1446_v34, %v1446_v34  ;;  %v1462_v47 = vsub.f32 %v5002_v23, %v1446_v34 }
 0xa56   : > { %v1452_v37 = vpop.xlane.xlu0 %1451 }
 0xa57   : > { %v1456_v39 = vmul.f32 0.03125, %v1452_v37  ;;  %v1459_v41 = vmul.f32 %v1447_v36, %v1447_v36  ;;  %v1463_v50 = vsub.f32 %v5005_v26, %v1447_v36 }
 0xa58   : > { %v1455_v40 = vpop.xlane.xlu1 %1454 }
 0xa59   : > { %v1460_v42 = vsub.f32 %v1456_v39, %v1458_v38  ;;  %v1457_v43 = vmul.f32 0.03125, %v1455_v40 }
 0xa5b   : > { %v1464_v44 = vadd.f32 1e-06, %v1460_v42  ;;  %v1461_v45 = vsub.f32 %v1457_v43, %v1459_v41 }
 0xa5d   : > { %4578 = vrsqrt.f32 %v1464_v44  ;;  %v1465_v46 = vadd.f32 1e-06, %v1461_v45 }
 0xa5f   : > { %4580 = vrsqrt.f32 %v1465_v46 }
 0xa67   : > { %v4579_v48 = vpop.eup %4578 }
 0xa68   : > { %v1468_v51 = vmul.f32 %v4579_v48, %v1462_v47 }
 0xa69   : > { %v4581_v52 = vpop.eup %4580 }
 0xa6a   : > { %v1469_v53 = vmul.f32 %v4581_v52, %v1463_v50  ;;  %v1476_v54 = vmul.f32 %v3898_v49, %v1468_v51 }
 0xa6c   : > { %v1477_v56 = vmul.f32 %v3898_v49, %v1469_v53  ;;  %v1484_v57 = vadd.f32 %v3899_v55, %v1476_v54 }
 0xa6e   : > { %v1485_v58 = vadd.f32 %v3899_v55, %v1477_v56 }
 0xa70   : > { %v1486_v59 = vpack.c.bf16 %v1485_v58, %v1484_v57 }
 0xa72   : > { %4260 = vmatmul.mubr.msk.bf16.vlgmr.msra.gmra.mrb[16].mxu0 %vm772_vm2, %v1486_v59 }
 0xa73   : > { %4265 = vmatprep.mubr.msk.bf16.mxu0 %vm4683_vm0, %v4682_v1 }
 0xb45   : > { %v1549_v61 = vpop.f32.mrb[16].mxu0 }
 0xb46   : > { %v1550_v62 = vadd.f32 %v3905_v60, %v1549_v61  ;;  %v4261_v63 = vpop.f32.mrb[17].mxu0 }
 0xb47   : > { %v1552_v0 = vpop.f32.mrb[18].mxu0 }
 0xb48   : > { %v1553_v2 = vadd.f32 %v3905_v60, %v1552_v0  ;;  %v4262_v3 = vpop.f32.mrb[19].mxu0  ;;  %v1556_v4 = vmul.f32 0.25, %v1550_v62 }
 0xb49   : > { %v4510_v3 = vld [vmem:[%s5529_s8 + $0x10] sm:$0xff]  }
 0xb4a   : > { %v1557_v5 = vmul.f32 0.25, %v1553_v2  ;;  %v1559_v6 = vpack.c.bf16 %v1553_v2, %v1550_v62 }
 0xb4c   : > { %1685 = vrot.lane.b32.xlu1 %v1559_v6, %s5559_s2  ;;  %1561 = vrot.lane.b32.xlu0 %v1559_v6, %s5582_s25  ;;  %v1558_v7 = vpack.c.bf16 %v1557_v5, %v1556_v4 }
 0xb50   : > { %1683 = vrot.lane.b32.xlu1 %v1558_v7, %s5583_s29 }
 0xbbe   : > { %v1562_v8 = vpop.permute.xlu0 %1561  ;;  %v1686_v11 = vpop.permute.xlu1 %1685 }
 0xbbf   : > { %v1567_v9 = vsel %vm895_vm3, %v1562_v8, 0  ;;  %v1691_v13 = vsel %vm895_vm3, %v1686_v11, 0 }
 0xbc0   : > { %4264 = vmatpush3.bf16.xpose.msra.mxu0 %v1567_v9 }
 0xbc1   : > { %4275 = vmatprep.subr.bf16.mxu0 %v4682_v1 }
 0xbc2   : > { %v1684_v16 = vpop.permute.xlu1 %1683 }
 0xbc7   : > { %4266 = vmatmul.mubr.msk.bf16.vlgmr.msra.gmra.mrb[20].mxu0 %vm895_vm3, %v1558_v7 }
 0xbc8   : > { %4276 = vmatpush3.bf16.xpose.msra.mxu0 %v1691_v13  ;;  %4277 = vmatprep.mubr.msk.bf16.mxu0 %vm4683_vm0, %v4682_v1 }
 0xbc9   : > { %4287 = vmatprep.subr.bf16.mxu0 %v4682_v1 }
 0xbcf   : > { %4278 = vmatmul.mubr.msk.bf16.vlgmr.msra.gmra.mrb[24].mxu0 %vm895_vm3, %v1684_v16 }
 0xbd0   : > { %4291 = vmatprep.mubr.msk.bf16.mxu0 %vm4683_vm0, %v4682_v1  ;;  %4288 = vmatpush3.bf16.msra.mxu0 %v4510_v3 }
 0xbd1   : > { %4289 = vmatprep.subr.bf16.mxu0 %v4682_v1 }
 0xc9a   : > { %v1603_v17 = vpop.f32.mrb[20].mxu0 }
 0xc9b   : > { %v4267_v18 = vpop.f32.mrb[21].mxu0  ;;  %v1610_v19 = vsel %vm895_vm3, %v1603_v17, -inf }
 0xc9c   : > { %1611 = vmax.xlane.f32.xlu1 %v1610_v19  ;;  %v1606_v12 = vpop.f32.mrb[22].mxu0  ;;  %v3918_v18 = vld [vmem:[%s5530_s9 + $0x1] ss:$0 sm:$0xff] }
 0xc9d   : > { %v4268_v15 = vpop.f32.mrb[23].mxu0  ;;  %v1613_v20 = vsel %vm895_vm3, %v1606_v12, -inf }
 0xc9e   : > { %1614 = vmax.xlane.f32.xlu0 %v1613_v20 }
 0xca2   : > { %v1727_v21 = vpop.f32.mrb[24].mxu0 }
 0xca3   : > { %v4279_v22 = vpop.f32.mrb[25].mxu0  ;;  %v1734_v24 = vsel %vm895_vm3, %v1727_v21, -inf }
 0xca4   : > { %1735 = vmax.xlane.f32.xlu0 %v1734_v24  ;;  %v1730_v25 = vpop.f32.mrb[26].mxu0 }
 0xca5   : > { %v4280_v27 = vpop.f32.mrb[27].mxu0  ;;  %v1737_v28 = vsel %vm895_vm3, %v1730_v25, -inf }
 0xca8   : > { %1738 = vmax.xlane.f32.xlu0 %v1737_v28 }
 0xd29   : > { %v1612_v29 = vpop.xlane.xlu1 %1611 }
 0xd2a   : > { %v1616_v30 = vsub.f32 %v1603_v17, %v1612_v29 }
 0xd2b   : > { %v1615_v10 = vpop.xlane.xlu0 %1614 }
 0xd2c   : > { %v1618_v14 = vmul.f32 1.442695, %v1616_v30  ;;  %v1617_v31 = vsub.f32 %v1606_v12, %v1615_v10 }
 0xd2e   : > { %4582 = vpow2.f32 %v1618_v14  ;;  %v1620_v32 = vmul.f32 1.442695, %v1617_v31  ;;  %v4512_v31 = vld [vmem:[%s5533_s12 + $0x10] sm:$0xff]  }
 0xd30   : > { %4584 = vpow2.f32 %v1620_v32  ;;  %v4513_v32 = vld [vmem:[%s5533_s12 + $0x18] sm:$0xff]  }
 0xd31   : > { %v1736_v33 = vpop.xlane.xlu0 %1735 }
 0xd32   : > { %v1740_v34 = vsub.f32 %v1727_v21, %v1736_v33 }
 0xd34   : > { %v1742_v35 = vmul.f32 1.442695, %v1740_v34 }
 0xd35   : > { %v1739_v36 = vpop.xlane.xlu0 %1738 }
 0xd36   : > { %4586 = vpow2.f32 %v1742_v35  ;;  %v1741_v37 = vsub.f32 %v1730_v25, %v1739_v36 }
 0xd38   : > { %v4583_v38 = vpop.eup %4582  ;;  %v1744_v39 = vmul.f32 1.442695, %v1741_v37 }
 0xd39   : > { %v1622_v40 = vsel %vm895_vm3, %v4583_v38, 0.0 }
 0xd3a   : > { %v4585_v41 = vpop.eup %4584  ;;  %4588 = vpow2.f32 %v1744_v39  ;;  %1623 = vadd.xlane.f32.xlu1 %v1622_v40 }
 0xd3b   : > { %v1625_v42 = vsel %vm895_vm3, %v4585_v41, 0.0 }
 0xd3c   : > { %1626 = vadd.xlane.f32.xlu0 %v1625_v42 }
 0xd40   : > { %v4587_v43 = vpop.eup %4586 }
 0xd41   : > { %v1746_v44 = vsel %vm895_vm3, %v4587_v43, 0.0 }
 0xd42   : > { %1747 = vadd.xlane.f32.xlu1 %v1746_v44 }
 0xd44   : > { %v4589_v45 = vpop.eup %4588 }
 0xd45   : > { %v1749_v46 = vsel %vm895_vm3, %v4589_v45, 0.0 }
 0xd46   : > { %1750 = vadd.xlane.f32.xlu0 %v1749_v46 }
 0xd53   : > { %1633 = vrot.lane.b32.xlu1 %v1559_v6, %s5584_s27 }
 0xd5c   : > { %1757 = vrot.lane.b32.xlu0 %v1559_v6, %s5585_s30  ;;  %v4511_v6 = vld [vmem:[%s5529_s8 + $0x18] sm:$0xff]  }
 0xd5d   : > { %4290 = vmatpush3.bf16.msra.mxu0 %v4511_v6 }
 0xd5e   : > { %4303 = vmatprep.subr.bf16.mxu0 %v4682_v1 }
 0xdc7   : > { %v1624_v47 = vpop.xlane.xlu1 %1623 }
 0xdc8   : > { %4590 = vrcp.f32 %v1624_v47 }
 0xdc9   : > { %v1627_v48 = vpop.xlane.xlu0 %1626 }
 0xdca   : > { %4592 = vrcp.f32 %v1627_v48 }
 0xdcf   : > { %v1748_v49 = vpop.xlane.xlu1 %1747 }
 0xdd0   : > { %4594 = vrcp.f32 %v1748_v49  ;;  %v3924_v49 = vld [vmem:[%s5531_s10 + $0x1] ss:$0 sm:$0xff] }
 0xdd2   : > { %v4591_v50 = vpop.eup %4590 }
 0xdd3   : > { %v1634_v51 = vpop.permute.xlu1 %1633  ;;  %v1751_v52 = vpop.xlane.xlu0 %1750  ;;  %v1630_v54 = vmul.f32 %v4591_v50, %v4583_v38 }
 0xdd4   : > { %v4593_v53 = vpop.eup %4592  ;;  %4596 = vrcp.f32 %v1751_v52  ;;  %4270 = vmatpush3.bf16.msra.mxu1 %v1634_v51 }
 0xdd5   : > { %v1631_v55 = vmul.f32 %v4593_v53, %v4585_v41  ;;  %4281 = vmatprep.subr.bf16.mxu1 %v4682_v1 }
 0xdd7   : > { %v1758_v56 = vpop.permute.xlu0 %1757  ;;  %v1632_v57 = vpack.c.bf16 %v1631_v55, %v1630_v54  ;;  %v3925_v55 = vld [vmem:[%s5532_s11 + $0x1] ss:$0 sm:$0xff] }
 0xdd9   : > { %4272 = vmatmul.mubr.msk.bf16.vlgmr.msra.gmra.mrb[20].mxu1 %vm895_vm3, %v1632_v57 }
 0xdda   : > { %4282 = vmatpush3.bf16.msra.mxu1 %v1758_v56  ;;  %4283 = vmatprep.mubr.msk.bf16.mxu1 %vm4683_vm0, %v4682_v1  ;;  %v4595_v58 = vpop.eup %4594 }
 0xddb   : > { %4295 = vmatprep.subr.bf16.mxu1 %v4682_v1  ;;  %v1754_v60 = vmul.f32 %v4595_v58, %v4587_v43 }
 0xdde   : > { %v4597_v59 = vpop.eup %4596 }
 0xddf   : > { %v1755_v61 = vmul.f32 %v4597_v59, %v4589_v45 }
 0xde1   : > { %v1756_v62 = vpack.c.bf16 %v1755_v61, %v1754_v60  ;;  %v4514_v60 = vld [vmem:[%s5535_s14 + $0x20] sm:$0xff]   ;;  %v4515_v61 = vld [vmem:[%s5535_s14 + $0x28] sm:$0xff]  }
 0xde3   : > { %4284 = vmatmul.mubr.msk.bf16.vlgmr.msra.gmra.mrb[24].mxu1 %vm895_vm3, %v1756_v62  ;;  %v4516_v62 = vld [vmem:[%s5535_s14 + $0x30] sm:$0xff]  }
 0xde4   : > { %4299 = vmatprep.mubr.msk.bf16.mxu1 %vm4683_vm0, %v4682_v1  ;;  %4296 = vmatpush3.bf16.msra.mxu1 %v4512_v31  ;;  %v3944_v31 = vld [vmem:[%s5536_s15 + $0x1] ss:$0 sm:$0xff] }
 0xde5   : > { %4297 = vmatprep.subr.bf16.mxu1 %v4682_v1 }
 0xde8   : > { %4298 = vmatpush3.bf16.msra.mxu1 %v4513_v32 }
 0xde9   : > { %4315 = vmatprep.subr.bf16.mxu1 %v4682_v1 }
 0xeac   : > { %v1673_v63 = vpop.f32.mrb[20].mxu1 }
 0xead   : > { %v4273_v0 = vpop.f32.mrb[21].mxu1 }
 0xeae   : > { %v1676_v2 = vpop.f32.mrb[22].mxu1  ;;  %v3931_v0 = vld [vmem:[%s5534_s13 + $0x1] ss:$0 sm:$0xff] }
 0xeaf   : > { %v1680_v4 = vpack.c.bf16 %v1676_v2, %v1673_v63  ;;  %v4274_v5 = vpop.f32.mrb[23].mxu1  ;;  %v4517_v63 = vld [vmem:[%s5535_s14 + $0x38] sm:$0xff]  }
 0xeb1   : > { %1681 = vst.msk [vmem:[#allocation2] sm:$0xff] %vm895_vm3, %v1680_v4 }
 0xeb6   : > { %v1797_v7 = vpop.f32.mrb[24].mxu1 }
 0xeb7   : > { %v4285_v8 = vpop.f32.mrb[25].mxu1 }
 0xeb8   : > { %v1800_v9 = vpop.f32.mrb[26].mxu1 }
 0xeb9   : > { %v1804_v11 = vpack.c.bf16 %v1800_v9, %v1797_v7  ;;  %v4286_v13 = vpop.f32.mrb[27].mxu1 }
 0xebb   : > { %1806 = vrot.lane.b32.xlu1 %v1804_v11, %s5586_s23 }
 0xf2d   : > { %v1807_v16 = vpop.permute.xlu1 %1806 }
 0xf2e   : > { %1809 = vst.msk [vmem:[#allocation2] sm:$0xff] %vm1142_vm4, %v1807_v16 }
 0xf35   : > { %v1810_v17 = vld [vmem:[#allocation2] sm:$0xff] }
 0xf36   : > { %4292 = vmatmul.mubr.msk.bf16.vlgmr.msra.gmra.mrb[28].mxu0 %vm772_vm2, %v1810_v17 }
 0xf37   : > { %4311 = vmatprep.mubr.msk.bf16.mxu0 %vm4683_vm0, %v4682_v1  ;;  %4304 = vmatpush3.bf16.msra.mxu0 %v4514_v60 }
 0xf38   : > { %4305 = vmatprep.subr.bf16.mxu0 %v4682_v1 }
 0xf3b   : > { %4306 = vmatpush3.bf16.msra.mxu0 %v4515_v61 }
 0xf3c   : > { %4307 = vmatprep.subr.bf16.mxu0 %v4682_v1 }
 0xf3f   : > { %4308 = vmatpush3.bf16.msra.mxu0 %v4516_v62  ;;  %v3952_v62 = vld [vmem:[%s5580_s0 + $0x2] ss:$0 sm:$0xff] }
 0xf40   : > { %4309 = vmatprep.subr.bf16.mxu0 %v4682_v1 }
 0xf43   : > { %4310 = vmatpush3.bf16.msra.mxu0 %v4517_v63 }
 0xf44   : > { %4329 = vmatprep.subr.bf16.mxu0 %v4682_v1 }
0x1009   : > { %v1873_v19 = vpop.f32.mrb[28].mxu0 }
0x100a   : > { %v1874_v12 = vadd.f32 %v3918_v18, %v1873_v19  ;;  %v4293_v15 = vpop.f32.mrb[29].mxu0 }
0x100b   : > { %v1876_v20 = vpop.f32.mrb[30].mxu0 }
0x100c   : > { %v5088_v21 = vadd.f32 %v1874_v12, %v5002_v23  ;;  %v1877_v22 = vadd.f32 %v3918_v18, %v1876_v20  ;;  %v4294_v24 = vpop.f32.mrb[31].mxu0 }
0x100e   : > { %v5091_v25 = vadd.f32 %v1877_v22, %v5005_v26  ;;  %v1886_v27 = vsel %vm772_vm2, %v5088_v21, 0.0  ;;  %v1894_v30 = vmul.f32 %v5088_v21, %v5088_v21 }
0x100f   : > { %1887 = vadd.xlane.f32.xlu1 %v1886_v27 }
0x1010   : > { %v1889_v28 = vsel %vm772_vm2, %v5091_v25, 0.0  ;;  %v1895_v29 = vmul.f32 %v5091_v25, %v5091_v25  ;;  %v1896_v14 = vsel %vm772_vm2, %v1894_v30, 0.0 }
0x1011   : > { %1890 = vadd.xlane.f32.xlu0 %v1889_v28 }
0x1012   : > { %v1899_v10 = vsel %vm772_vm2, %v1895_v29, 0.0 }
0x1013   : > { %1900 = vadd.xlane.f32.xlu1 %v1899_v10 }
0x1015   : > { %1897 = vadd.xlane.f32.xlu0 %v1896_v14 }
0x109c   : > { %v1888_v33 = vpop.xlane.xlu1 %1887 }
0x109d   : > { %v1892_v35 = vmul.f32 0.03125, %v1888_v33 }
0x109e   : > { %v1891_v34 = vpop.xlane.xlu0 %1890 }
0x109f   : > { %v1893_v36 = vmul.f32 0.03125, %v1891_v34  ;;  %v1904_v41 = vmul.f32 %v1892_v35, %v1892_v35  ;;  %v1908_v50 = vsub.f32 %v5088_v21, %v1892_v35 }
0x10a0   : > { %v1901_v37 = vpop.xlane.xlu1 %1900 }
0x10a1   : > { %v1905_v38 = vmul.f32 %v1893_v36, %v1893_v36  ;;  %v1903_v39 = vmul.f32 0.03125, %v1901_v37  ;;  %v1909_v47 = vsub.f32 %v5091_v25, %v1893_v36 }
0x10a2   : > { %v1898_v40 = vpop.xlane.xlu0 %1897 }
0x10a3   : > { %v1907_v42 = vsub.f32 %v1903_v39, %v1905_v38  ;;  %v1902_v43 = vmul.f32 0.03125, %v1898_v40 }
0x10a5   : > { %v1911_v44 = vadd.f32 1e-06, %v1907_v42  ;;  %v1906_v45 = vsub.f32 %v1902_v43, %v1904_v41 }
0x10a7   : > { %4598 = vrsqrt.f32 %v1911_v44  ;;  %v1910_v46 = vadd.f32 1e-06, %v1906_v45  ;;  %v4518_v44 = vld [vmem:[%s5579_s26 + $0x20] sm:$0xff]   ;;  %v4519_v45 = vld [vmem:[%s5579_s26 + $0x28] sm:$0xff]  }
0x10a9   : > { %4600 = vrsqrt.f32 %v1910_v46 }
0x10b1   : > { %v4599_v48 = vpop.eup %4598 }
0x10b2   : > { %v1915_v51 = vmul.f32 %v4599_v48, %v1909_v47 }
0x10b3   : > { %v4601_v52 = vpop.eup %4600 }
0x10b4   : > { %v1914_v53 = vmul.f32 %v4601_v52, %v1908_v50  ;;  %v1923_v54 = vmul.f32 %v3924_v49, %v1915_v51 }
0x10b6   : > { %v1922_v56 = vmul.f32 %v3924_v49, %v1914_v53  ;;  %v1931_v58 = vadd.f32 %v3925_v55, %v1923_v54 }
0x10b8   : > { %v1930_v57 = vadd.f32 %v3925_v55, %v1922_v56 }
0x10ba   : > { %v1932_v59 = vpack.c.bf16 %v1931_v58, %v1930_v57 }
0x10bc   : > { %4300 = vmatmul.mubr.msk.bf16.vlgmr.msra.gmra.mrb[28].mxu1 %vm772_vm2, %v1932_v59 }
0x10bd   : > { %4319 = vmatprep.mubr.msk.bf16.mxu1 %vm4683_vm0, %v4682_v1  ;;  %4316 = vmatpush3.bf16.msra.mxu1 %v4518_v44 }
0x10be   : > { %4317 = vmatprep.subr.bf16.mxu1 %v4682_v1 }
0x10c1   : > { %4318 = vmatpush3.bf16.msra.mxu1 %v4519_v45 }
0x10c2   : > { %4323 = vmatprep.subr.bf16.mxu1 %v4682_v1 }
0x118f   : > { %v1995_v2 = vpop.f32.mrb[28].mxu1 }
0x1190   : > { %v1996_v3 = vadd.f32 %v3931_v0, %v1995_v2  ;;  %v4301_v4 = vpop.f32.mrb[29].mxu1 }
0x1191   : > { %v1998_v5 = vpop.f32.mrb[30].mxu1 }
0x1192   : > { %v2002_v6 = vmul.f32 %v1996_v3, %v1996_v3  ;;  %v1999_v7 = vadd.f32 %v3931_v0, %v1998_v5  ;;  %v4302_v8 = vpop.f32.mrb[31].mxu1  ;;  %v3953_v5 = vld [vmem:[%s5581_s24 + $0x2] ss:$0 sm:$0xff] }
0x1194   : > { %v2004_v9 = vmul.f32 %v2002_v6, %v1996_v3  ;;  %v2003_v11 = vmul.f32 %v1999_v7, %v1999_v7 }
0x1196   : > { %v2006_v13 = vmul.f32 0.044715, %v2004_v9  ;;  %v2005_v16 = vmul.f32 %v2003_v11, %v1999_v7  ;;  %v3959_v11 = vld [vmem:[%s5528_s7 + $0x2] ss:$0 sm:$0xff] }
0x1198   : > { %v2008_v17 = vadd.f32 %v2006_v13, %v1996_v3  ;;  %v2007_v18 = vmul.f32 0.044715, %v2005_v16 }
0x119a   : > { %v2010_v19 = vmul.f32 0.7978846, %v2008_v17  ;;  %v2009_v12 = vadd.f32 %v2007_v18, %v1999_v7 }
0x119c   : > { %4602 = vtanh.f32 %v2010_v19  ;;  %v2011_v15 = vmul.f32 0.7978846, %v2009_v12 }
0x119e   : > { %4604 = vtanh.f32 %v2011_v15 }
0x11a6   : > { %v4603_v20 = vpop.eup %4602 }
0x11a7   : > { %v2014_v22 = vadd.f32 1.0, %v4603_v20 }
0x11a8   : > { %v4605_v24 = vpop.eup %4604 }
0x11a9   : > { %v2016_v27 = vmul.f32 0.5, %v2014_v22  ;;  %v2015_v28 = vadd.f32 1.0, %v4605_v24 }
0x11ab   : > { %v2017_v29 = vmul.f32 0.5, %v2015_v28  ;;  %v2018_v30 = vmul.f32 %v2016_v27, %v1996_v3 }
0x11ad   : > { %v2019_v10 = vmul.f32 %v2017_v29, %v1999_v7 }
0x11af   : > { %v2020_v14 = vpack.c.bf16 %v2019_v10, %v2018_v30 }
0x11b1   : > { %4312 = vmatmul.mubr.msk.bf16.vlgmr.msra.gmra.mrb[32].mxu0 %vm1388_vm5, %v2020_v14 }
0x11b2   : > { %4331 = vmatprep.mubr.msk.bf16.mxu0 %vm4683_vm0, %v4682_v1 }
0x1284   : > { %v2099_v32 = vpop.f32.mrb[32].mxu0 }
0x1285   : > { %v2100_v33 = vadd.f32 %v3944_v31, %v2099_v32  ;;  %v4313_v34 = vpop.f32.mrb[33].mxu0 }
0x1286   : > { %v2102_v35 = vpop.f32.mrb[34].mxu0 }
0x1287   : > { %v5148_v36 = vadd.f32 %v2100_v33, %v5088_v21  ;;  %v2103_v37 = vadd.f32 %v3944_v31, %v2102_v35  ;;  %v4314_v38 = vpop.f32.mrb[35].mxu0 }
0x1289   : > { %v5151_v39 = vadd.f32 %v2103_v37, %v5091_v25  ;;  %v2113_v40 = vsel %vm772_vm2, %v5148_v36, 0.0  ;;  %v2121_v41 = vmul.f32 %v5148_v36, %v5148_v36 }
0x128a   : > { %2114 = vadd.xlane.f32.xlu0 %v2113_v40 }
0x128b   : > { %v2116_v42 = vsel %vm772_vm2, %v5151_v39, 0.0  ;;  %v2122_v43 = vmul.f32 %v5151_v39, %v5151_v39  ;;  %v2123_v21 = vsel %vm772_vm2, %v2121_v41, 0.0 }
0x128c   : > { %2117 = vadd.xlane.f32.xlu1 %v2116_v42 }
0x128d   : > { %v2126_v25 = vsel %vm772_vm2, %v2122_v43, 0.0 }
0x128e   : > { %2124 = vadd.xlane.f32.xlu0 %v2123_v21 }
0x1290   : > { %2127 = vadd.xlane.f32.xlu1 %v2126_v25 }
0x1317   : > { %v2115_v46 = vpop.xlane.xlu0 %2114 }
0x1318   : > { %v2119_v47 = vmul.f32 0.03125, %v2115_v46 }
0x1319   : > { %v2118_v48 = vpop.xlane.xlu1 %2117 }
0x131a   : > { %v2120_v49 = vmul.f32 0.03125, %v2118_v48  ;;  %v2131_v51 = vmul.f32 %v2119_v47, %v2119_v47  ;;  %v2135_v60 = vsub.f32 %v5148_v36, %v2119_v47 }
0x131b   : > { %v2125_v50 = vpop.xlane.xlu0 %2124 }
0x131c   : > { %v2129_v52 = vmul.f32 0.03125, %v2125_v50  ;;  %v2132_v54 = vmul.f32 %v2120_v49, %v2120_v49  ;;  %v2136_v63 = vsub.f32 %v5151_v39, %v2120_v49 }
0x131d   : > { %v2128_v53 = vpop.xlane.xlu1 %2127 }
0x131e   : > { %v2133_v55 = vsub.f32 %v2129_v52, %v2131_v51  ;;  %v2130_v56 = vmul.f32 0.03125, %v2128_v53 }
0x1320   : > { %v2137_v57 = vadd.f32 1e-06, %v2133_v55  ;;  %v2134_v58 = vsub.f32 %v2130_v56, %v2132_v54 }
0x1322   : > { %4606 = vrsqrt.f32 %v2137_v57  ;;  %v2138_v59 = vadd.f32 1e-06, %v2134_v58 }
0x1324   : > { %4608 = vrsqrt.f32 %v2138_v59 }
0x132c   : > { %v4607_v61 = vpop.eup %4606 }
0x132d   : > { %v2141_v0 = vmul.f32 %v4607_v61, %v2135_v60 }
0x132e   : > { %v4609_v2 = vpop.eup %4608 }
0x132f   : > { %v2142_v3 = vmul.f32 %v4609_v2, %v2136_v63  ;;  %v2149_v4 = vmul.f32 %v3952_v62, %v2141_v0 }
0x1331   : > { %v2150_v6 = vmul.f32 %v3952_v62, %v2142_v3  ;;  %v2157_v7 = vadd.f32 %v3953_v5, %v2149_v4 }
0x1333   : > { %v2158_v8 = vadd.f32 %v3953_v5, %v2150_v6 }
0x1335   : > { %v2159_v9 = vpack.c.bf16 %v2158_v8, %v2157_v7 }
0x1337   : > { %4320 = vmatmul.mubr.msk.bf16.vlgmr.msra.gmra.mrb[32].mxu1 %vm772_vm2, %v2159_v9 }
0x1338   : > { %4325 = vmatprep.mubr.msk.bf16.mxu1 %vm4683_vm0, %v4682_v1 }
0x140a   : > { %v2222_v13 = vpop.f32.mrb[32].mxu1 }
0x140b   : > { %v2223_v16 = vadd.f32 %v3959_v11, %v2222_v13  ;;  %v4321_v17 = vpop.f32.mrb[33].mxu1 }
0x140c   : > { %v2225_v18 = vpop.f32.mrb[34].mxu1 }
0x140d   : > { %v2226_v19 = vadd.f32 %v3959_v11, %v2225_v18  ;;  %v4322_v12 = vpop.f32.mrb[35].mxu1  ;;  %v2229_v15 = vmul.f32 0.25, %v2223_v16 }
0x140f   : > { %v2230_v20 = vmul.f32 0.25, %v2226_v19  ;;  %v2232_v22 = vpack.c.bf16 %v2226_v19, %v2223_v16 }
0x1411   : > { %2358 = vrot.lane.b32.xlu1 %v2232_v22, %s5587_s5  ;;  %2234 = vrot.lane.b32.xlu0 %v2232_v22, %s5582_s25  ;;  %v2231_v24 = vpack.c.bf16 %v2230_v20, %v2229_v15  ;;  %v4520_v20 = vld [vmem:[%s5529_s8 + $0x20] sm:$0xff]  }
0x1415   : > { %2356 = vrot.lane.b32.xlu1 %v2231_v24, %s5583_s29 }
0x1483   : > { %v2235_v27 = vpop.permute.xlu0 %2234  ;;  %v2359_v29 = vpop.permute.xlu1 %2358 }
0x1484   : > { %v2240_v28 = vsel %vm895_vm3, %v2235_v27, 0  ;;  %v2364_v30 = vsel %vm895_vm3, %v2359_v29, 0  ;;  %v4521_v27 = vld [vmem:[%s5529_s8 + $0x28] sm:$0xff]  }
0x1485   : > { %4324 = vmatpush3.bf16.xpose.msra.mxu1 %v2240_v28 }
0x1486   : > { %4335 = vmatprep.subr.bf16.mxu1 %v4682_v1 }
0x1487   : > { %v2357_v10 = vpop.permute.xlu1 %2356 }
0x148c   : > { %4326 = vmatmul.mubr.msk.bf16.vlgmr.msra.gmra.mrb[36].mxu1 %vm895_vm3, %v2231_v24 }
0x148d   : > { %4336 = vmatpush3.bf16.xpose.msra.mxu1 %v2364_v30  ;;  %4337 = vmatprep.mubr.msk.bf16.mxu1 %vm4683_vm0, %v4682_v1 }
0x148e   : > { %4347 = vmatprep.subr.bf16.mxu1 %v4682_v1 }
0x1494   : > { %4338 = vmatmul.mubr.msk.bf16.vlgmr.msra.gmra.mrb[40].mxu1 %vm895_vm3, %v2357_v10 }
0x1495   : > { %4351 = vmatprep.mubr.msk.bf16.mxu1 %vm4683_vm0, %v4682_v1  ;;  %4348 = vmatpush3.bf16.msra.mxu1 %v4520_v20  ;;  %v3985_v20 = vld [vmem:[%s5534_s13 + $0x2] ss:$0 sm:$0xff] }
0x1496   : > { %4349 = vmatprep.subr.bf16.mxu1 %v4682_v1 }
0x1499   : > { %4350 = vmatpush3.bf16.msra.mxu1 %v4521_v27 }
0x149a   : > { %4363 = vmatprep.subr.bf16.mxu1 %v4682_v1 }
0x155f   : > { %v2276_v14 = vpop.f32.mrb[36].mxu1 }
0x1560   : > { %v4327_v31 = vpop.f32.mrb[37].mxu1  ;;  %v2283_v32 = vsel %vm895_vm3, %v2276_v14, -inf }
0x1561   : > { %2284 = vmax.xlane.f32.xlu1 %v2283_v32  ;;  %v2279_v33 = vpop.f32.mrb[38].mxu1 }
0x1562   : > { %v4328_v34 = vpop.f32.mrb[39].mxu1  ;;  %v2286_v35 = vsel %vm895_vm3, %v2279_v33, -inf }
0x1563   : > { %2287 = vmax.xlane.f32.xlu0 %v2286_v35 }
0x1567   : > { %v2400_v37 = vpop.f32.mrb[40].mxu1 }
0x1568   : > { %v4339_v38 = vpop.f32.mrb[41].mxu1  ;;  %v2407_v40 = vsel %vm895_vm3, %v2400_v37, -inf }
0x1569   : > { %2408 = vmax.xlane.f32.xlu0 %v2407_v40  ;;  %v2403_v41 = vpop.f32.mrb[42].mxu1 }
0x156a   : > { %v4340_v42 = vpop.f32.mrb[43].mxu1  ;;  %v2410_v43 = vsel %vm895_vm3, %v2403_v41, -inf }
0x156d   : > { %2411 = vmax.xlane.f32.xlu0 %v2410_v43 }
0x15ee   : > { %v2285_v21 = vpop.xlane.xlu1 %2284 }
0x15ef   : > { %v2289_v25 = vsub.f32 %v2276_v14, %v2285_v21 }
0x15f0   : > { %v2288_v44 = vpop.xlane.xlu0 %2287 }
0x15f1   : > { %v2291_v45 = vmul.f32 1.442695, %v2289_v25  ;;  %v2290_v46 = vsub.f32 %v2279_v33, %v2288_v44  ;;  %v3972_v33 = vld [vmem:[%s5530_s9 + $0x2] ss:$0 sm:$0xff] }
0x15f3   : > { %4610 = vpow2.f32 %v2291_v45  ;;  %v2293_v47 = vmul.f32 1.442695, %v2290_v46 }
0x15f5   : > { %4612 = vpow2.f32 %v2293_v47 }
0x15f6   : > { %v2409_v48 = vpop.xlane.xlu0 %2408 }
0x15f7   : > { %v2413_v49 = vsub.f32 %v2400_v37, %v2409_v48  ;;  %v4522_v48 = vld [vmem:[%s5533_s12 + $0x20] sm:$0xff]  }
0x15f9   : > { %v2415_v50 = vmul.f32 1.442695, %v2413_v49  ;;  %v4523_v49 = vld [vmem:[%s5533_s12 + $0x28] sm:$0xff]  }
0x15fa   : > { %v2412_v51 = vpop.xlane.xlu0 %2411 }
0x15fb   : > { %4614 = vpow2.f32 %v2415_v50  ;;  %v2414_v52 = vsub.f32 %v2403_v41, %v2412_v51 }
0x15fd   : > { %v4611_v53 = vpop.eup %4610  ;;  %v2417_v54 = vmul.f32 1.442695, %v2414_v52 }
0x15fe   : > { %v2295_v55 = vsel %vm895_vm3, %v4611_v53, 0.0 }
0x15ff   : > { %v4613_v56 = vpop.eup %4612  ;;  %4616 = vpow2.f32 %v2417_v54  ;;  %2296 = vadd.xlane.f32.xlu1 %v2295_v55 }
0x1600   : > { %v2298_v57 = vsel %vm895_vm3, %v4613_v56, 0.0 }
0x1601   : > { %2299 = vadd.xlane.f32.xlu0 %v2298_v57 }
0x1605   : > { %v4615_v58 = vpop.eup %4614 }
0x1606   : > { %v2419_v59 = vsel %vm895_vm3, %v4615_v58, 0.0 }
0x1607   : > { %2420 = vadd.xlane.f32.xlu1 %v2419_v59 }
0x1609   : > { %v4617_v60 = vpop.eup %4616 }
0x160a   : > { %v2422_v61 = vsel %vm895_vm3, %v4617_v60, 0.0 }
0x160b   : > { %2423 = vadd.xlane.f32.xlu0 %v2422_v61 }
0x1618   : > { %2306 = vrot.lane.b32.xlu1 %v2232_v22, %s5584_s27 }
0x1621   : > { %2430 = vrot.lane.b32.xlu0 %v2232_v22, %s5585_s30 }
0x168c   : > { %v2297_v62 = vpop.xlane.xlu1 %2296 }
0x168d   : > { %4618 = vrcp.f32 %v2297_v62 }
0x168e   : > { %v2300_v63 = vpop.xlane.xlu0 %2299 }
0x168f   : > { %4620 = vrcp.f32 %v2300_v63 }
0x1694   : > { %v2421_v0 = vpop.xlane.xlu1 %2420 }
0x1695   : > { %4622 = vrcp.f32 %v2421_v0 }
0x1697   : > { %v4619_v2 = vpop.eup %4618 }
0x1698   : > { %v2307_v3 = vpop.permute.xlu1 %2306  ;;  %v2424_v4 = vpop.xlane.xlu0 %2423  ;;  %v2303_v6 = vmul.f32 %v4619_v2, %v4611_v53 }
0x1699   : > { %v4621_v5 = vpop.eup %4620  ;;  %4624 = vrcp.f32 %v2424_v4  ;;  %4330 = vmatpush3.bf16.msra.mxu0 %v2307_v3  ;;  %v3978_v3 = vld [vmem:[%s5531_s10 + $0x2] ss:$0 sm:$0xff] }
0x169a   : > { %v2304_v7 = vmul.f32 %v4621_v5, %v4613_v56  ;;  %4341 = vmatprep.subr.bf16.mxu0 %v4682_v1 }
0x169c   : > { %v2431_v8 = vpop.permute.xlu0 %2430  ;;  %v2305_v9 = vpack.c.bf16 %v2304_v7, %v2303_v6 }
0x169e   : > { %4332 = vmatmul.mubr.msk.bf16.vlgmr.msra.gmra.mrb[36].mxu0 %vm895_vm3, %v2305_v9  ;;  %v3979_v9 = vld [vmem:[%s5532_s11 + $0x2] ss:$0 sm:$0xff] }
0x169f   : > { %4342 = vmatpush3.bf16.msra.mxu0 %v2431_v8  ;;  %4343 = vmatprep.mubr.msk.bf16.mxu0 %vm4683_vm0, %v4682_v1  ;;  %v4623_v11 = vpop.eup %4622 }
0x16a0   : > { %4355 = vmatprep.subr.bf16.mxu0 %v4682_v1  ;;  %v2427_v16 = vmul.f32 %v4623_v11, %v4615_v58 }
0x16a3   : > { %v4625_v13 = vpop.eup %4624 }
0x16a4   : > { %v2428_v17 = vmul.f32 %v4625_v13, %v4617_v60 }
0x16a6   : > { %v2429_v18 = vpack.c.bf16 %v2428_v17, %v2427_v16 }
0x16a8   : > { %4344 = vmatmul.mubr.msk.bf16.vlgmr.msra.gmra.mrb[40].mxu0 %vm895_vm3, %v2429_v18  ;;  %v4524_v18 = vld [vmem:[%s5535_s14 + $0x40] sm:$0xff]  }
0x16a9   : > { %4359 = vmatprep.mubr.msk.bf16.mxu0 %vm4683_vm0, %v4682_v1  ;;  %4356 = vmatpush3.bf16.msra.mxu0 %v4522_v48 }
0x16aa   : > { %4357 = vmatprep.subr.bf16.mxu0 %v4682_v1 }
0x16ad   : > { %4358 = vmatpush3.bf16.msra.mxu0 %v4523_v49 }
0x16ae   : > { %4375 = vmatprep.subr.bf16.mxu0 %v4682_v1 }
0x1771   : > { %v2346_v19 = vpop.f32.mrb[36].mxu0 }
0x1772   : > { %v4333_v12 = vpop.f32.mrb[37].mxu0 }
0x1773   : > { %v2349_v15 = vpop.f32.mrb[38].mxu0  ;;  %v4526_v12 = vld [vmem:[%s5535_s14 + $0x50] sm:$0xff]  }
0x1774   : > { %v2353_v22 = vpack.c.bf16 %v2349_v15, %v2346_v19  ;;  %v4334_v24 = vpop.f32.mrb[39].mxu0  ;;  %v4525_v19 = vld [vmem:[%s5535_s14 + $0x48] sm:$0xff]   ;;  %v4527_v15 = vld [vmem:[%s5535_s14 + $0x58] sm:$0xff]  }
0x1776   : > { %2354 = vst.msk [vmem:[#allocation2] sm:$0xff] %vm895_vm3, %v2353_v22 }
0x177b   : > { %v2470_v28 = vpop.f32.mrb[40].mxu0 }
0x177c   : > { %v4345_v29 = vpop.f32.mrb[41].mxu0 }
0x177d   : > { %v2473_v30 = vpop.f32.mrb[42].mxu0 }
0x177e   : > { %v2477_v10 = vpack.c.bf16 %v2473_v30, %v2470_v28  ;;  %v4346_v14 = vpop.f32.mrb[43].mxu0 }
0x1780   : > { %2479 = vrot.lane.b32.xlu1 %v2477_v10, %s5586_s23 }
0x17f2   : > { %v2480_v31 = vpop.permute.xlu1 %2479 }
0x17f3   : > { %2482 = vst.msk [vmem:[#allocation2] sm:$0xff] %vm1142_vm4, %v2480_v31 }
0x17fa   : > { %v2483_v32 = vld [vmem:[#allocation2] sm:$0xff] }
0x17fb   : > { %4352 = vmatmul.mubr.msk.bf16.vlgmr.msra.gmra.mrb[44].mxu1 %vm772_vm2, %v2483_v32 }
0x17fc   : > { %4371 = vmatprep.mubr.msk.bf16.mxu1 %vm4683_vm0, %v4682_v1  ;;  %4364 = vmatpush3.bf16.msra.mxu1 %v4524_v18 }
0x17fd   : > { %4365 = vmatprep.subr.bf16.mxu1 %v4682_v1 }
0x1800   : > { %4366 = vmatpush3.bf16.msra.mxu1 %v4525_v19 }
0x1801   : > { %4367 = vmatprep.subr.bf16.mxu1 %v4682_v1 }
0x1804   : > { %4368 = vmatpush3.bf16.msra.mxu1 %v4526_v12 }
0x1805   : > { %4369 = vmatprep.subr.bf16.mxu1 %v4682_v1 }
0x1808   : > { %4370 = vmatpush3.bf16.msra.mxu1 %v4527_v15 }
0x1809   : > { %4389 = vmatprep.subr.bf16.mxu1 %v4682_v1 }
0x18ce   : > { %v2546_v34 = vpop.f32.mrb[44].mxu1 }
0x18cf   : > { %v2547_v35 = vadd.f32 %v3972_v33, %v2546_v34  ;;  %v4353_v37 = vpop.f32.mrb[45].mxu1 }
0x18d0   : > { %v2549_v38 = vpop.f32.mrb[46].mxu1 }
0x18d1   : > { %v5234_v40 = vadd.f32 %v2547_v35, %v5148_v36  ;;  %v2550_v41 = vadd.f32 %v3972_v33, %v2549_v38  ;;  %v4354_v42 = vpop.f32.mrb[47].mxu1 }
0x18d3   : > { %v5237_v43 = vadd.f32 %v2550_v41, %v5151_v39  ;;  %v2559_v21 = vsel %vm772_vm2, %v5234_v40, 0.0  ;;  %v2567_v45 = vmul.f32 %v5234_v40, %v5234_v40 }
0x18d4   : > { %2560 = vadd.xlane.f32.xlu1 %v2559_v21 }
0x18d5   : > { %v2562_v25 = vsel %vm772_vm2, %v5237_v43, 0.0  ;;  %v2568_v44 = vmul.f32 %v5237_v43, %v5237_v43  ;;  %v2569_v47 = vsel %vm772_vm2, %v2567_v45, 0.0 }
0x18d6   : > { %2563 = vadd.xlane.f32.xlu0 %v2562_v25 }
0x18d7   : > { %v2572_v46 = vsel %vm772_vm2, %v2568_v44, 0.0 }
0x18d8   : > { %2573 = vadd.xlane.f32.xlu1 %v2572_v46 }
0x18da   : > { %2570 = vadd.xlane.f32.xlu0 %v2569_v47 }
0x1961   : > { %v2561_v50 = vpop.xlane.xlu1 %2560 }
0x1962   : > { %v2565_v52 = vmul.f32 0.03125, %v2561_v50  ;;  %v3998_v50 = vld [vmem:[%s5536_s15 + $0x2] ss:$0 sm:$0xff] }
0x1963   : > { %v2564_v51 = vpop.xlane.xlu0 %2563 }
0x1964   : > { %v2566_v53 = vmul.f32 0.03125, %v2564_v51  ;;  %v2577_v58 = vmul.f32 %v2565_v52, %v2565_v52  ;;  %v2581_v4 = vsub.f32 %v5234_v40, %v2565_v52 }
0x1965   : > { %v2574_v54 = vpop.xlane.xlu1 %2573 }
0x1966   : > { %v2578_v55 = vmul.f32 %v2566_v53, %v2566_v53  ;;  %v2576_v56 = vmul.f32 0.03125, %v2574_v54  ;;  %v2582_v0 = vsub.f32 %v5237_v43, %v2566_v53 }
0x1967   : > { %v2571_v57 = vpop.xlane.xlu0 %2570 }
0x1968   : > { %v2580_v59 = vsub.f32 %v2576_v56, %v2578_v55  ;;  %v2575_v60 = vmul.f32 0.03125, %v2571_v57 }
0x196a   : > { %v2584_v61 = vadd.f32 1e-06, %v2580_v59  ;;  %v2579_v62 = vsub.f32 %v2575_v60, %v2577_v58 }
0x196c   : > { %4626 = vrsqrt.f32 %v2584_v61  ;;  %v2583_v63 = vadd.f32 1e-06, %v2579_v62 }
0x196e   : > { %4628 = vrsqrt.f32 %v2583_v63  ;;  %v4528_v63 = vld [vmem:[%s5579_s26 + $0x30] sm:$0xff]  }
0x1976   : > { %v4627_v2 = vpop.eup %4626 }
0x1977   : > { %v2588_v5 = vmul.f32 %v4627_v2, %v2582_v0  ;;  %v4529_v0 = vld [vmem:[%s5579_s26 + $0x38] sm:$0xff]  }
0x1978   : > { %v4629_v6 = vpop.eup %4628 }
0x1979   : > { %v2587_v7 = vmul.f32 %v4629_v6, %v2581_v4  ;;  %v2596_v8 = vmul.f32 %v3978_v3, %v2588_v5 }
0x197b   : > { %v2595_v11 = vmul.f32 %v3978_v3, %v2587_v7  ;;  %v2604_v16 = vadd.f32 %v3979_v9, %v2596_v8 }
0x197d   : > { %v2603_v13 = vadd.f32 %v3979_v9, %v2595_v11 }
0x197f   : > { %v2605_v17 = vpack.c.bf16 %v2604_v16, %v2603_v13 }
0x1981   : > { %4360 = vmatmul.mubr.msk.bf16.vlgmr.msra.gmra.mrb[44].mxu0 %vm772_vm2, %v2605_v17 }
0x1982   : > { %4379 = vmatprep.mubr.msk.bf16.mxu0 %vm4683_vm0, %v4682_v1  ;;  %4376 = vmatpush3.bf16.msra.mxu0 %v4528_v63 }
0x1983   : > { %4377 = vmatprep.subr.bf16.mxu0 %v4682_v1 }
0x1986   : > { %4378 = vmatpush3.bf16.msra.mxu0 %v4529_v0 }
0x1987   : > { %4383 = vmatprep.subr.bf16.mxu0 %v4682_v1 }
0x1a54   : > { %v2668_v22 = vpop.f32.mrb[44].mxu0 }
0x1a55   : > { %v2669_v24 = vadd.f32 %v3985_v20, %v2668_v22  ;;  %v4361_v27 = vpop.f32.mrb[45].mxu0 }
0x1a56   : > { %v2671_v28 = vpop.f32.mrb[46].mxu0 }
0x1a57   : > { %v2675_v29 = vmul.f32 %v2669_v24, %v2669_v24  ;;  %v2672_v30 = vadd.f32 %v3985_v20, %v2671_v28  ;;  %v4362_v10 = vpop.f32.mrb[47].mxu0  ;;  %v4006_v20 = vld [vmem:[%s5580_s0 + $0x3] ss:$0 sm:$0xff] }
0x1a59   : > { %v2677_v14 = vmul.f32 %v2675_v29, %v2669_v24  ;;  %v2676_v31 = vmul.f32 %v2672_v30, %v2672_v30 }
0x1a5b   : > { %v2679_v32 = vmul.f32 0.044715, %v2677_v14  ;;  %v2678_v33 = vmul.f32 %v2676_v31, %v2672_v30 }
0x1a5d   : > { %v2681_v34 = vadd.f32 %v2679_v32, %v2669_v24  ;;  %v2680_v35 = vmul.f32 0.044715, %v2678_v33  ;;  %v4013_v33 = vld [vmem:[%s5528_s7 + $0x3] ss:$0 sm:$0xff] }
0x1a5f   : > { %v2683_v37 = vmul.f32 0.7978846, %v2681_v34  ;;  %v2682_v38 = vadd.f32 %v2680_v35, %v2672_v30 }
0x1a61   : > { %4630 = vtanh.f32 %v2683_v37  ;;  %v2684_v41 = vmul.f32 0.7978846, %v2682_v38 }
0x1a63   : > { %4632 = vtanh.f32 %v2684_v41 }
0x1a6b   : > { %v4631_v42 = vpop.eup %4630 }
0x1a6c   : > { %v2687_v21 = vadd.f32 1.0, %v4631_v42 }
0x1a6d   : > { %v4633_v25 = vpop.eup %4632 }
0x1a6e   : > { %v2689_v44 = vmul.f32 0.5, %v2687_v21  ;;  %v2688_v45 = vadd.f32 1.0, %v4633_v25 }
0x1a70   : > { %v2690_v46 = vmul.f32 0.5, %v2688_v45  ;;  %v2691_v47 = vmul.f32 %v2689_v44, %v2669_v24 }
0x1a72   : > { %v2692_v48 = vmul.f32 %v2690_v46, %v2672_v30  ;;  %v4007_v30 = vld [vmem:[%s5581_s24 + $0x3] ss:$0 sm:$0xff] }
0x1a74   : > { %v2693_v49 = vpack.c.bf16 %v2692_v48, %v2691_v47 }
0x1a76   : > { %4372 = vmatmul.mubr.msk.bf16.vlgmr.msra.gmra.mrb[48].mxu1 %vm1388_vm5, %v2693_v49 }
0x1a77   : > { %4391 = vmatprep.mubr.msk.bf16.mxu1 %vm4683_vm0, %v4682_v1 }
0x1b49   : > { %v2772_v51 = vpop.f32.mrb[48].mxu1 }
0x1b4a   : > { %v2773_v52 = vadd.f32 %v3998_v50, %v2772_v51  ;;  %v4373_v53 = vpop.f32.mrb[49].mxu1 }
0x1b4b   : > { %v2775_v54 = vpop.f32.mrb[50].mxu1 }
0x1b4c   : > { %v5294_v55 = vadd.f32 %v2773_v52, %v5234_v40  ;;  %v2776_v56 = vadd.f32 %v3998_v50, %v2775_v54  ;;  %v4374_v57 = vpop.f32.mrb[51].mxu1 }
0x1b4e   : > { %v5297_v58 = vadd.f32 %v2776_v56, %v5237_v43  ;;  %v2786_v59 = vsel %vm772_vm2, %v5294_v55, 0.0  ;;  %v2794_v60 = vmul.f32 %v5294_v55, %v5294_v55 }
0x1b4f   : > { %2787 = vadd.xlane.f32.xlu0 %v2786_v59 }
0x1b50   : > { %v2789_v61 = vsel %vm772_vm2, %v5297_v58, 0.0  ;;  %v2795_v62 = vmul.f32 %v5297_v58, %v5297_v58  ;;  %v2796_v40 = vsel %vm772_vm2, %v2794_v60, 0.0 }
0x1b51   : > { %2790 = vadd.xlane.f32.xlu1 %v2789_v61 }
0x1b52   : > { %v2799_v43 = vsel %vm772_vm2, %v2795_v62, 0.0 }
0x1b53   : > { %2797 = vadd.xlane.f32.xlu0 %v2796_v40 }
0x1b55   : > { %2800 = vadd.xlane.f32.xlu1 %v2799_v43 }
0x1bdc   : > { %v2788_v2 = vpop.xlane.xlu0 %2787 }
0x1bdd   : > { %v2792_v3 = vmul.f32 0.03125, %v2788_v2 }
0x1bde   : > { %v2791_v4 = vpop.xlane.xlu1 %2790 }
0x1bdf   : > { %v2793_v5 = vmul.f32 0.03125, %v2791_v4  ;;  %v2804_v7 = vmul.f32 %v2792_v3, %v2792_v3  ;;  %v2808_v12 = vsub.f32 %v5294_v55, %v2792_v3 }
0x1be0   : > { %v2798_v6 = vpop.xlane.xlu0 %2797 }
0x1be1   : > { %v2802_v8 = vmul.f32 0.03125, %v2798_v6  ;;  %v2805_v11 = vmul.f32 %v2793_v5, %v2793_v5  ;;  %v2809_v22 = vsub.f32 %v5297_v58, %v2793_v5 }
0x1be2   : > { %v2801_v9 = vpop.xlane.xlu1 %2800 }
0x1be3   : > { %v2806_v13 = vsub.f32 %v2802_v8, %v2804_v7  ;;  %v2803_v16 = vmul.f32 0.03125, %v2801_v9 }
0x1be5   : > { %v2810_v17 = vadd.f32 1e-06, %v2806_v13  ;;  %v2807_v18 = vsub.f32 %v2803_v16, %v2805_v11 }
0x1be7   : > { %4634 = vrsqrt.f32 %v2810_v17  ;;  %v2811_v19 = vadd.f32 1e-06, %v2807_v18 }
0x1be9   : > { %4636 = vrsqrt.f32 %v2811_v19 }
0x1bf1   : > { %v4635_v15 = vpop.eup %4634 }
0x1bf2   : > { %v2814_v24 = vmul.f32 %v4635_v15, %v2808_v12 }
0x1bf3   : > { %v4637_v27 = vpop.eup %4636 }
0x1bf4   : > { %v2815_v28 = vmul.f32 %v4637_v27, %v2809_v22  ;;  %v2822_v29 = vmul.f32 %v4006_v20, %v2814_v24 }
0x1bf6   : > { %v2823_v10 = vmul.f32 %v4006_v20, %v2815_v28  ;;  %v2830_v14 = vadd.f32 %v4007_v30, %v2822_v29 }
0x1bf8   : > { %v2831_v31 = vadd.f32 %v4007_v30, %v2823_v10 }
0x1bfa   : > { %v2832_v32 = vpack.c.bf16 %v2831_v31, %v2830_v14 }
0x1bfc   : > { %4380 = vmatmul.mubr.msk.bf16.vlgmr.msra.gmra.mrb[48].mxu0 %vm772_vm2, %v2832_v32 }
0x1bfd   : > { %4385 = vmatprep.mubr.msk.bf16.mxu0 %vm4683_vm0, %v4682_v1 }
0x1ccf   : > { %v2895_v34 = vpop.f32.mrb[48].mxu0 }
0x1cd0   : > { %v2896_v35 = vadd.f32 %v4013_v33, %v2895_v34  ;;  %v4381_v37 = vpop.f32.mrb[49].mxu0 }
0x1cd1   : > { %v2898_v38 = vpop.f32.mrb[50].mxu0 }
0x1cd2   : > { %v2899_v41 = vadd.f32 %v4013_v33, %v2898_v38  ;;  %v4382_v42 = vpop.f32.mrb[51].mxu0  ;;  %v2902_v21 = vmul.f32 0.25, %v2896_v35 }
0x1cd4   : > { %v2903_v25 = vmul.f32 0.25, %v2899_v41  ;;  %v2905_v44 = vpack.c.bf16 %v2899_v41, %v2896_v35 }
0x1cd6   : > { %3031 = vrot.lane.b32.xlu1 %v2905_v44, %s5587_s5  ;;  %2907 = vrot.lane.b32.xlu0 %v2905_v44, %s5582_s25  ;;  %v2904_v45 = vpack.c.bf16 %v2903_v25, %v2902_v21 }
0x1cda   : > { %3029 = vrot.lane.b32.xlu1 %v2904_v45, %s5583_s29 }
0x1d48   : > { %v2908_v46 = vpop.permute.xlu0 %2907  ;;  %v3032_v48 = vpop.permute.xlu1 %3031 }
0x1d49   : > { %v2913_v47 = vsel %vm895_vm3, %v2908_v46, 0  ;;  %v3037_v49 = vsel %vm895_vm3, %v3032_v48, 0  ;;  %v4531_v48 = vld [vmem:[%s5529_s8 + $0x38] sm:$0xff]  }
0x1d4a   : > { %4384 = vmatpush3.bf16.xpose.msra.mxu0 %v2913_v47 }
0x1d4b   : > { %4395 = vmatprep.subr.bf16.mxu0 %v4682_v1 }
0x1d4c   : > { %v3030_v50 = vpop.permute.xlu1 %3029 }
0x1d51   : > { %4386 = vmatmul.mubr.msk.bf16.vlgmr.msra.gmra.mrb[52].mxu0 %vm895_vm3, %v2904_v45  ;;  %v4530_v45 = vld [vmem:[%s5529_s8 + $0x30] sm:$0xff]  }
0x1d52   : > { %4396 = vmatpush3.bf16.xpose.msra.mxu0 %v3037_v49  ;;  %4397 = vmatprep.mubr.msk.bf16.mxu0 %vm4683_vm0, %v4682_v1 }
0x1d53   : > { %4407 = vmatprep.subr.bf16.mxu0 %v4682_v1 }
0x1d59   : > { %4398 = vmatmul.mubr.msk.bf16.vlgmr.msra.gmra.mrb[56].mxu0 %vm895_vm3, %v3030_v50 }
0x1d5a   : > { %4411 = vmatprep.mubr.msk.bf16.mxu0 %vm4683_vm0, %v4682_v1  ;;  %4408 = vmatpush3.bf16.msra.mxu0 %v4530_v45  ;;  %v4039_v45 = vld [vmem:[%s5534_s13 + $0x3] ss:$0 sm:$0xff] }
0x1d5b   : > { %4409 = vmatprep.subr.bf16.mxu0 %v4682_v1 }
0x1d5e   : > { %4410 = vmatpush3.bf16.msra.mxu0 %v4531_v48 }
0x1d5f   : > { %4423 = vmatprep.subr.bf16.mxu0 %v4682_v1 }
0x1e24   : > { %v2949_v51 = vpop.f32.mrb[52].mxu0 }
0x1e25   : > { %v4387_v52 = vpop.f32.mrb[53].mxu0  ;;  %v2956_v53 = vsel %vm895_vm3, %v2949_v51, -inf }
0x1e26   : > { %2957 = vmax.xlane.f32.xlu1 %v2956_v53  ;;  %v2952_v54 = vpop.f32.mrb[54].mxu0 }
0x1e27   : > { %v4388_v56 = vpop.f32.mrb[55].mxu0  ;;  %v2959_v57 = vsel %vm895_vm3, %v2952_v54, -inf }
0x1e28   : > { %2960 = vmax.xlane.f32.xlu0 %v2959_v57  ;;  %v4026_v57 = vld [vmem:[%s5530_s9 + $0x3] ss:$0 sm:$0xff] }
0x1e2c   : > { %v3073_v59 = vpop.f32.mrb[56].mxu0 }
0x1e2d   : > { %v4399_v60 = vpop.f32.mrb[57].mxu0  ;;  %v3080_v61 = vsel %vm895_vm3, %v3073_v59, -inf }
0x1e2e   : > { %3081 = vmax.xlane.f32.xlu0 %v3080_v61  ;;  %v3076_v62 = vpop.f32.mrb[58].mxu0 }
0x1e2f   : > { %v4400_v40 = vpop.f32.mrb[59].mxu0  ;;  %v3083_v43 = vsel %vm895_vm3, %v3076_v62, -inf }
0x1e32   : > { %3084 = vmax.xlane.f32.xlu0 %v3083_v43 }
0x1eb3   : > { %v2958_v63 = vpop.xlane.xlu1 %2957 }
0x1eb4   : > { %v2962_v0 = vsub.f32 %v2949_v51, %v2958_v63 }
0x1eb5   : > { %v2961_v2 = vpop.xlane.xlu0 %2960 }
0x1eb6   : > { %v2964_v3 = vmul.f32 1.442695, %v2962_v0  ;;  %v2963_v4 = vsub.f32 %v2952_v54, %v2961_v2 }
0x1eb8   : > { %4638 = vpow2.f32 %v2964_v3  ;;  %v2966_v5 = vmul.f32 1.442695, %v2963_v4 }
0x1eba   : > { %4640 = vpow2.f32 %v2966_v5 }
0x1ebb   : > { %v3082_v6 = vpop.xlane.xlu0 %3081 }
0x1ebc   : > { %v3086_v7 = vsub.f32 %v3073_v59, %v3082_v6 }
0x1ebe   : > { %v3088_v8 = vmul.f32 1.442695, %v3086_v7 }
0x1ebf   : > { %v3085_v9 = vpop.xlane.xlu0 %3084 }
0x1ec0   : > { %4642 = vpow2.f32 %v3088_v8  ;;  %v3087_v11 = vsub.f32 %v3076_v62, %v3085_v9  ;;  %v2781_v8 = vpack.c.bf16 %v5297_v58, %v5294_v55  ;;  %v2108_v9 = vpack.c.bf16 %v5151_v39, %v5148_v36 }
0x1ec2   : > { %v4639_v13 = vpop.eup %4638  ;;  %v3090_v16 = vmul.f32 1.442695, %v3087_v11  ;;  %v4532_v11 = vld [vmem:[%s5533_s12 + $0x30] sm:$0xff]  }
0x1ec3   : > { %v2968_v17 = vsel %vm895_vm3, %v4639_v13, 0.0 }
0x1ec4   : > { %v4641_v18 = vpop.eup %4640  ;;  %4644 = vpow2.f32 %v3090_v16  ;;  %2969 = vadd.xlane.f32.xlu1 %v2968_v17 }
0x1ec5   : > { %v2971_v19 = vsel %vm895_vm3, %v4641_v18, 0.0 }
0x1ec6   : > { %2972 = vadd.xlane.f32.xlu0 %v2971_v19 }
0x1eca   : > { %v4643_v12 = vpop.eup %4642 }
0x1ecb   : > { %v3092_v15 = vsel %vm895_vm3, %v4643_v12, 0.0 }
0x1ecc   : > { %3093 = vadd.xlane.f32.xlu1 %v3092_v15 }
0x1ece   : > { %v4645_v20 = vpop.eup %4644 }
0x1ecf   : > { %v3095_v22 = vsel %vm895_vm3, %v4645_v20, 0.0 }
0x1ed0   : > { %3096 = vadd.xlane.f32.xlu0 %v3095_v22 }
0x1edd   : > { %2979 = vrot.lane.b32.xlu1 %v2905_v44, %s5584_s27 }
0x1ee6   : > { %3103 = vrot.lane.b32.xlu0 %v2905_v44, %s5585_s30 }
0x1f51   : > { %v2970_v24 = vpop.xlane.xlu1 %2969 }
0x1f52   : > { %4646 = vrcp.f32 %v2970_v24 }
0x1f53   : > { %v2973_v27 = vpop.xlane.xlu0 %2972 }
0x1f54   : > { %4648 = vrcp.f32 %v2973_v27 }
0x1f59   : > { %v3094_v28 = vpop.xlane.xlu1 %3093 }
0x1f5a   : > { %4650 = vrcp.f32 %v3094_v28 }
0x1f5c   : > { %v4647_v29 = vpop.eup %4646 }
0x1f5d   : > { %v2980_v30 = vpop.permute.xlu1 %2979  ;;  %v3097_v10 = vpop.xlane.xlu0 %3096  ;;  %v2976_v31 = vmul.f32 %v4647_v29, %v4639_v13  ;;  %v4533_v13 = vld [vmem:[%s5533_s12 + $0x38] sm:$0xff]  }
0x1f5e   : > { %v4649_v14 = vpop.eup %4648  ;;  %4652 = vrcp.f32 %v3097_v10  ;;  %4390 = vmatpush3.bf16.msra.mxu1 %v2980_v30  ;;  %v4032_v30 = vld [vmem:[%s5531_s10 + $0x3] ss:$0 sm:$0xff] }
0x1f5f   : > { %v2977_v32 = vmul.f32 %v4649_v14, %v4641_v18  ;;  %4401 = vmatprep.subr.bf16.mxu1 %v4682_v1 }
0x1f61   : > { %v3104_v33 = vpop.permute.xlu0 %3103  ;;  %v2978_v34 = vpack.c.bf16 %v2977_v32, %v2976_v31 }
0x1f63   : > { %4392 = vmatmul.mubr.msk.bf16.vlgmr.msra.gmra.mrb[52].mxu1 %vm895_vm3, %v2978_v34  ;;  %v4033_v34 = vld [vmem:[%s5532_s11 + $0x3] ss:$0 sm:$0xff] }
0x1f64   : > { %4402 = vmatpush3.bf16.msra.mxu1 %v3104_v33  ;;  %4403 = vmatprep.mubr.msk.bf16.mxu1 %vm4683_vm0, %v4682_v1  ;;  %v4651_v35 = vpop.eup %4650 }
0x1f65   : > { %4415 = vmatprep.subr.bf16.mxu1 %v4682_v1  ;;  %v3100_v38 = vmul.f32 %v4651_v35, %v4643_v12 }
0x1f68   : > { %v4653_v37 = vpop.eup %4652 }
0x1f69   : > { %v3101_v41 = vmul.f32 %v4653_v37, %v4645_v20 }
0x1f6b   : > { %v3102_v42 = vpack.c.bf16 %v3101_v41, %v3100_v38 }
0x1f6d   : > { %4404 = vmatmul.mubr.msk.bf16.vlgmr.msra.gmra.mrb[56].mxu1 %vm895_vm3, %v3102_v42  ;;  %v4534_v42 = vld [vmem:[%s5535_s14 + $0x60] sm:$0xff]  }
0x1f6e   : > { %4419 = vmatprep.mubr.msk.bf16.mxu1 %vm4683_vm0, %v4682_v1  ;;  %4416 = vmatpush3.bf16.msra.mxu1 %v4532_v11  ;;  %v4538_v11 = vld [vmem:[%s5537_s16] sm:$0xff]  }
0x1f6f   : > { %4417 = vmatprep.subr.bf16.mxu1 %v4682_v1 }
0x1f72   : > { %4418 = vmatpush3.bf16.msra.mxu1 %v4533_v13  ;;  %v4539_v13 = vld [vmem:[%s5537_s16 + $0x8] sm:$0xff]  }
0x1f73   : > { %4435 = vmatprep.subr.bf16.mxu1 %v4682_v1 }
0x2036   : > { %v3019_v21 = vpop.f32.mrb[52].mxu1 }
0x2037   : > { %v4393_v25 = vpop.f32.mrb[53].mxu1 }
0x2038   : > { %v3022_v44 = vpop.f32.mrb[54].mxu1  ;;  %v4536_v25 = vld [vmem:[%s5535_s14 + $0x70] sm:$0xff]  }
0x2039   : > { %v3026_v46 = vpack.c.bf16 %v3022_v44, %v3019_v21  ;;  %v4394_v47 = vpop.f32.mrb[55].mxu1  ;;  %v4535_v21 = vld [vmem:[%s5535_s14 + $0x68] sm:$0xff]   ;;  %v4537_v44 = vld [vmem:[%s5535_s14 + $0x78] sm:$0xff]  }
0x203b   : > { %3027 = vst.msk [vmem:[#allocation2] sm:$0xff] %vm895_vm3, %v3026_v46 }
0x2040   : > { %v3143_v49 = vpop.f32.mrb[56].mxu1 }
0x2041   : > { %v4405_v50 = vpop.f32.mrb[57].mxu1 }
0x2042   : > { %v3146_v51 = vpop.f32.mrb[58].mxu1 }
0x2043   : > { %v3150_v52 = vpack.c.bf16 %v3146_v51, %v3143_v49  ;;  %v4406_v53 = vpop.f32.mrb[59].mxu1 }
0x2045   : > { %3152 = vrot.lane.b32.xlu1 %v3150_v52, %s5586_s23  ;;  %s4690_s23 = smov 32  }
0x20b7   : > { %v3153_v54 = vpop.permute.xlu1 %3152 }
0x20b8   : > { %3155 = vst.msk [vmem:[#allocation2] sm:$0xff] %vm1142_vm4, %v3153_v54 }
0x20bf   : > { %v3156_v56 = vld [vmem:[#allocation2] sm:$0xff] }
0x20c0   : > { %4412 = vmatmul.mubr.msk.bf16.vlgmr.msra.gmra.mrb[60].mxu0 %vm772_vm2, %v3156_v56 }
0x20c1   : > { %4431 = vmatprep.mubr.msk.bf16.mxu0 %vm4683_vm0, %v4682_v1  ;;  %4424 = vmatpush3.bf16.msra.mxu0 %v4534_v42 }
0x20c2   : > { %4425 = vmatprep.subr.bf16.mxu0 %v4682_v1 }
0x20c5   : > { %4426 = vmatpush3.bf16.msra.mxu0 %v4535_v21 }
0x20c6   : > { %4427 = vmatprep.subr.bf16.mxu0 %v4682_v1 }
0x20c9   : > { %4428 = vmatpush3.bf16.msra.mxu0 %v4536_v25  ;;  %v4548_v25 = vld [vmem:[%s5541_s20] sm:$0xff]  }
0x20ca   : > { %4429 = vmatprep.subr.bf16.mxu0 %v4682_v1 }
0x20cd   : > { %4430 = vmatpush3.bf16.msra.mxu0 %v4537_v44  ;;  %v4549_v44 = vld [vmem:[%s5541_s20 + $0x8] sm:$0xff]  }
0x20ce   : > { %4455 = vmatprep.subr.bf16.mxu0 %v4682_v1 }
0x2193   : > { %v3219_v59 = vpop.f32.mrb[60].mxu0 }
0x2194   : > { %v3220_v60 = vadd.f32 %v4026_v57, %v3219_v59  ;;  %v4413_v61 = vpop.f32.mrb[61].mxu0 }
0x2195   : > { %v3222_v62 = vpop.f32.mrb[62].mxu0 }
0x2196   : > { %v5380_v40 = vadd.f32 %v3220_v60, %v5294_v55  ;;  %v3223_v43 = vadd.f32 %v4026_v57, %v3222_v62  ;;  %v4414_v63 = vpop.f32.mrb[63].mxu0 }
0x2198   : > { %v5383_v0 = vadd.f32 %v3223_v43, %v5297_v58  ;;  %v3232_v2 = vsel %vm772_vm2, %v5380_v40, 0.0  ;;  %v3240_v5 = vmul.f32 %v5380_v40, %v5380_v40 }
0x2199   : > { %3233 = vadd.xlane.f32.xlu1 %v3232_v2 }
0x219a   : > { %v3235_v3 = vsel %vm772_vm2, %v5383_v0, 0.0  ;;  %v3241_v4 = vmul.f32 %v5383_v0, %v5383_v0  ;;  %v3242_v7 = vsel %vm772_vm2, %v3240_v5, 0.0 }
0x219b   : > { %3236 = vadd.xlane.f32.xlu0 %v3235_v3 }
0x219c   : > { %v3245_v6 = vsel %vm772_vm2, %v3241_v4, 0.0 }
0x219d   : > { %3246 = vadd.xlane.f32.xlu1 %v3245_v6 }
0x219f   : > { %3243 = vadd.xlane.f32.xlu0 %v3242_v7 }
0x21ae   : > { %3459 = vrot.lane.b32.xlu1 %v2781_v8, %s5584_s27  ;;  %s5589_s27 = sld [smem:[#allocation12_spill]] }
0x21b5   : > { %3456 = vrot.lane.b32.xlu0 %v2108_v9, %s4690_s23 }
0x2226   : > { %v3234_v55 = vpop.xlane.xlu1 %3233 }
0x2227   : > { %v3238_v16 = vmul.f32 0.03125, %v3234_v55  ;;  %v4540_v55 = vld [vmem:[%s5537_s16 + $0x10] sm:$0xff]  }
0x2228   : > { %v3237_v58 = vpop.xlane.xlu0 %3236 }
0x2229   : > { %v3239_v36 = vmul.f32 0.03125, %v3237_v58  ;;  %v3250_v12 = vmul.f32 %v3238_v16, %v3238_v16  ;;  %v3254_v10 = vsub.f32 %v5380_v40, %v3238_v16  ;;  %v4541_v58 = vld [vmem:[%s5537_s16 + $0x18] sm:$0xff]   ;;  %v4542_v16 = vld [vmem:[%s5537_s16 + $0x20] sm:$0xff]  }
0x222a   : > { %v3247_v39 = vpop.xlane.xlu1 %3246 }
0x222b   : > { %v3251_v17 = vmul.f32 %v3239_v36, %v3239_v36  ;;  %v3249_v18 = vmul.f32 0.03125, %v3247_v39  ;;  %v3255_v28 = vsub.f32 %v5383_v0, %v3239_v36  ;;  %v4543_v36 = vld [vmem:[%s5537_s16 + $0x28] sm:$0xff]   ;;  %v4544_v39 = vld [vmem:[%s5537_s16 + $0x30] sm:$0xff]  }
0x222c   : > { %v3244_v19 = vpop.xlane.xlu0 %3243 }
0x222d   : > { %v3253_v15 = vsub.f32 %v3249_v18, %v3251_v17  ;;  %v3248_v20 = vmul.f32 0.03125, %v3244_v19  ;;  %v4545_v17 = vld [vmem:[%s5537_s16 + $0x38] sm:$0xff]   ;;  %v4052_v18 = vld [vmem:[%s5536_s15 + $0x3] ss:$0 sm:$0xff] }
0x222f   : > { %v3257_v22 = vadd.f32 1e-06, %v3253_v15  ;;  %v3252_v24 = vsub.f32 %v3248_v20, %v3250_v12 }
0x2231   : > { %4654 = vrsqrt.f32 %v3257_v22  ;;  %v3256_v27 = vadd.f32 1e-06, %v3252_v24 }
0x2233   : > { %4656 = vrsqrt.f32 %v3256_v27 }
0x223b   : > { %v4655_v29 = vpop.eup %4654 }
0x223c   : > { %v3261_v14 = vmul.f32 %v4655_v29, %v3255_v28 }
0x223d   : > { %v4657_v31 = vpop.eup %4656 }
0x223e   : > { %v3260_v32 = vmul.f32 %v4657_v31, %v3254_v10  ;;  %v3269_v33 = vmul.f32 %v4032_v30, %v3261_v14  ;;  %v1435_v10 = vpack.c.bf16 %v5005_v26, %v5002_v23  ;;  %v3460_v14 = vpop.permute.xlu1 %3459  ;;  %v4547_v23 = vld [vmem:[%s5539_s18 + $0x8] sm:$0xff]   ;;  %v4058_v26 = vld [vmem:[%s5538_s17] ss:$0 sm:$0xff] }
0x2240   : > { %v3268_v35 = vmul.f32 %v4032_v30, %v3260_v32  ;;  %v3277_v38 = vadd.f32 %v4033_v34, %v3269_v33  ;;  %v3457_v30 = vpop.permute.xlu0 %3456 }
0x2241   : > { %v3466_v31 = vsel %vm772_vm2, %v1435_v10, %v3457_v30  ;;  %v4691_v30 = vmov 0  }
0x2242   : > { %v3276_v37 = vadd.f32 %v4033_v34, %v3268_v35  ;;  %v3468_v32 = vsel %vm1388_vm5, %v3466_v31, %v3460_v14  ;;  %4490 = vset.pattern.permute.xlu1 %v4691_v30  ;;  %4491 = vset.pattern.permute.xlu0 %v4691_v30 }
0x2244   : > { %v3278_v41 = vpack.c.bf16 %v3277_v38, %v3276_v37 }
0x2246   : > { %4420 = vmatmul.mubr.msk.bf16.vlgmr.msra.gmra.mrb[60].mxu1 %vm772_vm2, %v3278_v41 }
0x2247   : > { %4451 = vmatprep.mubr.msk.bf16.mxu1 %vm4683_vm0, %v4682_v1  ;;  %4436 = vmatpush3.bf16.msra.mxu1 %v4538_v11 }
0x2248   : > { %4437 = vmatprep.subr.bf16.mxu1 %v4682_v1 }
0x224b   : > { %4438 = vmatpush3.bf16.msra.mxu1 %v4539_v13 }
0x224c   : > { %4439 = vmatprep.subr.bf16.mxu1 %v4682_v1 }
0x224f   : > { %4440 = vmatpush3.bf16.msra.mxu1 %v4540_v55 }
0x2250   : > { %4441 = vmatprep.subr.bf16.mxu1 %v4682_v1 }
0x2253   : > { %4442 = vmatpush3.bf16.msra.mxu1 %v4541_v58 }
0x2254   : > { %4443 = vmatprep.subr.bf16.mxu1 %v4682_v1 }
0x2257   : > { %4444 = vmatpush3.bf16.msra.mxu1 %v4542_v16 }
0x2258   : > { %4445 = vmatprep.subr.bf16.mxu1 %v4682_v1 }
0x225b   : > { %4446 = vmatpush3.bf16.msra.mxu1 %v4543_v36 }
0x225c   : > { %4447 = vmatprep.subr.bf16.mxu1 %v4682_v1 }
0x225f   : > { %4448 = vmatpush3.bf16.msra.mxu1 %v4544_v39 }
0x2260   : > { %4449 = vmatprep.subr.bf16.mxu1 %v4682_v1 }
0x2263   : > { %4450 = vmatpush3.bf16.msra.mxu1 %v4545_v17 }
0x2319   : > { %v3341_v46 = vpop.f32.mrb[60].mxu1 }
0x231a   : > { %v3342_v47 = vadd.f32 %v4039_v45, %v3341_v46  ;;  %v4421_v48 = vpop.f32.mrb[61].mxu1 }
0x231b   : > { %v3344_v49 = vpop.f32.mrb[62].mxu1 }
0x231c   : > { %v3348_v50 = vmul.f32 %v3342_v47, %v3342_v47  ;;  %v3345_v51 = vadd.f32 %v4039_v45, %v3344_v49  ;;  %v4422_v52 = vpop.f32.mrb[63].mxu1  ;;  %v4067_v45 = vld [vmem:[%s5540_s19] ss:$0 sm:$0xff] }
0x231e   : > { %v3350_v53 = vmul.f32 %v3348_v50, %v3342_v47  ;;  %v3349_v54 = vmul.f32 %v3345_v51, %v3345_v51 }
0x2320   : > { %v3352_v56 = vmul.f32 0.044715, %v3350_v53  ;;  %v3351_v57 = vmul.f32 %v3349_v54, %v3345_v51 }
0x2322   : > { %v3354_v59 = vadd.f32 %v3352_v56, %v3342_v47  ;;  %v3353_v60 = vmul.f32 0.044715, %v3351_v57 }
0x2324   : > { %v3356_v61 = vmul.f32 0.7978846, %v3354_v59  ;;  %v3355_v62 = vadd.f32 %v3353_v60, %v3345_v51 }
0x2326   : > { %4658 = vtanh.f32 %v3356_v61  ;;  %v3357_v43 = vmul.f32 0.7978846, %v3355_v62 }
0x2328   : > { %4660 = vtanh.f32 %v3357_v43 }
0x2330   : > { %v4659_v63 = vpop.eup %4658 }
0x2331   : > { %v3360_v2 = vadd.f32 1.0, %v4659_v63 }
0x2332   : > { %v4661_v3 = vpop.eup %4660 }
0x2333   : > { %v3362_v4 = vmul.f32 0.5, %v3360_v2  ;;  %v3361_v5 = vadd.f32 1.0, %v4661_v3 }
0x2335   : > { %v3363_v6 = vmul.f32 0.5, %v3361_v5  ;;  %v3364_v7 = vmul.f32 %v3362_v4, %v3342_v47 }
0x2337   : > { %v3365_v8 = vmul.f32 %v3363_v6, %v3345_v51 }
0x2339   : > { %v3366_v9 = vpack.c.bf16 %v3365_v8, %v3364_v7 }
0x233b   : > { %4432 = vmatmul.mubr.msk.bf16.vlgmr.msra.gmra.mrb[64].mxu0 %vm1388_vm5, %v3366_v9  ;;  %v4071_v9 = vld [vmem:[%s5542_s21] ss:$0 sm:$0xff] }
0x233c   : > { %4459 = vmatprep.mubr.msk.bf16.mxu0 %vm4683_vm0, %v4682_v1 }
0x240e   : > { %v3445_v19 = vpop.f32.mrb[64].mxu0 }
0x240f   : > { %v3446_v12 = vadd.f32 %v4052_v18, %v3445_v19  ;;  %v4433_v15 = vpop.f32.mrb[65].mxu0 }
0x2410   : > { %v3448_v20 = vpop.f32.mrb[66].mxu0 }
0x2411   : > { %v3449_v22 = vadd.f32 %v4052_v18, %v3448_v20  ;;  %v4434_v24 = vpop.f32.mrb[67].mxu0  ;;  %v3452_v27 = vadd.f32 %v3446_v12, %v5380_v40  ;;  %v4546_v40 = vld [vmem:[%s5539_s18] sm:$0xff]  }
0x2412   : > { %4456 = vmatpush3.bf16.msra.mxu0 %v4546_v40  ;;  %v4692_v40 = vmov 1  }
0x2413   : > { %v3453_v28 = vadd.f32 %v3449_v22, %v5383_v0  ;;  %4457 = vmatprep.subr.bf16.mxu0 %v4682_v1 }
0x2415   : > { %v3454_v29 = vpack.c.bf16 %v3453_v28, %v3452_v27 }
0x2416   : > { %4458 = vmatpush3.bf16.msra.mxu0 %v4547_v23  ;;  %v3770_v23 = vlaneseq }
0x2417   : > { %3462 = vrot.lane.b32.xlu1 %v3454_v29, %s5582_s25  ;;  %4463 = vmatprep.subr.bf16.mxu0 %v4682_v1  ;;  %s3863_s25 = sshll.u32 %s5588_s3, 1 }
0x2418   : > { %s681_s29 = scalar_lea.vmem %s5589_s27, %s3863_s25 }
0x2489   : > { %v3463_v33 = vpop.permute.xlu1 %3462 }
0x248a   : > { %v3471_v34 = vsel %vm3469_vm6, %v3468_v32, %v3463_v33 }
0x248b   : > { %4452 = vmatmul.mubr.bf16.vlgmr.msra.gmra.mrb[64].mxu1 %v3471_v34 }
0x255e   : > { %v3578_v0 = vpop.f32.mrb[64].mxu1 }
0x255f   : > { %v4453_v35 = vpop.f32.mrb[65].mxu1  ;;  %v3579_v38 = vadd.f32 %v4058_v26, %v3578_v0  ;;  %v3773_v0 = vshrl.u32 %v3770_v23, 7 }
0x2560   : > { %v3581_v37 = vpop.f32.mrb[66].mxu1 }
0x2561   : > { %v3582_v41 = vadd.f32 %v4058_v26, %v3581_v37  ;;  %v4454_v42 = vpop.f32.mrb[67].mxu1  ;;  %v3771_v26 = vand.u32 127, %v3770_v23 }
0x2563   : > { %v3585_v21 = vpack.c.bf16 %v3582_v41, %v3579_v38  ;;  %v3776_v35 = vadd.s32 4294967288, %v3771_v26  ;;  %v3774_v38 = vsub.s32 %v3771_v26, %v3773_v0 }
0x2565   : > { %4460 = vmatmul.mubr.msk.bf16.vlgmr.msra.gmra.mrb[68].mxu0 %vm772_vm2, %v3585_v21  ;;  %v3779_v41 = vsub.s32 %v3776_v35, %v3773_v0 }
0x2566   : > { %4467 = vmatprep.mubr.msk.bf16.mxu0 %vm4683_vm0, %v4682_v1  ;;  %4464 = vmatpush3.bf16.msra.mxu0 %v4548_v25 }
0x2567   : > { %4465 = vmatprep.subr.bf16.mxu0 %v4682_v1 }
0x256a   : > { %4466 = vmatpush3.bf16.msra.mxu0 %v4549_v44 }
0x2638   : > { %v3646_v46 = vpop.f32.mrb[68].mxu0 }
0x2639   : > { %v3647_v47 = vadd.f32 %v4067_v45, %v3646_v46  ;;  %v4461_v48 = vpop.f32.mrb[69].mxu0 }
0x263a   : > { %v3649_v49 = vpop.f32.mrb[70].mxu0 }
0x263b   : > { %v3653_v50 = vmul.f32 %v3647_v47, %v3647_v47  ;;  %v3650_v51 = vadd.f32 %v4067_v45, %v3649_v49  ;;  %v4462_v52 = vpop.f32.mrb[71].mxu0 }
0x263d   : > { %v3655_v53 = vmul.f32 %v3653_v50, %v3647_v47  ;;  %v3654_v54 = vmul.f32 %v3650_v51, %v3650_v51 }
0x263f   : > { %v3657_v56 = vmul.f32 0.044715, %v3655_v53  ;;  %v3656_v1 = vmul.f32 %v3654_v54, %v3650_v51 }
0x2641   : > { %v3659_v57 = vadd.f32 %v3657_v56, %v3647_v47  ;;  %v3658_v59 = vmul.f32 0.044715, %v3656_v1 }
0x2643   : > { %v3661_v60 = vmul.f32 0.7978846, %v3659_v57  ;;  %v3660_v61 = vadd.f32 %v3658_v59, %v3650_v51 }
0x2645   : > { %4662 = vtanh.f32 %v3661_v60  ;;  %v3662_v62 = vmul.f32 0.7978846, %v3660_v61 }
0x2647   : > { %4664 = vtanh.f32 %v3662_v62 }
0x264f   : > { %v4663_v43 = vpop.eup %4662 }
0x2650   : > { %v3665_v63 = vadd.f32 1.0, %v4663_v43 }
0x2651   : > { %v4665_v2 = vpop.eup %4664 }
0x2652   : > { %v3667_v3 = vmul.f32 0.5, %v3665_v63  ;;  %v3666_v4 = vadd.f32 1.0, %v4665_v2 }
0x2654   : > { %v3668_v5 = vmul.f32 0.5, %v3666_v4  ;;  %v3669_v6 = vmul.f32 %v3667_v3, %v3647_v47 }
0x2656   : > { %v3670_v7 = vmul.f32 %v3668_v5, %v3650_v51 }
0x2658   : > { %v3671_v8 = vpack.c.bf16 %v3670_v7, %v3669_v6 }
0x265a   : > { %4468 = vmatmul.mubr.msk.bf16.vlgmr.msra.gmra.mrb[72].mxu0 %vm772_vm2, %v3671_v8 }
0x272d   : > { %v3732_v11 = vpop.f32.mrb[72].mxu0 }
0x272e   : > { %v3733_v13 = vadd.f32 %v4071_v9, %v3732_v11  ;;  %v4469_v55 = vpop.f32.mrb[73].mxu0 }
0x272f   : > { %v3735_v58 = vpop.f32.mrb[74].mxu0 }
0x2730   : > { %v3736_v16 = vadd.f32 %v4071_v9, %v3735_v58  ;;  %v4470_v36 = vpop.f32.mrb[75].mxu0  ;;  %v3740_v39 = vsel %vm3739_vm7, %v3733_v13, -inf }
0x2731   : > { %3741 = vmax.xlane.f32.xlu1 %v3740_v39 }
0x2732   : > { %v3743_v17 = vsel %vm3739_vm7, %v3736_v16, -inf }
0x2733   : > { %3744 = vmax.xlane.f32.xlu0 %v3743_v17 }
0x27be   : > { %v3742_v18 = vpop.xlane.xlu1 %3741 }
0x27bf   : > { %v3746_v19 = vsub.f32 %v3733_v13, %v3742_v18 }
0x27c0   : > { %v3745_v12 = vpop.xlane.xlu0 %3744 }
0x27c1   : > { %v3748_v15 = vmul.f32 1.442695, %v3746_v19  ;;  %v3747_v20 = vsub.f32 %v3736_v16, %v3745_v12 }
0x27c3   : > { %4666 = vpow2.f32 %v3748_v15  ;;  %v3750_v22 = vmul.f32 1.442695, %v3747_v20 }
0x27c5   : > { %4668 = vpow2.f32 %v3750_v22 }
0x27cd   : > { %v4667_v24 = vpop.eup %4666 }
0x27ce   : > { %v3752_v27 = vsel %vm3739_vm7, %v4667_v24, 0.0 }
0x27cf   : > { %v4669_v28 = vpop.eup %4668  ;;  %3753 = vadd.xlane.f32.xlu0 %v3752_v27 }
0x27d0   : > { %v3755_v29 = vsel %vm3739_vm7, %v4669_v28, 0.0 }
0x27d3   : > { %3756 = vadd.xlane.f32.xlu0 %v3755_v29 }
0x285c   : > { %v3754_v10 = vpop.xlane.xlu0 %3753 }
0x285d   : > { %4670 = vrcp.f32 %v3754_v10 }
0x2860   : > { %v3757_v14 = vpop.xlane.xlu0 %3756 }
0x2861   : > { %4672 = vrcp.f32 %v3757_v14 }
0x2867   : > { %v4671_v31 = vpop.eup %4670 }
0x2868   : > { %v3759_v32 = vmul.f32 %v4671_v31, %v4667_v24 }
0x286a   : > { %3765 = vperm.xlu1 %4490, %v3759_v32  }
0x286b   : > { %v4673_v33 = vpop.eup %4672 }
0x286c   : > { %v3761_v34 = vmul.f32 %v4673_v33, %v4669_v28 }
0x286e   : > { %4492 = vset.pattern.permute.xlu1 %v4692_v40  ;;  %3768 = vperm.xlu0 %4491, %v3761_v34  }
0x286f   : > { %3787 = vperm.xlu1 %4492, %v3759_v32  }
0x2872   : > { %4493 = vset.pattern.permute.xlu0 %v4692_v40 }
0x2873   : > { %3790 = vperm.xlu1 %4492, %v3761_v34  }
0x28e9   : > { %v3766_v37 = vpop.permute.xlu1 %3765 }
0x28ea   : > { %v3775_v21 = vrot.slane %v3766_v37, %v3774_v38 }
0x28ed   : > { %v3769_v42 = vpop.permute.xlu0 %3768 }
0x28ee   : > { %v3780_v25 = vrot.slane %v3769_v42, %v3779_v41  ;;  %v3788_v44 = vpop.permute.xlu1 %3787 }
0x28ef   : > { %v3795_v47 = vrot.slane %v3788_v44, %v3774_v38 }
0x28f0   : > { %v3782_v45 = vsel %vm3781_vm8, %v3780_v25, %v3775_v21 }
0x28f1   : > { %3785 = vst.msk [vmem:[%s681_s29] sm:$0x1] %vm3784_vm9, %v3782_v45 }
0x28f2   : > { %v3791_v46 = vpop.permute.xlu1 %3790 }
0x28f3   : > { %v3799_v48 = vrot.slane %v3791_v46, %v3779_v41 }
0x28f5   : > { %v3800_v49 = vsel %vm3781_vm8, %v3799_v48, %v3795_v47 }
0x28f6   : > { %3802 = vst.msk [vmem:[%s681_s29 + $0x1] sm:$0x1] %vm3784_vm9, %v3800_v49 }
0x28f7 PF: > { %s5590_s30 = sld [smem:[#allocation3_spill]] }
0x28fd   : > { %s32_s3 = sadd.s32 1, %s5590_s30  }
0x28fe   : > { %p29_p4 = scmp.ge.s32.totalorder %s32_s3, 14  }
0x2900   :  { %31 = sbr.rel (!%p29_p4) target bundleno = 9 (0x9), region = 174 }

</bundles_post_ra>
